<compile_context>
chip_gen: v6e
topology: v6e:2x2x1
jax: 0.10.0
libtpu: 0.0.40
codegen_flags: <defaults>
</compile_context>

<pallas_src>
import functools

import jax
import jax.numpy as jnp
from jax.experimental import pallas as pl
from jax.experimental.pallas import tpu as pltpu


# ----------------------------------------------------------------------------
# Conv2d: direct (no HBM im2col) row-wise conv kernel
# ----------------------------------------------------------------------------
def _conv_row_kernel(*refs, kh, kw, wo, apply_relu):
    """One output row (Wo, Tco) for one (cout_tile, n, ho) grid point.

    refs = kh shifted input-row refs (1,1,Wp,Cin) f32
           + weight (kh*kw, Cin, Tco) bf16 + bias (1, Tco) f32
           + output (1,1,Wo,Tco) f32.
    """
    x_refs = refs[:kh]
    w_ref, b_ref, o_ref = refs[kh], refs[kh + 1], refs[kh + 2]
    tco = o_ref.shape[-1]

    acc = jnp.zeros((wo, tco), jnp.float32)
    for di in range(kh):
        row = x_refs[di][0, 0, :, :]                          # (Wp, Cin) f32
        row_bf = row.astype(jnp.bfloat16)
        for dj in range(kw):
            xs = row_bf[dj:dj + wo, :]                        # (Wo, Cin) bf16
            wk = w_ref[di * kw + dj, :, :]                    # (Cin, Tco) bf16
            acc = acc + jnp.dot(xs, wk, preferred_element_type=jnp.float32)

    y = acc + b_ref[...]                                      # (1,Tco) broadcast
    if apply_relu:
        y = jnp.maximum(y, 0.0)
    o_ref[0, 0, :, :] = y.astype(o_ref.dtype)


def conv2d_pallas(x, w3, bias2d, kh, kw, pad, relu):
    """x: (N,H,W,Cin) f32.  w3: (kh*kw, Cin, Cout) bf16 (pre-reshaped).
    bias2d: (1, Cout) f32.  Returns (N,Ho,Wo,Cout) f32 (stride 1 conv)."""
    n, h, w, cin = x.shape
    cout = w3.shape[-1]
    xp = jnp.pad(x, ((0, 0), (pad, pad), (pad, pad), (0, 0))) if pad else x
    hp, wp = h + 2 * pad, w + 2 * pad
    ho, wo = hp - kh + 1, wp - kw + 1

    # Tile Cout so the resident weight block stays small (v5e / v7x VMEM) and
    # matches the 256-wide MXU on v6e/v7x.
    tco = 256 if (cout > 256 and cout % 256 == 0) else cout
    n_co = cout // tco

    kernel = functools.partial(_conv_row_kernel, kh=kh, kw=kw, wo=wo,
                               apply_relu=relu)

    in_specs = [
        pl.BlockSpec((1, 1, wp, cin),
                     (lambda ci, ni, hi, di=di: (ni, hi + di, 0, 0)))
        for di in range(kh)
    ]
    in_specs += [
        pl.BlockSpec((kh * kw, cin, tco), lambda ci, ni, hi: (0, 0, ci)),
        pl.BlockSpec((1, tco), lambda ci, ni, hi: (0, ci)),
    ]

    return pl.pallas_call(
        kernel,
        out_shape=jax.ShapeDtypeStruct((n, ho, wo, cout), jnp.float32),
        grid=(n_co, n, ho),
        in_specs=in_specs,
        out_specs=pl.BlockSpec((1, 1, wo, tco),
                               lambda ci, ni, hi: (ni, hi, 0, ci)),
        compiler_params=pltpu.CompilerParams(
            dimension_semantics=("parallel", "parallel", "parallel")),
    )(*([xp] * kh), w3, bias2d)


# ----------------------------------------------------------------------------
# MaxPool2d (kernel = stride = (ph, pw)), single HBM pass
# ----------------------------------------------------------------------------
def _maxpool_kernel(x_ref, o_ref, *, ph, pw, c):
    m = x_ref[0, 0, :, :]                                     # (Wo, pw*C)
    for i in range(1, ph):
        m = jnp.maximum(m, x_ref[0, i, :, :])
    if pw == 1:
        r = m
    else:
        r = m[:, 0:c]
        for j in range(1, pw):
            r = jnp.maximum(r, m[:, j * c:(j + 1) * c])
    o_ref[0, 0, :, :] = r


def maxpool_pallas(x, ph, pw):
    """MaxPool2d((ph,pw), stride=(ph,pw)), NHWC, floor mode (PyTorch default)."""
    n, h, w, c = x.shape
    ho, wo = h // ph, w // pw
    # Fold the pw window into the lane axis (free reshape in HBM).
    xr = x[:, :ho * ph, :wo * pw, :].reshape(n, ho * ph, wo, pw * c)
    kernel = functools.partial(_maxpool_kernel, ph=ph, pw=pw, c=c)
    return pl.pallas_call(
        kernel,
        out_shape=jax.ShapeDtypeStruct((n, ho, wo, c), jnp.float32),
        grid=(n, ho),
        in_specs=[pl.BlockSpec((1, ph, wo, pw * c),
                               lambda ni, hi: (ni, hi, 0, 0))],
        out_specs=pl.BlockSpec((1, 1, wo, c), lambda ni, hi: (ni, hi, 0, 0)),
        compiler_params=pltpu.CompilerParams(
            dimension_semantics=("parallel", "parallel")),
    )(xr)


# ----------------------------------------------------------------------------
# Per-channel affine + ReLU (used for BatchNorm normalize)
# ----------------------------------------------------------------------------
def _affine_relu_kernel(x_ref, s_ref, b_ref, o_ref):
    o_ref[...] = jnp.maximum(x_ref[...] * s_ref[...] + b_ref[...], 0.0)


def affine_relu_pallas(x2d, scale, shift):
    """x2d: (M, C); out = relu(x*scale + shift), per-channel scale/shift."""
    m, c = x2d.shape
    tm = 512 if m >= 512 else ((m + 7) // 8) * 8      # big row tiles (mem-bound)
    mp = ((m + tm - 1) // tm) * tm
    xp = jnp.pad(x2d, ((0, mp - m), (0, 0))) if mp != m else x2d
    out = pl.pallas_call(
        _affine_relu_kernel,
        out_shape=jax.ShapeDtypeStruct((mp, c), jnp.float32),
        grid=(mp // tm,),
        in_specs=[pl.BlockSpec((tm, c), lambda i: (i, 0)),
                  pl.BlockSpec((1, c), lambda i: (0, 0)),
                  pl.BlockSpec((1, c), lambda i: (0, 0))],
        out_specs=pl.BlockSpec((tm, c), lambda i: (i, 0)),
        compiler_params=pltpu.CompilerParams(
            dimension_semantics=("parallel",)),
    )(xp, scale, shift)
    return out[:m]


def batchnorm_relu_pallas(x, gamma, beta, eps=1e-5):
    """PyTorch BatchNorm2d training-mode semantics (batch stats, biased var)."""
    # TODO(synk): fuse the per-channel sum / sum-of-squares into the preceding
    # conv kernel's epilogue (resident accumulator outputs) to save one HBM
    # read pass; kept as tiny plain-JAX glue here.
    n, h, w, c = x.shape
    xf = x.reshape(-1, c)
    mean = jnp.mean(xf, axis=0)
    var = jnp.mean(jnp.square(xf - mean), axis=0)
    scale = (gamma / jnp.sqrt(var + eps)).reshape(1, c).astype(jnp.float32)
    shift = (beta.reshape(1, c) - mean.reshape(1, c) * scale).astype(jnp.float32)
    out = affine_relu_pallas(xf, scale, shift)
    return out.reshape(n, h, w, c)


# ----------------------------------------------------------------------------
# Parameters
# ----------------------------------------------------------------------------
def init_params(key, input_channel, output_channel):
    oc = [output_channel // 8, output_channel // 4, output_channel // 2,
          output_channel]
    keys = jax.random.split(key, 8)

    def conv_w(k, cout, cin, kh, kw):
        std = (2.0 / (cin * kh * kw)) ** 0.5
        return std * jax.random.normal(k, (cout, cin, kh, kw), jnp.float32)

    p = {
        "conv0_w": conv_w(keys[0], oc[0], input_channel, 3, 3),
        "conv0_b": 0.01 * jax.random.normal(keys[0], (oc[0],), jnp.float32),
        "conv1_w": conv_w(keys[1], oc[1], oc[0], 3, 3),
        "conv1_b": 0.01 * jax.random.normal(keys[1], (oc[1],), jnp.float32),
        "conv2_w": conv_w(keys[2], oc[2], oc[1], 3, 3),
        "conv2_b": 0.01 * jax.random.normal(keys[2], (oc[2],), jnp.float32),
        "conv3_w": conv_w(keys[3], oc[2], oc[2], 3, 3),
        "conv3_b": 0.01 * jax.random.normal(keys[3], (oc[2],), jnp.float32),
        "conv4_w": conv_w(keys[4], oc[3], oc[2], 3, 3),          # bias=False
        "bn4_g": jnp.ones((oc[3],), jnp.float32),
        "bn4_b": jnp.zeros((oc[3],), jnp.float32),
        "conv5_w": conv_w(keys[5], oc[3], oc[3], 3, 3),          # bias=False
        "bn5_g": jnp.ones((oc[3],), jnp.float32),
        "bn5_b": jnp.zeros((oc[3],), jnp.float32),
        "conv6_w": conv_w(keys[6], oc[3], oc[3], 2, 2),
        "conv6_b": 0.01 * jax.random.normal(keys[6], (oc[3],), jnp.float32),
        "oc": oc,
    }
    return p


def prepare_params(p):
    """One-time layout prep: (Cout,Cin,kh,kw) -> (kh*kw,Cin,Cout) bf16 weights,
    biases -> (1,Cout) f32 (done once, not per forward call)."""
    def wmat(w):
        cout, cin, kh, kw = w.shape
        return (jnp.transpose(w, (2, 3, 1, 0))
                .reshape(kh * kw, cin, cout).astype(jnp.bfloat16))

    def b2d(b, cout):
        if b is None:
            return jnp.zeros((1, cout), jnp.float32)
        return b.reshape(1, cout).astype(jnp.float32)

    oc = p["oc"]
    return {
        "w0": wmat(p["conv0_w"]), "b0": b2d(p["conv0_b"], oc[0]),
        "w1": wmat(p["conv1_w"]), "b1": b2d(p["conv1_b"], oc[1]),
        "w2": wmat(p["conv2_w"]), "b2": b2d(p["conv2_b"], oc[2]),
        "w3": wmat(p["conv3_w"]), "b3": b2d(p["conv3_b"], oc[2]),
        "w4": wmat(p["conv4_w"]), "b4": b2d(None, oc[3]),
        "w5": wmat(p["conv5_w"]), "b5": b2d(None, oc[3]),
        "w6": wmat(p["conv6_w"]), "b6": b2d(p["conv6_b"], oc[3]),
        "bn4_g": p["bn4_g"], "bn4_b": p["bn4_b"],
        "bn5_g": p["bn5_g"], "bn5_b": p["bn5_b"],
    }


# ----------------------------------------------------------------------------
# VGG_FeatureExtractor forward
# ----------------------------------------------------------------------------
def vgg_feature_extractor(x_nchw, pp):
    x = jnp.transpose(x_nchw, (0, 2, 3, 1)).astype(jnp.float32)   # NCHW -> NHWC

    x = conv2d_pallas(x, pp["w0"], pp["b0"], 3, 3, 1, relu=True)
    x = maxpool_pallas(x, 2, 2)

    x = conv2d_pallas(x, pp["w1"], pp["b1"], 3, 3, 1, relu=True)
    x = maxpool_pallas(x, 2, 2)

    x = conv2d_pallas(x, pp["w2"], pp["b2"], 3, 3, 1, relu=True)
    x = conv2d_pallas(x, pp["w3"], pp["b3"], 3, 3, 1, relu=True)
    x = maxpool_pallas(x, 2, 1)

    x = conv2d_pallas(x, pp["w4"], pp["b4"], 3, 3, 1, relu=False)
    x = batchnorm_relu_pallas(x, pp["bn4_g"], pp["bn4_b"])
    x = conv2d_pallas(x, pp["w5"], pp["b5"], 3, 3, 1, relu=False)
    x = batchnorm_relu_pallas(x, pp["bn5_g"], pp["bn5_b"])
    x = maxpool_pallas(x, 2, 1)

    x = conv2d_pallas(x, pp["w6"], pp["b6"], 2, 2, 0, relu=True)

    return jnp.transpose(x, (0, 3, 1, 2))                          # NHWC -> NCHW


if __name__ == "__main__":
    key = jax.random.PRNGKey(0)
    k_x, k_p = jax.random.split(key)

    batch, input_channel, H, W = 2, 4, 32, 16
    output_channel = 64        # small synthetic version of the 512-wide module

    x = jax.random.normal(k_x, (batch, input_channel, H, W), jnp.float32)
    params = init_params(k_p, input_channel, output_channel)
    pp = prepare_params(params)

    fwd = jax.jit(vgg_feature_extractor)
    out = jax.block_until_ready(fwd(x, pp))

    # Expected: N x output_channel x (H/16 - 1) x (W/4 - 1) = (2, 64, 1, 3)
    assert out.shape == (batch, output_channel, H // 16 - 1, W // 4 - 1), out.shape
    assert bool(jnp.all(jnp.isfinite(out)))
    print("KERNEL_OK")
</pallas_src>

<mosaic_0001>
module attributes {stable_mosaic.version = 11 : i64} {
  func.func @_conv_row_kernel(%arg0: i32, %arg1: i32, %arg2: i32, %arg3: memref<1x1x18x4xf32, #tpu.memory_space<vmem>>, %arg4: memref<1x1x18x4xf32, #tpu.memory_space<vmem>>, %arg5: memref<1x1x18x4xf32, #tpu.memory_space<vmem>>, %arg6: memref<9x4x8xbf16, #tpu.memory_space<vmem>>, %arg7: memref<1x8xf32, #tpu.memory_space<vmem>>, %arg8: memref<1x1x16x8xf32, #tpu.memory_space<vmem>>) attributes {dimension_semantics = [#tpu.dimension_semantics<parallel>, #tpu.dimension_semantics<parallel>, #tpu.dimension_semantics<parallel>], iteration_bounds = array<i64: 1, 2, 32>, scalar_prefetch = 0 : i64, scratch_operands = 0 : i64, tpu.core_type = #tpu.core_type<tc>, window_params = [{transform_indices = @transform_0, window_bounds = array<i64: 1, 1, 18, 4>}, {transform_indices = @transform_1, window_bounds = array<i64: 1, 1, 18, 4>}, {transform_indices = @transform_2, window_bounds = array<i64: 1, 1, 18, 4>}, {transform_indices = @transform_3, window_bounds = array<i64: 9, 4, 8>}, {transform_indices = @transform_4, window_bounds = array<i64: 1, 8>}, {transform_indices = @transform_5, window_bounds = array<i64: 1, 1, 16, 8>}]} {
    %cst = arith.constant 0.000000e+00 : f32
    %0 = vector.broadcast %cst : f32 to vector<16x8xf32>
    %c0 = arith.constant 0 : index
    %c0_0 = arith.constant 0 : index
    %c0_1 = arith.constant 0 : index
    %c0_2 = arith.constant 0 : index
    %1 = vector.load %arg3[%c0, %c0_0, %c0_1, %c0_2] : memref<1x1x18x4xf32, #tpu.memory_space<vmem>>, vector<1x1x18x4xf32>
    %2 = vector.shape_cast %1 : vector<1x1x18x4xf32> to vector<18x4xf32>
    %3 = arith.truncf %2 : vector<18x4xf32> to vector<18x4xbf16>
    %4 = vector.extract_strided_slice %3 {offsets = [0, 0], sizes = [16, 4], strides = [1, 1]} : vector<18x4xbf16> to vector<16x4xbf16>
    %c0_3 = arith.constant 0 : index
    %c0_4 = arith.constant 0 : index
    %c0_5 = arith.constant 0 : index
    %5 = vector.load %arg6[%c0_3, %c0_4, %c0_5] : memref<9x4x8xbf16, #tpu.memory_space<vmem>>, vector<1x4x8xbf16>
    %6 = vector.shape_cast %5 : vector<1x4x8xbf16> to vector<4x8xbf16>
    %cst_6 = arith.constant dense<0.000000e+00> : vector<16x8xf32>
    %7 = tpu.matmul %4, %6, %cst_6 {dimension_numbers = #tpu.dot_dimension_numbers<[1], [0], [0], [1], [0, 0, 1, 1], [], []>} : vector<16x4xbf16>, vector<4x8xbf16>, vector<16x8xf32> -> vector<16x8xf32>
    %8 = arith.addf %0, %7 : vector<16x8xf32>
    %9 = vector.extract_strided_slice %3 {offsets = [1, 0], sizes = [16, 4], strides = [1, 1]} : vector<18x4xbf16> to vector<16x4xbf16>
    %c1 = arith.constant 1 : index
    %c0_7 = arith.constant 0 : index
    %c0_8 = arith.constant 0 : index
    %10 = vector.load %arg6[%c1, %c0_7, %c0_8] : memref<9x4x8xbf16, #tpu.memory_space<vmem>>, vector<1x4x8xbf16>
    %11 = vector.shape_cast %10 : vector<1x4x8xbf16> to vector<4x8xbf16>
    %cst_9 = arith.constant dense<0.000000e+00> : vector<16x8xf32>
    %12 = tpu.matmul %9, %11, %cst_9 {dimension_numbers = #tpu.dot_dimension_numbers<[1], [0], [0], [1], [0, 0, 1, 1], [], []>} : vector<16x4xbf16>, vector<4x8xbf16>, vector<16x8xf32> -> vector<16x8xf32>
    %13 = arith.addf %8, %12 : vector<16x8xf32>
    %14 = vector.extract_strided_slice %3 {offsets = [2, 0], sizes = [16, 4], strides = [1, 1]} : vector<18x4xbf16> to vector<16x4xbf16>
    %c2 = arith.constant 2 : index
    %c0_10 = arith.constant 0 : index
    %c0_11 = arith.constant 0 : index
    %15 = vector.load %arg6[%c2, %c0_10, %c0_11] : memref<9x4x8xbf16, #tpu.memory_space<vmem>>, vector<1x4x8xbf16>
    %16 = vector.shape_cast %15 : vector<1x4x8xbf16> to vector<4x8xbf16>
    %cst_12 = arith.constant dense<0.000000e+00> : vector<16x8xf32>
    %17 = tpu.matmul %14, %16, %cst_12 {dimension_numbers = #tpu.dot_dimension_numbers<[1], [0], [0], [1], [0, 0, 1, 1], [], []>} : vector<16x4xbf16>, vector<4x8xbf16>, vector<16x8xf32> -> vector<16x8xf32>
    %18 = arith.addf %13, %17 : vector<16x8xf32>
    %c0_13 = arith.constant 0 : index
    %c0_14 = arith.constant 0 : index
    %c0_15 = arith.constant 0 : index
    %c0_16 = arith.constant 0 : index
    %19 = vector.load %arg4[%c0_13, %c0_14, %c0_15, %c0_16] : memref<1x1x18x4xf32, #tpu.memory_space<vmem>>, vector<1x1x18x4xf32>
    %20 = vector.shape_cast %19 : vector<1x1x18x4xf32> to vector<18x4xf32>
    %21 = arith.truncf %20 : vector<18x4xf32> to vector<18x4xbf16>
    %22 = vector.extract_strided_slice %21 {offsets = [0, 0], sizes = [16, 4], strides = [1, 1]} : vector<18x4xbf16> to vector<16x4xbf16>
    %c3 = arith.constant 3 : index
    %c0_17 = arith.constant 0 : index
    %c0_18 = arith.constant 0 : index
    %23 = vector.load %arg6[%c3, %c0_17, %c0_18] : memref<9x4x8xbf16, #tpu.memory_space<vmem>>, vector<1x4x8xbf16>
    %24 = vector.shape_cast %23 : vector<1x4x8xbf16> to vector<4x8xbf16>
    %cst_19 = arith.constant dense<0.000000e+00> : vector<16x8xf32>
    %25 = tpu.matmul %22, %24, %cst_19 {dimension_numbers = #tpu.dot_dimension_numbers<[1], [0], [0], [1], [0, 0, 1, 1], [], []>} : vector<16x4xbf16>, vector<4x8xbf16>, vector<16x8xf32> -> vector<16x8xf32>
    %26 = arith.addf %18, %25 : vector<16x8xf32>
    %27 = vector.extract_strided_slice %21 {offsets = [1, 0], sizes = [16, 4], strides = [1, 1]} : vector<18x4xbf16> to vector<16x4xbf16>
    %c4 = arith.constant 4 : index
    %c0_20 = arith.constant 0 : index
    %c0_21 = arith.constant 0 : index
    %28 = vector.load %arg6[%c4, %c0_20, %c0_21] : memref<9x4x8xbf16, #tpu.memory_space<vmem>>, vector<1x4x8xbf16>
    %29 = vector.shape_cast %28 : vector<1x4x8xbf16> to vector<4x8xbf16>
    %cst_22 = arith.constant dense<0.000000e+00> : vector<16x8xf32>
    %30 = tpu.matmul %27, %29, %cst_22 {dimension_numbers = #tpu.dot_dimension_numbers<[1], [0], [0], [1], [0, 0, 1, 1], [], []>} : vector<16x4xbf16>, vector<4x8xbf16>, vector<16x8xf32> -> vector<16x8xf32>
    %31 = arith.addf %26, %30 : vector<16x8xf32>
    %32 = vector.extract_strided_slice %21 {offsets = [2, 0], sizes = [16, 4], strides = [1, 1]} : vector<18x4xbf16> to vector<16x4xbf16>
    %c5 = arith.constant 5 : index
    %c0_23 = arith.constant 0 : index
    %c0_24 = arith.constant 0 : index
    %33 = vector.load %arg6[%c5, %c0_23, %c0_24] : memref<9x4x8xbf16, #tpu.memory_space<vmem>>, vector<1x4x8xbf16>
    %34 = vector.shape_cast %33 : vector<1x4x8xbf16> to vector<4x8xbf16>
    %cst_25 = arith.constant dense<0.000000e+00> : vector<16x8xf32>
    %35 = tpu.matmul %32, %34, %cst_25 {dimension_numbers = #tpu.dot_dimension_numbers<[1], [0], [0], [1], [0, 0, 1, 1], [], []>} : vector<16x4xbf16>, vector<4x8xbf16>, vector<16x8xf32> -> vector<16x8xf32>
    %36 = arith.addf %31, %35 : vector<16x8xf32>
    %c0_26 = arith.constant 0 : index
    %c0_27 = arith.constant 0 : index
    %c0_28 = arith.constant 0 : index
    %c0_29 = arith.constant 0 : index
    %37 = vector.load %arg5[%c0_26, %c0_27, %c0_28, %c0_29] : memref<1x1x18x4xf32, #tpu.memory_space<vmem>>, vector<1x1x18x4xf32>
    %38 = vector.shape_cast %37 : vector<1x1x18x4xf32> to vector<18x4xf32>
    %39 = arith.truncf %38 : vector<18x4xf32> to vector<18x4xbf16>
    %40 = vector.extract_strided_slice %39 {offsets = [0, 0], sizes = [16, 4], strides = [1, 1]} : vector<18x4xbf16> to vector<16x4xbf16>
    %c6 = arith.constant 6 : index
    %c0_30 = arith.constant 0 : index
    %c0_31 = arith.constant 0 : index
    %41 = vector.load %arg6[%c6, %c0_30, %c0_31] : memref<9x4x8xbf16, #tpu.memory_space<vmem>>, vector<1x4x8xbf16>
    %42 = vector.shape_cast %41 : vector<1x4x8xbf16> to vector<4x8xbf16>
    %cst_32 = arith.constant dense<0.000000e+00> : vector<16x8xf32>
    %43 = tpu.matmul %40, %42, %cst_32 {dimension_numbers = #tpu.dot_dimension_numbers<[1], [0], [0], [1], [0, 0, 1, 1], [], []>} : vector<16x4xbf16>, vector<4x8xbf16>, vector<16x8xf32> -> vector<16x8xf32>
    %44 = arith.addf %36, %43 : vector<16x8xf32>
    %45 = vector.extract_strided_slice %39 {offsets = [1, 0], sizes = [16, 4], strides = [1, 1]} : vector<18x4xbf16> to vector<16x4xbf16>
    %c7 = arith.constant 7 : index
    %c0_33 = arith.constant 0 : index
    %c0_34 = arith.constant 0 : index
    %46 = vector.load %arg6[%c7, %c0_33, %c0_34] : memref<9x4x8xbf16, #tpu.memory_space<vmem>>, vector<1x4x8xbf16>
    %47 = vector.shape_cast %46 : vector<1x4x8xbf16> to vector<4x8xbf16>
    %cst_35 = arith.constant dense<0.000000e+00> : vector<16x8xf32>
    %48 = tpu.matmul %45, %47, %cst_35 {dimension_numbers = #tpu.dot_dimension_numbers<[1], [0], [0], [1], [0, 0, 1, 1], [], []>} : vector<16x4xbf16>, vector<4x8xbf16>, vector<16x8xf32> -> vector<16x8xf32>
    %49 = arith.addf %44, %48 : vector<16x8xf32>
    %50 = vector.extract_strided_slice %39 {offsets = [2, 0], sizes = [16, 4], strides = [1, 1]} : vector<18x4xbf16> to vector<16x4xbf16>
    %c8 = arith.constant 8 : index
    %c0_36 = arith.constant 0 : index
    %c0_37 = arith.constant 0 : index
    %51 = vector.load %arg6[%c8, %c0_36, %c0_37] : memref<9x4x8xbf16, #tpu.memory_space<vmem>>, vector<1x4x8xbf16>
    %52 = vector.shape_cast %51 : vector<1x4x8xbf16> to vector<4x8xbf16>
    %cst_38 = arith.constant dense<0.000000e+00> : vector<16x8xf32>
    %53 = tpu.matmul %50, %52, %cst_38 {dimension_numbers = #tpu.dot_dimension_numbers<[1], [0], [0], [1], [0, 0, 1, 1], [], []>} : vector<16x4xbf16>, vector<4x8xbf16>, vector<16x8xf32> -> vector<16x8xf32>
    %54 = arith.addf %49, %53 : vector<16x8xf32>
    %c0_39 = arith.constant 0 : index
    %c0_40 = arith.constant 0 : index
    %55 = vector.load %arg7[%c0_39, %c0_40] : memref<1x8xf32, #tpu.memory_space<vmem>>, vector<1x8xf32>
    %56 = vector.broadcast %55 : vector<1x8xf32> to vector<16x8xf32>
    %57 = arith.addf %54, %56 : vector<16x8xf32>
    %cst_41 = arith.constant 0.000000e+00 : f32
    %58 = vector.broadcast %cst_41 : f32 to vector<16x8xf32>
    %59 = arith.maximumf %57, %58 : vector<16x8xf32>
    %c0_42 = arith.constant 0 : index
    %c0_43 = arith.constant 0 : index
    %c0_44 = arith.constant 0 : index
    %c0_45 = arith.constant 0 : index
    %60 = vector.load %arg8[%c0_42, %c0_43, %c0_44, %c0_45] : memref<1x1x16x8xf32, #tpu.memory_space<vmem>>, vector<1x1x16x8xf32>
    %61 = vector.shape_cast %60 : vector<1x1x16x8xf32> to vector<16x8xf32>
    %62 = vector.shape_cast %59 : vector<16x8xf32> to vector<1x1x16x8xf32>
    tpu.vector_store %arg8[%c0_42, %c0_43, %c0_44, %c0_45], %62 {strides = array<i32>} : memref<1x1x16x8xf32, #tpu.memory_space<vmem>>, vector<1x1x16x8xf32>,
    return
  }
  func.func @transform_0(%arg0: i32, %arg1: i32, %arg2: i32) -> (i32, i32, i32, i32) {
    %c0_i32 = arith.constant 0 : i32
    %0 = arith.addi %arg2, %c0_i32 : i32
    %c0_i32_0 = arith.constant 0 : i32
    %c0_i32_1 = arith.constant 0 : i32
    %c0_i32_2 = arith.constant 0 : i32
    return %arg1, %0, %c0_i32_0, %c0_i32_1 : i32, i32, i32, i32
  }
  func.func @transform_1(%arg0: i32, %arg1: i32, %arg2: i32) -> (i32, i32, i32, i32) {
    %c1_i32 = arith.constant 1 : i32
    %0 = arith.addi %arg2, %c1_i32 : i32
    %c0_i32 = arith.constant 0 : i32
    %c0_i32_0 = arith.constant 0 : i32
    %c0_i32_1 = arith.constant 0 : i32
    return %arg1, %0, %c0_i32, %c0_i32_0 : i32, i32, i32, i32
  }
  func.func @transform_2(%arg0: i32, %arg1: i32, %arg2: i32) -> (i32, i32, i32, i32) {
    %c2_i32 = arith.constant 2 : i32
    %0 = arith.addi %arg2, %c2_i32 : i32
    %c0_i32 = arith.constant 0 : i32
    %c0_i32_0 = arith.constant 0 : i32
    %c0_i32_1 = arith.constant 0 : i32
    return %arg1, %0, %c0_i32, %c0_i32_0 : i32, i32, i32, i32
  }
  func.func @transform_3(%arg0: i32, %arg1: i32, %arg2: i32) -> (i32, i32, i32) {
    %c0_i32 = arith.constant 0 : i32
    %c0_i32_0 = arith.constant 0 : i32
    %c0_i32_1 = arith.constant 0 : i32
    return %c0_i32, %c0_i32_0, %arg0 : i32, i32, i32
  }
  func.func @transform_4(%arg0: i32, %arg1: i32, %arg2: i32) -> (i32, i32) {
    %c0_i32 = arith.constant 0 : i32
    %c0_i32_0 = arith.constant 0 : i32
    return %c0_i32, %arg0 : i32, i32
  }
  func.func @transform_5(%arg0: i32, %arg1: i32, %arg2: i32) -> (i32, i32, i32, i32) {
    %c0_i32 = arith.constant 0 : i32
    %c0_i32_0 = arith.constant 0 : i32
    return %arg1, %arg2, %c0_i32, %arg0 : i32, i32, i32, i32
  }
}

module attributes {stable_mosaic.version = 11 : i64} {
  func.func @_maxpool_kernel(%arg0: i32, %arg1: i32, %arg2: memref<1x2x8x16xf32, #tpu.memory_space<vmem>>, %arg3: memref<1x1x8x8xf32, #tpu.memory_space<vmem>>) attributes {dimension_semantics = [#tpu.dimension_semantics<parallel>, #tpu.dimension_semantics<parallel>], iteration_bounds = array<i64: 2, 16>, scalar_prefetch = 0 : i64, scratch_operands = 0 : i64, tpu.core_type = #tpu.core_type<tc>, window_params = [{transform_indices = @transform_0, window_bounds = array<i64: 1, 2, 8, 16>}, {transform_indices = @transform_1, window_bounds = array<i64: 1, 1, 8, 8>}]} {
    %c0 = arith.constant 0 : index
    %c0_0 = arith.constant 0 : index
    %c0_1 = arith.constant 0 : index
    %c0_2 = arith.constant 0 : index
    %0 = vector.load %arg2[%c0, %c0_0, %c0_1, %c0_2] : memref<1x2x8x16xf32, #tpu.memory_space<vmem>>, vector<1x1x8x16xf32>
    %1 = vector.shape_cast %0 : vector<1x1x8x16xf32> to vector<8x16xf32>
    %c0_3 = arith.constant 0 : index
    %c1 = arith.constant 1 : index
    %c0_4 = arith.constant 0 : index
    %c0_5 = arith.constant 0 : index
    %2 = vector.load %arg2[%c0_3, %c1, %c0_4, %c0_5] : memref<1x2x8x16xf32, #tpu.memory_space<vmem>>, vector<1x1x8x16xf32>
    %3 = vector.shape_cast %2 : vector<1x1x8x16xf32> to vector<8x16xf32>
    %4 = arith.maximumf %1, %3 : vector<8x16xf32>
    %5 = vector.extract_strided_slice %4 {offsets = [0, 0], sizes = [8, 8], strides = [1, 1]} : vector<8x16xf32> to vector<8x8xf32>
    %6 = vector.extract_strided_slice %4 {offsets = [0, 8], sizes = [8, 8], strides = [1, 1]} : vector<8x16xf32> to vector<8x8xf32>
    %7 = arith.maximumf %5, %6 : vector<8x8xf32>
    %c0_6 = arith.constant 0 : index
    %c0_7 = arith.constant 0 : index
    %c0_8 = arith.constant 0 : index
    %c0_9 = arith.constant 0 : index
    %8 = vector.load %arg3[%c0_6, %c0_7, %c0_8, %c0_9] : memref<1x1x8x8xf32, #tpu.memory_space<vmem>>, vector<1x1x8x8xf32>
    %9 = vector.shape_cast %8 : vector<1x1x8x8xf32> to vector<8x8xf32>
    %10 = vector.shape_cast %7 : vector<8x8xf32> to vector<1x1x8x8xf32>
    tpu.vector_store %arg3[%c0_6, %c0_7, %c0_8, %c0_9], %10 {strides = array<i32>} : memref<1x1x8x8xf32, #tpu.memory_space<vmem>>, vector<1x1x8x8xf32>,
    return
  }
  func.func @transform_0(%arg0: i32, %arg1: i32) -> (i32, i32, i32, i32) {
    %c0_i32 = arith.constant 0 : i32
    %c0_i32_0 = arith.constant 0 : i32
    %c0_i32_1 = arith.constant 0 : i32
    return %arg0, %arg1, %c0_i32, %c0_i32_0 : i32, i32, i32, i32
  }
  func.func @transform_1(%arg0: i32, %arg1: i32) -> (i32, i32, i32, i32) {
    %c0_i32 = arith.constant 0 : i32
    %c0_i32_0 = arith.constant 0 : i32
    %c0_i32_1 = arith.constant 0 : i32
    return %arg0, %arg1, %c0_i32, %c0_i32_0 : i32, i32, i32, i32
  }
}

module attributes {stable_mosaic.version = 11 : i64} {
  func.func @_conv_row_kernel(%arg0: i32, %arg1: i32, %arg2: i32, %arg3: memref<1x1x10x8xf32, #tpu.memory_space<vmem>>, %arg4: memref<1x1x10x8xf32, #tpu.memory_space<vmem>>, %arg5: memref<1x1x10x8xf32, #tpu.memory_space<vmem>>, %arg6: memref<9x8x16xbf16, #tpu.memory_space<vmem>>, %arg7: memref<1x16xf32, #tpu.memory_space<vmem>>, %arg8: memref<1x1x8x16xf32, #tpu.memory_space<vmem>>) attributes {dimension_semantics = [#tpu.dimension_semantics<parallel>, #tpu.dimension_semantics<parallel>, #tpu.dimension_semantics<parallel>], iteration_bounds = array<i64: 1, 2, 16>, scalar_prefetch = 0 : i64, scratch_operands = 0 : i64, tpu.core_type = #tpu.core_type<tc>, window_params = [{transform_indices = @transform_0, window_bounds = array<i64: 1, 1, 10, 8>}, {transform_indices = @transform_1, window_bounds = array<i64: 1, 1, 10, 8>}, {transform_indices = @transform_2, window_bounds = array<i64: 1, 1, 10, 8>}, {transform_indices = @transform_3, window_bounds = array<i64: 9, 8, 16>}, {transform_indices = @transform_4, window_bounds = array<i64: 1, 16>}, {transform_indices = @transform_5, window_bounds = array<i64: 1, 1, 8, 16>}]} {
    %cst = arith.constant 0.000000e+00 : f32
    %0 = vector.broadcast %cst : f32 to vector<8x16xf32>
    %c0 = arith.constant 0 : index
    %c0_0 = arith.constant 0 : index
    %c0_1 = arith.constant 0 : index
    %c0_2 = arith.constant 0 : index
    %1 = vector.load %arg3[%c0, %c0_0, %c0_1, %c0_2] : memref<1x1x10x8xf32, #tpu.memory_space<vmem>>, vector<1x1x10x8xf32>
    %2 = vector.shape_cast %1 : vector<1x1x10x8xf32> to vector<10x8xf32>
    %3 = arith.truncf %2 : vector<10x8xf32> to vector<10x8xbf16>
    %4 = vector.extract_strided_slice %3 {offsets = [0, 0], sizes = [8, 8], strides = [1, 1]} : vector<10x8xbf16> to vector<8x8xbf16>
    %c0_3 = arith.constant 0 : index
    %c0_4 = arith.constant 0 : index
    %c0_5 = arith.constant 0 : index
    %5 = vector.load %arg6[%c0_3, %c0_4, %c0_5] : memref<9x8x16xbf16, #tpu.memory_space<vmem>>, vector<1x8x16xbf16>
    %6 = vector.shape_cast %5 : vector<1x8x16xbf16> to vector<8x16xbf16>
    %cst_6 = arith.constant dense<0.000000e+00> : vector<8x16xf32>
    %7 = tpu.matmul %4, %6, %cst_6 {dimension_numbers = #tpu.dot_dimension_numbers<[1], [0], [0], [1], [0, 0, 1, 1], [], []>} : vector<8x8xbf16>, vector<8x16xbf16>, vector<8x16xf32> -> vector<8x16xf32>
    %8 = arith.addf %0, %7 : vector<8x16xf32>
    %9 = vector.extract_strided_slice %3 {offsets = [1, 0], sizes = [8, 8], strides = [1, 1]} : vector<10x8xbf16> to vector<8x8xbf16>
    %c1 = arith.constant 1 : index
    %c0_7 = arith.constant 0 : index
    %c0_8 = arith.constant 0 : index
    %10 = vector.load %arg6[%c1, %c0_7, %c0_8] : memref<9x8x16xbf16, #tpu.memory_space<vmem>>, vector<1x8x16xbf16>
    %11 = vector.shape_cast %10 : vector<1x8x16xbf16> to vector<8x16xbf16>
    %cst_9 = arith.constant dense<0.000000e+00> : vector<8x16xf32>
    %12 = tpu.matmul %9, %11, %cst_9 {dimension_numbers = #tpu.dot_dimension_numbers<[1], [0], [0], [1], [0, 0, 1, 1], [], []>} : vector<8x8xbf16>, vector<8x16xbf16>, vector<8x16xf32> -> vector<8x16xf32>
    %13 = arith.addf %8, %12 : vector<8x16xf32>
    %14 = vector.extract_strided_slice %3 {offsets = [2, 0], sizes = [8, 8], strides = [1, 1]} : vector<10x8xbf16> to vector<8x8xbf16>
    %c2 = arith.constant 2 : index
    %c0_10 = arith.constant 0 : index
    %c0_11 = arith.constant 0 : index
    %15 = vector.load %arg6[%c2, %c0_10, %c0_11] : memref<9x8x16xbf16, #tpu.memory_space<vmem>>, vector<1x8x16xbf16>
    %16 = vector.shape_cast %15 : vector<1x8x16xbf16> to vector<8x16xbf16>
    %cst_12 = arith.constant dense<0.000000e+00> : vector<8x16xf32>
    %17 = tpu.matmul %14, %16, %cst_12 {dimension_numbers = #tpu.dot_dimension_numbers<[1], [0], [0], [1], [0, 0, 1, 1], [], []>} : vector<8x8xbf16>, vector<8x16xbf16>, vector<8x16xf32> -> vector<8x16xf32>
    %18 = arith.addf %13, %17 : vector<8x16xf32>
    %c0_13 = arith.constant 0 : index
    %c0_14 = arith.constant 0 : index
    %c0_15 = arith.constant 0 : index
    %c0_16 = arith.constant 0 : index
    %19 = vector.load %arg4[%c0_13, %c0_14, %c0_15, %c0_16] : memref<1x1x10x8xf32, #tpu.memory_space<vmem>>, vector<1x1x10x8xf32>
    %20 = vector.shape_cast %19 : vector<1x1x10x8xf32> to vector<10x8xf32>
    %21 = arith.truncf %20 : vector<10x8xf32> to vector<10x8xbf16>
    %22 = vector.extract_strided_slice %21 {offsets = [0, 0], sizes = [8, 8], strides = [1, 1]} : vector<10x8xbf16> to vector<8x8xbf16>
    %c3 = arith.constant 3 : index
    %c0_17 = arith.constant 0 : index
    %c0_18 = arith.constant 0 : index
    %23 = vector.load %arg6[%c3, %c0_17, %c0_18] : memref<9x8x16xbf16, #tpu.memory_space<vmem>>, vector<1x8x16xbf16>
    %24 = vector.shape_cast %23 : vector<1x8x16xbf16> to vector<8x16xbf16>
    %cst_19 = arith.constant dense<0.000000e+00> : vector<8x16xf32>
    %25 = tpu.matmul %22, %24, %cst_19 {dimension_numbers = #tpu.dot_dimension_numbers<[1], [0], [0], [1], [0, 0, 1, 1], [], []>} : vector<8x8xbf16>, vector<8x16xbf16>, vector<8x16xf32> -> vector<8x16xf32>
    %26 = arith.addf %18, %25 : vector<8x16xf32>
    %27 = vector.extract_strided_slice %21 {offsets = [1, 0], sizes = [8, 8], strides = [1, 1]} : vector<10x8xbf16> to vector<8x8xbf16>
    %c4 = arith.constant 4 : index
    %c0_20 = arith.constant 0 : index
    %c0_21 = arith.constant 0 : index
    %28 = vector.load %arg6[%c4, %c0_20, %c0_21] : memref<9x8x16xbf16, #tpu.memory_space<vmem>>, vector<1x8x16xbf16>
    %29 = vector.shape_cast %28 : vector<1x8x16xbf16> to vector<8x16xbf16>
    %cst_22 = arith.constant dense<0.000000e+00> : vector<8x16xf32>
    %30 = tpu.matmul %27, %29, %cst_22 {dimension_numbers = #tpu.dot_dimension_numbers<[1], [0], [0], [1], [0, 0, 1, 1], [], []>} : vector<8x8xbf16>, vector<8x16xbf16>, vector<8x16xf32> -> vector<8x16xf32>
    %31 = arith.addf %26, %30 : vector<8x16xf32>
    %32 = vector.extract_strided_slice %21 {offsets = [2, 0], sizes = [8, 8], strides = [1, 1]} : vector<10x8xbf16> to vector<8x8xbf16>
    %c5 = arith.constant 5 : index
    %c0_23 = arith.constant 0 : index
    %c0_24 = arith.constant 0 : index
    %33 = vector.load %arg6[%c5, %c0_23, %c0_24] : memref<9x8x16xbf16, #tpu.memory_space<vmem>>, vector<1x8x16xbf16>
    %34 = vector.shape_cast %33 : vector<1x8x16xbf16> to vector<8x16xbf16>
    %cst_25 = arith.constant dense<0.000000e+00> : vector<8x16xf32>
    %35 = tpu.matmul %32, %34, %cst_25 {dimension_numbers = #tpu.dot_dimension_numbers<[1], [0], [0], [1], [0, 0, 1, 1], [], []>} : vector<8x8xbf16>, vector<8x16xbf16>, vector<8x16xf32> -> vector<8x16xf32>
    %36 = arith.addf %31, %35 : vector<8x16xf32>
    %c0_26 = arith.constant 0 : index
    %c0_27 = arith.constant 0 : index
    %c0_28 = arith.constant 0 : index
    %c0_29 = arith.constant 0 : index
    %37 = vector.load %arg5[%c0_26, %c0_27, %c0_28, %c0_29] : memref<1x1x10x8xf32, #tpu.memory_space<vmem>>, vector<1x1x10x8xf32>
    %38 = vector.shape_cast %37 : vector<1x1x10x8xf32> to vector<10x8xf32>
    %39 = arith.truncf %38 : vector<10x8xf32> to vector<10x8xbf16>
    %40 = vector.extract_strided_slice %39 {offsets = [0, 0], sizes = [8, 8], strides = [1, 1]} : vector<10x8xbf16> to vector<8x8xbf16>
    %c6 = arith.constant 6 : index
    %c0_30 = arith.constant 0 : index
    %c0_31 = arith.constant 0 : index
    %41 = vector.load %arg6[%c6, %c0_30, %c0_31] : memref<9x8x16xbf16, #tpu.memory_space<vmem>>, vector<1x8x16xbf16>
    %42 = vector.shape_cast %41 : vector<1x8x16xbf16> to vector<8x16xbf16>
    %cst_32 = arith.constant dense<0.000000e+00> : vector<8x16xf32>
    %43 = tpu.matmul %40, %42, %cst_32 {dimension_numbers = #tpu.dot_dimension_numbers<[1], [0], [0], [1], [0, 0, 1, 1], [], []>} : vector<8x8xbf16>, vector<8x16xbf16>, vector<8x16xf32> -> vector<8x16xf32>
    %44 = arith.addf %36, %43 : vector<8x16xf32>
    %45 = vector.extract_strided_slice %39 {offsets = [1, 0], sizes = [8, 8], strides = [1, 1]} : vector<10x8xbf16> to vector<8x8xbf16>
    %c7 = arith.constant 7 : index
    %c0_33 = arith.constant 0 : index
    %c0_34 = arith.constant 0 : index
    %46 = vector.load %arg6[%c7, %c0_33, %c0_34] : memref<9x8x16xbf16, #tpu.memory_space<vmem>>, vector<1x8x16xbf16>
    %47 = vector.shape_cast %46 : vector<1x8x16xbf16> to vector<8x16xbf16>
    %cst_35 = arith.constant dense<0.000000e+00> : vector<8x16xf32>
    %48 = tpu.matmul %45, %47, %cst_35 {dimension_numbers = #tpu.dot_dimension_numbers<[1], [0], [0], [1], [0, 0, 1, 1], [], []>} : vector<8x8xbf16>, vector<8x16xbf16>, vector<8x16xf32> -> vector<8x16xf32>
    %49 = arith.addf %44, %48 : vector<8x16xf32>
    %50 = vector.extract_strided_slice %39 {offsets = [2, 0], sizes = [8, 8], strides = [1, 1]} : vector<10x8xbf16> to vector<8x8xbf16>
    %c8 = arith.constant 8 : index
    %c0_36 = arith.constant 0 : index
    %c0_37 = arith.constant 0 : index
    %51 = vector.load %arg6[%c8, %c0_36, %c0_37] : memref<9x8x16xbf16, #tpu.memory_space<vmem>>, vector<1x8x16xbf16>
    %52 = vector.shape_cast %51 : vector<1x8x16xbf16> to vector<8x16xbf16>
    %cst_38 = arith.constant dense<0.000000e+00> : vector<8x16xf32>
    %53 = tpu.matmul %50, %52, %cst_38 {dimension_numbers = #tpu.dot_dimension_numbers<[1], [0], [0], [1], [0, 0, 1, 1], [], []>} : vector<8x8xbf16>, vector<8x16xbf16>, vector<8x16xf32> -> vector<8x16xf32>
    %54 = arith.addf %49, %53 : vector<8x16xf32>
    %c0_39 = arith.constant 0 : index
    %c0_40 = arith.constant 0 : index
    %55 = vector.load %arg7[%c0_39, %c0_40] : memref<1x16xf32, #tpu.memory_space<vmem>>, vector<1x16xf32>
    %56 = vector.broadcast %55 : vector<1x16xf32> to vector<8x16xf32>
    %57 = arith.addf %54, %56 : vector<8x16xf32>
    %cst_41 = arith.constant 0.000000e+00 : f32
    %58 = vector.broadcast %cst_41 : f32 to vector<8x16xf32>
    %59 = arith.maximumf %57, %58 : vector<8x16xf32>
    %c0_42 = arith.constant 0 : index
    %c0_43 = arith.constant 0 : index
    %c0_44 = arith.constant 0 : index
    %c0_45 = arith.constant 0 : index
    %60 = vector.load %arg8[%c0_42, %c0_43, %c0_44, %c0_45] : memref<1x1x8x16xf32, #tpu.memory_space<vmem>>, vector<1x1x8x16xf32>
    %61 = vector.shape_cast %60 : vector<1x1x8x16xf32> to vector<8x16xf32>
    %62 = vector.shape_cast %59 : vector<8x16xf32> to vector<1x1x8x16xf32>
    tpu.vector_store %arg8[%c0_42, %c0_43, %c0_44, %c0_45], %62 {strides = array<i32>} : memref<1x1x8x16xf32, #tpu.memory_space<vmem>>, vector<1x1x8x16xf32>,
    return
  }
  func.func @transform_0(%arg0: i32, %arg1: i32, %arg2: i32) -> (i32, i32, i32, i32) {
    %c0_i32 = arith.constant 0 : i32
    %0 = arith.addi %arg2, %c0_i32 : i32
    %c0_i32_0 = arith.constant 0 : i32
    %c0_i32_1 = arith.constant 0 : i32
    %c0_i32_2 = arith.constant 0 : i32
    return %arg1, %0, %c0_i32_0, %c0_i32_1 : i32, i32, i32, i32
  }
  func.func @transform_1(%arg0: i32, %arg1: i32, %arg2: i32) -> (i32, i32, i32, i32) {
    %c1_i32 = arith.constant 1 : i32
    %0 = arith.addi %arg2, %c1_i32 : i32
    %c0_i32 = arith.constant 0 : i32
    %c0_i32_0 = arith.constant 0 : i32
    %c0_i32_1 = arith.constant 0 : i32
    return %arg1, %0, %c0_i32, %c0_i32_0 : i32, i32, i32, i32
  }
  func.func @transform_2(%arg0: i32, %arg1: i32, %arg2: i32) -> (i32, i32, i32, i32) {
    %c2_i32 = arith.constant 2 : i32
    %0 = arith.addi %arg2, %c2_i32 : i32
    %c0_i32 = arith.constant 0 : i32
    %c0_i32_0 = arith.constant 0 : i32
    %c0_i32_1 = arith.constant 0 : i32
    return %arg1, %0, %c0_i32, %c0_i32_0 : i32, i32, i32, i32
  }
  func.func @transform_3(%arg0: i32, %arg1: i32, %arg2: i32) -> (i32, i32, i32) {
    %c0_i32 = arith.constant 0 : i32
    %c0_i32_0 = arith.constant 0 : i32
    %c0_i32_1 = arith.constant 0 : i32
    return %c0_i32, %c0_i32_0, %arg0 : i32, i32, i32
  }
  func.func @transform_4(%arg0: i32, %arg1: i32, %arg2: i32) -> (i32, i32) {
    %c0_i32 = arith.constant 0 : i32
    %c0_i32_0 = arith.constant 0 : i32
    return %c0_i32, %arg0 : i32, i32
  }
  func.func @transform_5(%arg0: i32, %arg1: i32, %arg2: i32) -> (i32, i32, i32, i32) {
    %c0_i32 = arith.constant 0 : i32
    %c0_i32_0 = arith.constant 0 : i32
    return %arg1, %arg2, %c0_i32, %arg0 : i32, i32, i32, i32
  }
}

module attributes {stable_mosaic.version = 11 : i64} {
  func.func @_maxpool_kernel(%arg0: i32, %arg1: i32, %arg2: memref<1x2x4x32xf32, #tpu.memory_space<vmem>>, %arg3: memref<1x1x4x16xf32, #tpu.memory_space<vmem>>) attributes {dimension_semantics = [#tpu.dimension_semantics<parallel>, #tpu.dimension_semantics<parallel>], iteration_bounds = array<i64: 2, 8>, scalar_prefetch = 0 : i64, scratch_operands = 0 : i64, tpu.core_type = #tpu.core_type<tc>, window_params = [{transform_indices = @transform_0, window_bounds = array<i64: 1, 2, 4, 32>}, {transform_indices = @transform_1, window_bounds = array<i64: 1, 1, 4, 16>}]} {
    %c0 = arith.constant 0 : index
    %c0_0 = arith.constant 0 : index
    %c0_1 = arith.constant 0 : index
    %c0_2 = arith.constant 0 : index
    %0 = vector.load %arg2[%c0, %c0_0, %c0_1, %c0_2] : memref<1x2x4x32xf32, #tpu.memory_space<vmem>>, vector<1x1x4x32xf32>
    %1 = vector.shape_cast %0 : vector<1x1x4x32xf32> to vector<4x32xf32>
    %c0_3 = arith.constant 0 : index
    %c1 = arith.constant 1 : index
    %c0_4 = arith.constant 0 : index
    %c0_5 = arith.constant 0 : index
    %2 = vector.load %arg2[%c0_3, %c1, %c0_4, %c0_5] : memref<1x2x4x32xf32, #tpu.memory_space<vmem>>, vector<1x1x4x32xf32>
    %3 = vector.shape_cast %2 : vector<1x1x4x32xf32> to vector<4x32xf32>
    %4 = arith.maximumf %1, %3 : vector<4x32xf32>
    %5 = vector.extract_strided_slice %4 {offsets = [0, 0], sizes = [4, 16], strides = [1, 1]} : vector<4x32xf32> to vector<4x16xf32>
    %6 = vector.extract_strided_slice %4 {offsets = [0, 16], sizes = [4, 16], strides = [1, 1]} : vector<4x32xf32> to vector<4x16xf32>
    %7 = arith.maximumf %5, %6 : vector<4x16xf32>
    %c0_6 = arith.constant 0 : index
    %c0_7 = arith.constant 0 : index
    %c0_8 = arith.constant 0 : index
    %c0_9 = arith.constant 0 : index
    %8 = vector.load %arg3[%c0_6, %c0_7, %c0_8, %c0_9] : memref<1x1x4x16xf32, #tpu.memory_space<vmem>>, vector<1x1x4x16xf32>
    %9 = vector.shape_cast %8 : vector<1x1x4x16xf32> to vector<4x16xf32>
    %10 = vector.shape_cast %7 : vector<4x16xf32> to vector<1x1x4x16xf32>
    tpu.vector_store %arg3[%c0_6, %c0_7, %c0_8, %c0_9], %10 {strides = array<i32>} : memref<1x1x4x16xf32, #tpu.memory_space<vmem>>, vector<1x1x4x16xf32>,
    return
  }
  func.func @transform_0(%arg0: i32, %arg1: i32) -> (i32, i32, i32, i32) {
    %c0_i32 = arith.constant 0 : i32
    %c0_i32_0 = arith.constant 0 : i32
    %c0_i32_1 = arith.constant 0 : i32
    return %arg0, %arg1, %c0_i32, %c0_i32_0 : i32, i32, i32, i32
  }
  func.func @transform_1(%arg0: i32, %arg1: i32) -> (i32, i32, i32, i32) {
    %c0_i32 = arith.constant 0 : i32
    %c0_i32_0 = arith.constant 0 : i32
    %c0_i32_1 = arith.constant 0 : i32
    return %arg0, %arg1, %c0_i32, %c0_i32_0 : i32, i32, i32, i32
  }
}

module attributes {stable_mosaic.version = 11 : i64} {
  func.func @_conv_row_kernel(%arg0: i32, %arg1: i32, %arg2: i32, %arg3: memref<1x1x6x16xf32, #tpu.memory_space<vmem>>, %arg4: memref<1x1x6x16xf32, #tpu.memory_space<vmem>>, %arg5: memref<1x1x6x16xf32, #tpu.memory_space<vmem>>, %arg6: memref<9x16x32xbf16, #tpu.memory_space<vmem>>, %arg7: memref<1x32xf32, #tpu.memory_space<vmem>>, %arg8: memref<1x1x4x32xf32, #tpu.memory_space<vmem>>) attributes {dimension_semantics = [#tpu.dimension_semantics<parallel>, #tpu.dimension_semantics<parallel>, #tpu.dimension_semantics<parallel>], iteration_bounds = array<i64: 1, 2, 8>, scalar_prefetch = 0 : i64, scratch_operands = 0 : i64, tpu.core_type = #tpu.core_type<tc>, window_params = [{transform_indices = @transform_0, window_bounds = array<i64: 1, 1, 6, 16>}, {transform_indices = @transform_1, window_bounds = array<i64: 1, 1, 6, 16>}, {transform_indices = @transform_2, window_bounds = array<i64: 1, 1, 6, 16>}, {transform_indices = @transform_3, window_bounds = array<i64: 9, 16, 32>}, {transform_indices = @transform_4, window_bounds = array<i64: 1, 32>}, {transform_indices = @transform_5, window_bounds = array<i64: 1, 1, 4, 32>}]} {
    %cst = arith.constant 0.000000e+00 : f32
    %0 = vector.broadcast %cst : f32 to vector<4x32xf32>
    %c0 = arith.constant 0 : index
    %c0_0 = arith.constant 0 : index
    %c0_1 = arith.constant 0 : index
    %c0_2 = arith.constant 0 : index
    %1 = vector.load %arg3[%c0, %c0_0, %c0_1, %c0_2] : memref<1x1x6x16xf32, #tpu.memory_space<vmem>>, vector<1x1x6x16xf32>
    %2 = vector.shape_cast %1 : vector<1x1x6x16xf32> to vector<6x16xf32>
    %3 = arith.truncf %2 : vector<6x16xf32> to vector<6x16xbf16>
    %4 = vector.extract_strided_slice %3 {offsets = [0, 0], sizes = [4, 16], strides = [1, 1]} : vector<6x16xbf16> to vector<4x16xbf16>
    %c0_3 = arith.constant 0 : index
    %c0_4 = arith.constant 0 : index
    %c0_5 = arith.constant 0 : index
    %5 = vector.load %arg6[%c0_3, %c0_4, %c0_5] : memref<9x16x32xbf16, #tpu.memory_space<vmem>>, vector<1x16x32xbf16>
    %6 = vector.shape_cast %5 : vector<1x16x32xbf16> to vector<16x32xbf16>
    %cst_6 = arith.constant dense<0.000000e+00> : vector<4x32xf32>
    %7 = tpu.matmul %4, %6, %cst_6 {dimension_numbers = #tpu.dot_dimension_numbers<[1], [0], [0], [1], [0, 0, 1, 1], [], []>} : vector<4x16xbf16>, vector<16x32xbf16>, vector<4x32xf32> -> vector<4x32xf32>
    %8 = arith.addf %0, %7 : vector<4x32xf32>
    %9 = vector.extract_strided_slice %3 {offsets = [1, 0], sizes = [4, 16], strides = [1, 1]} : vector<6x16xbf16> to vector<4x16xbf16>
    %c1 = arith.constant 1 : index
    %c0_7 = arith.constant 0 : index
    %c0_8 = arith.constant 0 : index
    %10 = vector.load %arg6[%c1, %c0_7, %c0_8] : memref<9x16x32xbf16, #tpu.memory_space<vmem>>, vector<1x16x32xbf16>
    %11 = vector.shape_cast %10 : vector<1x16x32xbf16> to vector<16x32xbf16>
    %cst_9 = arith.constant dense<0.000000e+00> : vector<4x32xf32>
    %12 = tpu.matmul %9, %11, %cst_9 {dimension_numbers = #tpu.dot_dimension_numbers<[1], [0], [0], [1], [0, 0, 1, 1], [], []>} : vector<4x16xbf16>, vector<16x32xbf16>, vector<4x32xf32> -> vector<4x32xf32>
    %13 = arith.addf %8, %12 : vector<4x32xf32>
    %14 = vector.extract_strided_slice %3 {offsets = [2, 0], sizes = [4, 16], strides = [1, 1]} : vector<6x16xbf16> to vector<4x16xbf16>
    %c2 = arith.constant 2 : index
    %c0_10 = arith.constant 0 : index
    %c0_11 = arith.constant 0 : index
    %15 = vector.load %arg6[%c2, %c0_10, %c0_11] : memref<9x16x32xbf16, #tpu.memory_space<vmem>>, vector<1x16x32xbf16>
    %16 = vector.shape_cast %15 : vector<1x16x32xbf16> to vector<16x32xbf16>
    %cst_12 = arith.constant dense<0.000000e+00> : vector<4x32xf32>
    %17 = tpu.matmul %14, %16, %cst_12 {dimension_numbers = #tpu.dot_dimension_numbers<[1], [0], [0], [1], [0, 0, 1, 1], [], []>} : vector<4x16xbf16>, vector<16x32xbf16>, vector<4x32xf32> -> vector<4x32xf32>
    %18 = arith.addf %13, %17 : vector<4x32xf32>
    %c0_13 = arith.constant 0 : index
    %c0_14 = arith.constant 0 : index
    %c0_15 = arith.constant 0 : index
    %c0_16 = arith.constant 0 : index
    %19 = vector.load %arg4[%c0_13, %c0_14, %c0_15, %c0_16] : memref<1x1x6x16xf32, #tpu.memory_space<vmem>>, vector<1x1x6x16xf32>
    %20 = vector.shape_cast %19 : vector<1x1x6x16xf32> to vector<6x16xf32>
    %21 = arith.truncf %20 : vector<6x16xf32> to vector<6x16xbf16>
    %22 = vector.extract_strided_slice %21 {offsets = [0, 0], sizes = [4, 16], strides = [1, 1]} : vector<6x16xbf16> to vector<4x16xbf16>
    %c3 = arith.constant 3 : index
    %c0_17 = arith.constant 0 : index
    %c0_18 = arith.constant 0 : index
    %23 = vector.load %arg6[%c3, %c0_17, %c0_18] : memref<9x16x32xbf16, #tpu.memory_space<vmem>>, vector<1x16x32xbf16>
    %24 = vector.shape_cast %23 : vector<1x16x32xbf16> to vector<16x32xbf16>
    %cst_19 = arith.constant dense<0.000000e+00> : vector<4x32xf32>
    %25 = tpu.matmul %22, %24, %cst_19 {dimension_numbers = #tpu.dot_dimension_numbers<[1], [0], [0], [1], [0, 0, 1, 1], [], []>} : vector<4x16xbf16>, vector<16x32xbf16>, vector<4x32xf32> -> vector<4x32xf32>
    %26 = arith.addf %18, %25 : vector<4x32xf32>
    %27 = vector.extract_strided_slice %21 {offsets = [1, 0], sizes = [4, 16], strides = [1, 1]} : vector<6x16xbf16> to vector<4x16xbf16>
    %c4 = arith.constant 4 : index
    %c0_20 = arith.constant 0 : index
    %c0_21 = arith.constant 0 : index
    %28 = vector.load %arg6[%c4, %c0_20, %c0_21] : memref<9x16x32xbf16, #tpu.memory_space<vmem>>, vector<1x16x32xbf16>
    %29 = vector.shape_cast %28 : vector<1x16x32xbf16> to vector<16x32xbf16>
    %cst_22 = arith.constant dense<0.000000e+00> : vector<4x32xf32>
    %30 = tpu.matmul %27, %29, %cst_22 {dimension_numbers = #tpu.dot_dimension_numbers<[1], [0], [0], [1], [0, 0, 1, 1], [], []>} : vector<4x16xbf16>, vector<16x32xbf16>, vector<4x32xf32> -> vector<4x32xf32>
    %31 = arith.addf %26, %30 : vector<4x32xf32>
    %32 = vector.extract_strided_slice %21 {offsets = [2, 0], sizes = [4, 16], strides = [1, 1]} : vector<6x16xbf16> to vector<4x16xbf16>
    %c5 = arith.constant 5 : index
    %c0_23 = arith.constant 0 : index
    %c0_24 = arith.constant 0 : index
    %33 = vector.load %arg6[%c5, %c0_23, %c0_24] : memref<9x16x32xbf16, #tpu.memory_space<vmem>>, vector<1x16x32xbf16>
    %34 = vector.shape_cast %33 : vector<1x16x32xbf16> to vector<16x32xbf16>
    %cst_25 = arith.constant dense<0.000000e+00> : vector<4x32xf32>
    %35 = tpu.matmul %32, %34, %cst_25 {dimension_numbers = #tpu.dot_dimension_numbers<[1], [0], [0], [1], [0, 0, 1, 1], [], []>} : vector<4x16xbf16>, vector<16x32xbf16>, vector<4x32xf32> -> vector<4x32xf32>
    %36 = arith.addf %31, %35 : vector<4x32xf32>
    %c0_26 = arith.constant 0 : index
    %c0_27 = arith.constant 0 : index
    %c0_28 = arith.constant 0 : index
    %c0_29 = arith.constant 0 : index
    %37 = vector.load %arg5[%c0_26, %c0_27, %c0_28, %c0_29] : memref<1x1x6x16xf32, #tpu.memory_space<vmem>>, vector<1x1x6x16xf32>
    %38 = vector.shape_cast %37 : vector<1x1x6x16xf32> to vector<6x16xf32>
    %39 = arith.truncf %38 : vector<6x16xf32> to vector<6x16xbf16>
    %40 = vector.extract_strided_slice %39 {offsets = [0, 0], sizes = [4, 16], strides = [1, 1]} : vector<6x16xbf16> to vector<4x16xbf16>
    %c6 = arith.constant 6 : index
    %c0_30 = arith.constant 0 : index
    %c0_31 = arith.constant 0 : index
    %41 = vector.load %arg6[%c6, %c0_30, %c0_31] : memref<9x16x32xbf16, #tpu.memory_space<vmem>>, vector<1x16x32xbf16>
    %42 = vector.shape_cast %41 : vector<1x16x32xbf16> to vector<16x32xbf16>
    %cst_32 = arith.constant dense<0.000000e+00> : vector<4x32xf32>
    %43 = tpu.matmul %40, %42, %cst_32 {dimension_numbers = #tpu.dot_dimension_numbers<[1], [0], [0], [1], [0, 0, 1, 1], [], []>} : vector<4x16xbf16>, vector<16x32xbf16>, vector<4x32xf32> -> vector<4x32xf32>
    %44 = arith.addf %36, %43 : vector<4x32xf32>
    %45 = vector.extract_strided_slice %39 {offsets = [1, 0], sizes = [4, 16], strides = [1, 1]} : vector<6x16xbf16> to vector<4x16xbf16>
    %c7 = arith.constant 7 : index
    %c0_33 = arith.constant 0 : index
    %c0_34 = arith.constant 0 : index
    %46 = vector.load %arg6[%c7, %c0_33, %c0_34] : memref<9x16x32xbf16, #tpu.memory_space<vmem>>, vector<1x16x32xbf16>
    %47 = vector.shape_cast %46 : vector<1x16x32xbf16> to vector<16x32xbf16>
    %cst_35 = arith.constant dense<0.000000e+00> : vector<4x32xf32>
    %48 = tpu.matmul %45, %47, %cst_35 {dimension_numbers = #tpu.dot_dimension_numbers<[1], [0], [0], [1], [0, 0, 1, 1], [], []>} : vector<4x16xbf16>, vector<16x32xbf16>, vector<4x32xf32> -> vector<4x32xf32>
    %49 = arith.addf %44, %48 : vector<4x32xf32>
    %50 = vector.extract_strided_slice %39 {offsets = [2, 0], sizes = [4, 16], strides = [1, 1]} : vector<6x16xbf16> to vector<4x16xbf16>
    %c8 = arith.constant 8 : index
    %c0_36 = arith.constant 0 : index
    %c0_37 = arith.constant 0 : index
    %51 = vector.load %arg6[%c8, %c0_36, %c0_37] : memref<9x16x32xbf16, #tpu.memory_space<vmem>>, vector<1x16x32xbf16>
    %52 = vector.shape_cast %51 : vector<1x16x32xbf16> to vector<16x32xbf16>
    %cst_38 = arith.constant dense<0.000000e+00> : vector<4x32xf32>
    %53 = tpu.matmul %50, %52, %cst_38 {dimension_numbers = #tpu.dot_dimension_numbers<[1], [0], [0], [1], [0, 0, 1, 1], [], []>} : vector<4x16xbf16>, vector<16x32xbf16>, vector<4x32xf32> -> vector<4x32xf32>
    %54 = arith.addf %49, %53 : vector<4x32xf32>
    %c0_39 = arith.constant 0 : index
    %c0_40 = arith.constant 0 : index
    %55 = vector.load %arg7[%c0_39, %c0_40] : memref<1x32xf32, #tpu.memory_space<vmem>>, vector<1x32xf32>
    %56 = vector.broadcast %55 : vector<1x32xf32> to vector<4x32xf32>
    %57 = arith.addf %54, %56 : vector<4x32xf32>
    %cst_41 = arith.constant 0.000000e+00 : f32
    %58 = vector.broadcast %cst_41 : f32 to vector<4x32xf32>
    %59 = arith.maximumf %57, %58 : vector<4x32xf32>
    %c0_42 = arith.constant 0 : index
    %c0_43 = arith.constant 0 : index
    %c0_44 = arith.constant 0 : index
    %c0_45 = arith.constant 0 : index
    %60 = vector.load %arg8[%c0_42, %c0_43, %c0_44, %c0_45] : memref<1x1x4x32xf32, #tpu.memory_space<vmem>>, vector<1x1x4x32xf32>
    %61 = vector.shape_cast %60 : vector<1x1x4x32xf32> to vector<4x32xf32>
    %62 = vector.shape_cast %59 : vector<4x32xf32> to vector<1x1x4x32xf32>
    tpu.vector_store %arg8[%c0_42, %c0_43, %c0_44, %c0_45], %62 {strides = array<i32>} : memref<1x1x4x32xf32, #tpu.memory_space<vmem>>, vector<1x1x4x32xf32>,
    return
  }
  func.func @transform_0(%arg0: i32, %arg1: i32, %arg2: i32) -> (i32, i32, i32, i32) {
    %c0_i32 = arith.constant 0 : i32
    %0 = arith.addi %arg2, %c0_i32 : i32
    %c0_i32_0 = arith.constant 0 : i32
    %c0_i32_1 = arith.constant 0 : i32
    %c0_i32_2 = arith.constant 0 : i32
    return %arg1, %0, %c0_i32_0, %c0_i32_1 : i32, i32, i32, i32
  }
  func.func @transform_1(%arg0: i32, %arg1: i32, %arg2: i32) -> (i32, i32, i32, i32) {
    %c1_i32 = arith.constant 1 : i32
    %0 = arith.addi %arg2, %c1_i32 : i32
    %c0_i32 = arith.constant 0 : i32
    %c0_i32_0 = arith.constant 0 : i32
    %c0_i32_1 = arith.constant 0 : i32
    return %arg1, %0, %c0_i32, %c0_i32_0 : i32, i32, i32, i32
  }
  func.func @transform_2(%arg0: i32, %arg1: i32, %arg2: i32) -> (i32, i32, i32, i32) {
    %c2_i32 = arith.constant 2 : i32
    %0 = arith.addi %arg2, %c2_i32 : i32
    %c0_i32 = arith.constant 0 : i32
    %c0_i32_0 = arith.constant 0 : i32
    %c0_i32_1 = arith.constant 0 : i32
    return %arg1, %0, %c0_i32, %c0_i32_0 : i32, i32, i32, i32
  }
  func.func @transform_3(%arg0: i32, %arg1: i32, %arg2: i32) -> (i32, i32, i32) {
    %c0_i32 = arith.constant 0 : i32
    %c0_i32_0 = arith.constant 0 : i32
    %c0_i32_1 = arith.constant 0 : i32
    return %c0_i32, %c0_i32_0, %arg0 : i32, i32, i32
  }
  func.func @transform_4(%arg0: i32, %arg1: i32, %arg2: i32) -> (i32, i32) {
    %c0_i32 = arith.constant 0 : i32
    %c0_i32_0 = arith.constant 0 : i32
    return %c0_i32, %arg0 : i32, i32
  }
  func.func @transform_5(%arg0: i32, %arg1: i32, %arg2: i32) -> (i32, i32, i32, i32) {
    %c0_i32 = arith.constant 0 : i32
    %c0_i32_0 = arith.constant 0 : i32
    return %arg1, %arg2, %c0_i32, %arg0 : i32, i32, i32, i32
  }
}

module attributes {stable_mosaic.version = 11 : i64} {
  func.func @_conv_row_kernel(%arg0: i32, %arg1: i32, %arg2: i32, %arg3: memref<1x1x6x32xf32, #tpu.memory_space<vmem>>, %arg4: memref<1x1x6x32xf32, #tpu.memory_space<vmem>>, %arg5: memref<1x1x6x32xf32, #tpu.memory_space<vmem>>, %arg6: memref<9x32x32xbf16, #tpu.memory_space<vmem>>, %arg7: memref<1x32xf32, #tpu.memory_space<vmem>>, %arg8: memref<1x1x4x32xf32, #tpu.memory_space<vmem>>) attributes {dimension_semantics = [#tpu.dimension_semantics<parallel>, #tpu.dimension_semantics<parallel>, #tpu.dimension_semantics<parallel>], iteration_bounds = array<i64: 1, 2, 8>, scalar_prefetch = 0 : i64, scratch_operands = 0 : i64, tpu.core_type = #tpu.core_type<tc>, window_params = [{transform_indices = @transform_0, window_bounds = array<i64: 1, 1, 6, 32>}, {transform_indices = @transform_1, window_bounds = array<i64: 1, 1, 6, 32>}, {transform_indices = @transform_2, window_bounds = array<i64: 1, 1, 6, 32>}, {transform_indices = @transform_3, window_bounds = array<i64: 9, 32, 32>}, {transform_indices = @transform_4, window_bounds = array<i64: 1, 32>}, {transform_indices = @transform_5, window_bounds = array<i64: 1, 1, 4, 32>}]} {
    %cst = arith.constant 0.000000e+00 : f32
    %0 = vector.broadcast %cst : f32 to vector<4x32xf32>
    %c0 = arith.constant 0 : index
    %c0_0 = arith.constant 0 : index
    %c0_1 = arith.constant 0 : index
    %c0_2 = arith.constant 0 : index
    %1 = vector.load %arg3[%c0, %c0_0, %c0_1, %c0_2] : memref<1x1x6x32xf32, #tpu.memory_space<vmem>>, vector<1x1x6x32xf32>
    %2 = vector.shape_cast %1 : vector<1x1x6x32xf32> to vector<6x32xf32>
    %3 = arith.truncf %2 : vector<6x32xf32> to vector<6x32xbf16>
    %4 = vector.extract_strided_slice %3 {offsets = [0, 0], sizes = [4, 32], strides = [1, 1]} : vector<6x32xbf16> to vector<4x32xbf16>
    %c0_3 = arith.constant 0 : index
    %c0_4 = arith.constant 0 : index
    %c0_5 = arith.constant 0 : index
    %5 = vector.load %arg6[%c0_3, %c0_4, %c0_5] : memref<9x32x32xbf16, #tpu.memory_space<vmem>>, vector<1x32x32xbf16>
    %6 = vector.shape_cast %5 : vector<1x32x32xbf16> to vector<32x32xbf16>
    %cst_6 = arith.constant dense<0.000000e+00> : vector<4x32xf32>
    %7 = tpu.matmul %4, %6, %cst_6 {dimension_numbers = #tpu.dot_dimension_numbers<[1], [0], [0], [1], [0, 0, 1, 1], [], []>} : vector<4x32xbf16>, vector<32x32xbf16>, vector<4x32xf32> -> vector<4x32xf32>
    %8 = arith.addf %0, %7 : vector<4x32xf32>
    %9 = vector.extract_strided_slice %3 {offsets = [1, 0], sizes = [4, 32], strides = [1, 1]} : vector<6x32xbf16> to vector<4x32xbf16>
    %c1 = arith.constant 1 : index
    %c0_7 = arith.constant 0 : index
    %c0_8 = arith.constant 0 : index
    %10 = vector.load %arg6[%c1, %c0_7, %c0_8] : memref<9x32x32xbf16, #tpu.memory_space<vmem>>, vector<1x32x32xbf16>
    %11 = vector.shape_cast %10 : vector<1x32x32xbf16> to vector<32x32xbf16>
    %cst_9 = arith.constant dense<0.000000e+00> : vector<4x32xf32>
    %12 = tpu.matmul %9, %11, %cst_9 {dimension_numbers = #tpu.dot_dimension_numbers<[1], [0], [0], [1], [0, 0, 1, 1], [], []>} : vector<4x32xbf16>, vector<32x32xbf16>, vector<4x32xf32> -> vector<4x32xf32>
    %13 = arith.addf %8, %12 : vector<4x32xf32>
    %14 = vector.extract_strided_slice %3 {offsets = [2, 0], sizes = [4, 32], strides = [1, 1]} : vector<6x32xbf16> to vector<4x32xbf16>
    %c2 = arith.constant 2 : index
    %c0_10 = arith.constant 0 : index
    %c0_11 = arith.constant 0 : index
    %15 = vector.load %arg6[%c2, %c0_10, %c0_11] : memref<9x32x32xbf16, #tpu.memory_space<vmem>>, vector<1x32x32xbf16>
    %16 = vector.shape_cast %15 : vector<1x32x32xbf16> to vector<32x32xbf16>
    %cst_12 = arith.constant dense<0.000000e+00> : vector<4x32xf32>
    %17 = tpu.matmul %14, %16, %cst_12 {dimension_numbers = #tpu.dot_dimension_numbers<[1], [0], [0], [1], [0, 0, 1, 1], [], []>} : vector<4x32xbf16>, vector<32x32xbf16>, vector<4x32xf32> -> vector<4x32xf32>
    %18 = arith.addf %13, %17 : vector<4x32xf32>
    %c0_13 = arith.constant 0 : index
    %c0_14 = arith.constant 0 : index
    %c0_15 = arith.constant 0 : index
    %c0_16 = arith.constant 0 : index
    %19 = vector.load %arg4[%c0_13, %c0_14, %c0_15, %c0_16] : memref<1x1x6x32xf32, #tpu.memory_space<vmem>>, vector<1x1x6x32xf32>
    %20 = vector.shape_cast %19 : vector<1x1x6x32xf32> to vector<6x32xf32>
    %21 = arith.truncf %20 : vector<6x32xf32> to vector<6x32xbf16>
    %22 = vector.extract_strided_slice %21 {offsets = [0, 0], sizes = [4, 32], strides = [1, 1]} : vector<6x32xbf16> to vector<4x32xbf16>
    %c3 = arith.constant 3 : index
    %c0_17 = arith.constant 0 : index
    %c0_18 = arith.constant 0 : index
    %23 = vector.load %arg6[%c3, %c0_17, %c0_18] : memref<9x32x32xbf16, #tpu.memory_space<vmem>>, vector<1x32x32xbf16>
    %24 = vector.shape_cast %23 : vector<1x32x32xbf16> to vector<32x32xbf16>
    %cst_19 = arith.constant dense<0.000000e+00> : vector<4x32xf32>
    %25 = tpu.matmul %22, %24, %cst_19 {dimension_numbers = #tpu.dot_dimension_numbers<[1], [0], [0], [1], [0, 0, 1, 1], [], []>} : vector<4x32xbf16>, vector<32x32xbf16>, vector<4x32xf32> -> vector<4x32xf32>
    %26 = arith.addf %18, %25 : vector<4x32xf32>
    %27 = vector.extract_strided_slice %21 {offsets = [1, 0], sizes = [4, 32], strides = [1, 1]} : vector<6x32xbf16> to vector<4x32xbf16>
    %c4 = arith.constant 4 : index
    %c0_20 = arith.constant 0 : index
    %c0_21 = arith.constant 0 : index
    %28 = vector.load %arg6[%c4, %c0_20, %c0_21] : memref<9x32x32xbf16, #tpu.memory_space<vmem>>, vector<1x32x32xbf16>
    %29 = vector.shape_cast %28 : vector<1x32x32xbf16> to vector<32x32xbf16>
    %cst_22 = arith.constant dense<0.000000e+00> : vector<4x32xf32>
    %30 = tpu.matmul %27, %29, %cst_22 {dimension_numbers = #tpu.dot_dimension_numbers<[1], [0], [0], [1], [0, 0, 1, 1], [], []>} : vector<4x32xbf16>, vector<32x32xbf16>, vector<4x32xf32> -> vector<4x32xf32>
    %31 = arith.addf %26, %30 : vector<4x32xf32>
    %32 = vector.extract_strided_slice %21 {offsets = [2, 0], sizes = [4, 32], strides = [1, 1]} : vector<6x32xbf16> to vector<4x32xbf16>
    %c5 = arith.constant 5 : index
    %c0_23 = arith.constant 0 : index
    %c0_24 = arith.constant 0 : index
    %33 = vector.load %arg6[%c5, %c0_23, %c0_24] : memref<9x32x32xbf16, #tpu.memory_space<vmem>>, vector<1x32x32xbf16>
    %34 = vector.shape_cast %33 : vector<1x32x32xbf16> to vector<32x32xbf16>
    %cst_25 = arith.constant dense<0.000000e+00> : vector<4x32xf32>
    %35 = tpu.matmul %32, %34, %cst_25 {dimension_numbers = #tpu.dot_dimension_numbers<[1], [0], [0], [1], [0, 0, 1, 1], [], []>} : vector<4x32xbf16>, vector<32x32xbf16>, vector<4x32xf32> -> vector<4x32xf32>
    %36 = arith.addf %31, %35 : vector<4x32xf32>
    %c0_26 = arith.constant 0 : index
    %c0_27 = arith.constant 0 : index
    %c0_28 = arith.constant 0 : index
    %c0_29 = arith.constant 0 : index
    %37 = vector.load %arg5[%c0_26, %c0_27, %c0_28, %c0_29] : memref<1x1x6x32xf32, #tpu.memory_space<vmem>>, vector<1x1x6x32xf32>
    %38 = vector.shape_cast %37 : vector<1x1x6x32xf32> to vector<6x32xf32>
    %39 = arith.truncf %38 : vector<6x32xf32> to vector<6x32xbf16>
    %40 = vector.extract_strided_slice %39 {offsets = [0, 0], sizes = [4, 32], strides = [1, 1]} : vector<6x32xbf16> to vector<4x32xbf16>
    %c6 = arith.constant 6 : index
    %c0_30 = arith.constant 0 : index
    %c0_31 = arith.constant 0 : index
    %41 = vector.load %arg6[%c6, %c0_30, %c0_31] : memref<9x32x32xbf16, #tpu.memory_space<vmem>>, vector<1x32x32xbf16>
    %42 = vector.shape_cast %41 : vector<1x32x32xbf16> to vector<32x32xbf16>
    %cst_32 = arith.constant dense<0.000000e+00> : vector<4x32xf32>
    %43 = tpu.matmul %40, %42, %cst_32 {dimension_numbers = #tpu.dot_dimension_numbers<[1], [0], [0], [1], [0, 0, 1, 1], [], []>} : vector<4x32xbf16>, vector<32x32xbf16>, vector<4x32xf32> -> vector<4x32xf32>
    %44 = arith.addf %36, %43 : vector<4x32xf32>
    %45 = vector.extract_strided_slice %39 {offsets = [1, 0], sizes = [4, 32], strides = [1, 1]} : vector<6x32xbf16> to vector<4x32xbf16>
    %c7 = arith.constant 7 : index
    %c0_33 = arith.constant 0 : index
    %c0_34 = arith.constant 0 : index
    %46 = vector.load %arg6[%c7, %c0_33, %c0_34] : memref<9x32x32xbf16, #tpu.memory_space<vmem>>, vector<1x32x32xbf16>
    %47 = vector.shape_cast %46 : vector<1x32x32xbf16> to vector<32x32xbf16>
    %cst_35 = arith.constant dense<0.000000e+00> : vector<4x32xf32>
    %48 = tpu.matmul %45, %47, %cst_35 {dimension_numbers = #tpu.dot_dimension_numbers<[1], [0], [0], [1], [0, 0, 1, 1], [], []>} : vector<4x32xbf16>, vector<32x32xbf16>, vector<4x32xf32> -> vector<4x32xf32>
    %49 = arith.addf %44, %48 : vector<4x32xf32>
    %50 = vector.extract_strided_slice %39 {offsets = [2, 0], sizes = [4, 32], strides = [1, 1]} : vector<6x32xbf16> to vector<4x32xbf16>
    %c8 = arith.constant 8 : index
    %c0_36 = arith.constant 0 : index
    %c0_37 = arith.constant 0 : index
    %51 = vector.load %arg6[%c8, %c0_36, %c0_37] : memref<9x32x32xbf16, #tpu.memory_space<vmem>>, vector<1x32x32xbf16>
    %52 = vector.shape_cast %51 : vector<1x32x32xbf16> to vector<32x32xbf16>
    %cst_38 = arith.constant dense<0.000000e+00> : vector<4x32xf32>
    %53 = tpu.matmul %50, %52, %cst_38 {dimension_numbers = #tpu.dot_dimension_numbers<[1], [0], [0], [1], [0, 0, 1, 1], [], []>} : vector<4x32xbf16>, vector<32x32xbf16>, vector<4x32xf32> -> vector<4x32xf32>
    %54 = arith.addf %49, %53 : vector<4x32xf32>
    %c0_39 = arith.constant 0 : index
    %c0_40 = arith.constant 0 : index
    %55 = vector.load %arg7[%c0_39, %c0_40] : memref<1x32xf32, #tpu.memory_space<vmem>>, vector<1x32xf32>
    %56 = vector.broadcast %55 : vector<1x32xf32> to vector<4x32xf32>
    %57 = arith.addf %54, %56 : vector<4x32xf32>
    %cst_41 = arith.constant 0.000000e+00 : f32
    %58 = vector.broadcast %cst_41 : f32 to vector<4x32xf32>
    %59 = arith.maximumf %57, %58 : vector<4x32xf32>
    %c0_42 = arith.constant 0 : index
    %c0_43 = arith.constant 0 : index
    %c0_44 = arith.constant 0 : index
    %c0_45 = arith.constant 0 : index
    %60 = vector.load %arg8[%c0_42, %c0_43, %c0_44, %c0_45] : memref<1x1x4x32xf32, #tpu.memory_space<vmem>>, vector<1x1x4x32xf32>
    %61 = vector.shape_cast %60 : vector<1x1x4x32xf32> to vector<4x32xf32>
    %62 = vector.shape_cast %59 : vector<4x32xf32> to vector<1x1x4x32xf32>
    tpu.vector_store %arg8[%c0_42, %c0_43, %c0_44, %c0_45], %62 {strides = array<i32>} : memref<1x1x4x32xf32, #tpu.memory_space<vmem>>, vector<1x1x4x32xf32>,
    return
  }
  func.func @transform_0(%arg0: i32, %arg1: i32, %arg2: i32) -> (i32, i32, i32, i32) {
    %c0_i32 = arith.constant 0 : i32
    %0 = arith.addi %arg2, %c0_i32 : i32
    %c0_i32_0 = arith.constant 0 : i32
    %c0_i32_1 = arith.constant 0 : i32
    %c0_i32_2 = arith.constant 0 : i32
    return %arg1, %0, %c0_i32_0, %c0_i32_1 : i32, i32, i32, i32
  }
  func.func @transform_1(%arg0: i32, %arg1: i32, %arg2: i32) -> (i32, i32, i32, i32) {
    %c1_i32 = arith.constant 1 : i32
    %0 = arith.addi %arg2, %c1_i32 : i32
    %c0_i32 = arith.constant 0 : i32
    %c0_i32_0 = arith.constant 0 : i32
    %c0_i32_1 = arith.constant 0 : i32
    return %arg1, %0, %c0_i32, %c0_i32_0 : i32, i32, i32, i32
  }
  func.func @transform_2(%arg0: i32, %arg1: i32, %arg2: i32) -> (i32, i32, i32, i32) {
    %c2_i32 = arith.constant 2 : i32
    %0 = arith.addi %arg2, %c2_i32 : i32
    %c0_i32 = arith.constant 0 : i32
    %c0_i32_0 = arith.constant 0 : i32
    %c0_i32_1 = arith.constant 0 : i32
    return %arg1, %0, %c0_i32, %c0_i32_0 : i32, i32, i32, i32
  }
  func.func @transform_3(%arg0: i32, %arg1: i32, %arg2: i32) -> (i32, i32, i32) {
    %c0_i32 = arith.constant 0 : i32
    %c0_i32_0 = arith.constant 0 : i32
    %c0_i32_1 = arith.constant 0 : i32
    return %c0_i32, %c0_i32_0, %arg0 : i32, i32, i32
  }
  func.func @transform_4(%arg0: i32, %arg1: i32, %arg2: i32) -> (i32, i32) {
    %c0_i32 = arith.constant 0 : i32
    %c0_i32_0 = arith.constant 0 : i32
    return %c0_i32, %arg0 : i32, i32
  }
  func.func @transform_5(%arg0: i32, %arg1: i32, %arg2: i32) -> (i32, i32, i32, i32) {
    %c0_i32 = arith.constant 0 : i32
    %c0_i32_0 = arith.constant 0 : i32
    return %arg1, %arg2, %c0_i32, %arg0 : i32, i32, i32, i32
  }
}

module attributes {stable_mosaic.version = 11 : i64} {
  func.func @_maxpool_kernel(%arg0: i32, %arg1: i32, %arg2: memref<1x2x4x32xf32, #tpu.memory_space<vmem>>, %arg3: memref<1x1x4x32xf32, #tpu.memory_space<vmem>>) attributes {dimension_semantics = [#tpu.dimension_semantics<parallel>, #tpu.dimension_semantics<parallel>], iteration_bounds = array<i64: 2, 4>, scalar_prefetch = 0 : i64, scratch_operands = 0 : i64, tpu.core_type = #tpu.core_type<tc>, window_params = [{transform_indices = @transform_0, window_bounds = array<i64: 1, 2, 4, 32>}, {transform_indices = @transform_1, window_bounds = array<i64: 1, 1, 4, 32>}]} {
    %c0 = arith.constant 0 : index
    %c0_0 = arith.constant 0 : index
    %c0_1 = arith.constant 0 : index
    %c0_2 = arith.constant 0 : index
    %0 = vector.load %arg2[%c0, %c0_0, %c0_1, %c0_2] : memref<1x2x4x32xf32, #tpu.memory_space<vmem>>, vector<1x1x4x32xf32>
    %1 = vector.shape_cast %0 : vector<1x1x4x32xf32> to vector<4x32xf32>
    %c0_3 = arith.constant 0 : index
    %c1 = arith.constant 1 : index
    %c0_4 = arith.constant 0 : index
    %c0_5 = arith.constant 0 : index
    %2 = vector.load %arg2[%c0_3, %c1, %c0_4, %c0_5] : memref<1x2x4x32xf32, #tpu.memory_space<vmem>>, vector<1x1x4x32xf32>
    %3 = vector.shape_cast %2 : vector<1x1x4x32xf32> to vector<4x32xf32>
    %4 = arith.maximumf %1, %3 : vector<4x32xf32>
    %c0_6 = arith.constant 0 : index
    %c0_7 = arith.constant 0 : index
    %c0_8 = arith.constant 0 : index
    %c0_9 = arith.constant 0 : index
    %5 = vector.load %arg3[%c0_6, %c0_7, %c0_8, %c0_9] : memref<1x1x4x32xf32, #tpu.memory_space<vmem>>, vector<1x1x4x32xf32>
    %6 = vector.shape_cast %5 : vector<1x1x4x32xf32> to vector<4x32xf32>
    %7 = vector.shape_cast %4 : vector<4x32xf32> to vector<1x1x4x32xf32>
    tpu.vector_store %arg3[%c0_6, %c0_7, %c0_8, %c0_9], %7 {strides = array<i32>} : memref<1x1x4x32xf32, #tpu.memory_space<vmem>>, vector<1x1x4x32xf32>,
    return
  }
  func.func @transform_0(%arg0: i32, %arg1: i32) -> (i32, i32, i32, i32) {
    %c0_i32 = arith.constant 0 : i32
    %c0_i32_0 = arith.constant 0 : i32
    %c0_i32_1 = arith.constant 0 : i32
    return %arg0, %arg1, %c0_i32, %c0_i32_0 : i32, i32, i32, i32
  }
  func.func @transform_1(%arg0: i32, %arg1: i32) -> (i32, i32, i32, i32) {
    %c0_i32 = arith.constant 0 : i32
    %c0_i32_0 = arith.constant 0 : i32
    %c0_i32_1 = arith.constant 0 : i32
    return %arg0, %arg1, %c0_i32, %c0_i32_0 : i32, i32, i32, i32
  }
}

module attributes {stable_mosaic.version = 11 : i64} {
  func.func @_conv_row_kernel(%arg0: i32, %arg1: i32, %arg2: i32, %arg3: memref<1x1x6x32xf32, #tpu.memory_space<vmem>>, %arg4: memref<1x1x6x32xf32, #tpu.memory_space<vmem>>, %arg5: memref<1x1x6x32xf32, #tpu.memory_space<vmem>>, %arg6: memref<9x32x64xbf16, #tpu.memory_space<vmem>>, %arg7: memref<1x64xf32, #tpu.memory_space<vmem>>, %arg8: memref<1x1x4x64xf32, #tpu.memory_space<vmem>>) attributes {dimension_semantics = [#tpu.dimension_semantics<parallel>, #tpu.dimension_semantics<parallel>, #tpu.dimension_semantics<parallel>], iteration_bounds = array<i64: 1, 2, 4>, scalar_prefetch = 0 : i64, scratch_operands = 0 : i64, tpu.core_type = #tpu.core_type<tc>, window_params = [{transform_indices = @transform_0, window_bounds = array<i64: 1, 1, 6, 32>}, {transform_indices = @transform_1, window_bounds = array<i64: 1, 1, 6, 32>}, {transform_indices = @transform_2, window_bounds = array<i64: 1, 1, 6, 32>}, {transform_indices = @transform_3, window_bounds = array<i64: 9, 32, 64>}, {transform_indices = @transform_4, window_bounds = array<i64: 1, 64>}, {transform_indices = @transform_5, window_bounds = array<i64: 1, 1, 4, 64>}]} {
    %cst = arith.constant 0.000000e+00 : f32
    %0 = vector.broadcast %cst : f32 to vector<4x64xf32>
    %c0 = arith.constant 0 : index
    %c0_0 = arith.constant 0 : index
    %c0_1 = arith.constant 0 : index
    %c0_2 = arith.constant 0 : index
    %1 = vector.load %arg3[%c0, %c0_0, %c0_1, %c0_2] : memref<1x1x6x32xf32, #tpu.memory_space<vmem>>, vector<1x1x6x32xf32>
    %2 = vector.shape_cast %1 : vector<1x1x6x32xf32> to vector<6x32xf32>
    %3 = arith.truncf %2 : vector<6x32xf32> to vector<6x32xbf16>
    %4 = vector.extract_strided_slice %3 {offsets = [0, 0], sizes = [4, 32], strides = [1, 1]} : vector<6x32xbf16> to vector<4x32xbf16>
    %c0_3 = arith.constant 0 : index
    %c0_4 = arith.constant 0 : index
    %c0_5 = arith.constant 0 : index
    %5 = vector.load %arg6[%c0_3, %c0_4, %c0_5] : memref<9x32x64xbf16, #tpu.memory_space<vmem>>, vector<1x32x64xbf16>
    %6 = vector.shape_cast %5 : vector<1x32x64xbf16> to vector<32x64xbf16>
    %cst_6 = arith.constant dense<0.000000e+00> : vector<4x64xf32>
    %7 = tpu.matmul %4, %6, %cst_6 {dimension_numbers = #tpu.dot_dimension_numbers<[1], [0], [0], [1], [0, 0, 1, 1], [], []>} : vector<4x32xbf16>, vector<32x64xbf16>, vector<4x64xf32> -> vector<4x64xf32>
    %8 = arith.addf %0, %7 : vector<4x64xf32>
    %9 = vector.extract_strided_slice %3 {offsets = [1, 0], sizes = [4, 32], strides = [1, 1]} : vector<6x32xbf16> to vector<4x32xbf16>
    %c1 = arith.constant 1 : index
    %c0_7 = arith.constant 0 : index
    %c0_8 = arith.constant 0 : index
    %10 = vector.load %arg6[%c1, %c0_7, %c0_8] : memref<9x32x64xbf16, #tpu.memory_space<vmem>>, vector<1x32x64xbf16>
    %11 = vector.shape_cast %10 : vector<1x32x64xbf16> to vector<32x64xbf16>
    %cst_9 = arith.constant dense<0.000000e+00> : vector<4x64xf32>
    %12 = tpu.matmul %9, %11, %cst_9 {dimension_numbers = #tpu.dot_dimension_numbers<[1], [0], [0], [1], [0, 0, 1, 1], [], []>} : vector<4x32xbf16>, vector<32x64xbf16>, vector<4x64xf32> -> vector<4x64xf32>
    %13 = arith.addf %8, %12 : vector<4x64xf32>
    %14 = vector.extract_strided_slice %3 {offsets = [2, 0], sizes = [4, 32], strides = [1, 1]} : vector<6x32xbf16> to vector<4x32xbf16>
    %c2 = arith.constant 2 : index
    %c0_10 = arith.constant 0 : index
    %c0_11 = arith.constant 0 : index
    %15 = vector.load %arg6[%c2, %c0_10, %c0_11] : memref<9x32x64xbf16, #tpu.memory_space<vmem>>, vector<1x32x64xbf16>
    %16 = vector.shape_cast %15 : vector<1x32x64xbf16> to vector<32x64xbf16>
    %cst_12 = arith.constant dense<0.000000e+00> : vector<4x64xf32>
    %17 = tpu.matmul %14, %16, %cst_12 {dimension_numbers = #tpu.dot_dimension_numbers<[1], [0], [0], [1], [0, 0, 1, 1], [], []>} : vector<4x32xbf16>, vector<32x64xbf16>, vector<4x64xf32> -> vector<4x64xf32>
    %18 = arith.addf %13, %17 : vector<4x64xf32>
    %c0_13 = arith.constant 0 : index
    %c0_14 = arith.constant 0 : index
    %c0_15 = arith.constant 0 : index
    %c0_16 = arith.constant 0 : index
    %19 = vector.load %arg4[%c0_13, %c0_14, %c0_15, %c0_16] : memref<1x1x6x32xf32, #tpu.memory_space<vmem>>, vector<1x1x6x32xf32>
    %20 = vector.shape_cast %19 : vector<1x1x6x32xf32> to vector<6x32xf32>
    %21 = arith.truncf %20 : vector<6x32xf32> to vector<6x32xbf16>
    %22 = vector.extract_strided_slice %21 {offsets = [0, 0], sizes = [4, 32], strides = [1, 1]} : vector<6x32xbf16> to vector<4x32xbf16>
    %c3 = arith.constant 3 : index
    %c0_17 = arith.constant 0 : index
    %c0_18 = arith.constant 0 : index
    %23 = vector.load %arg6[%c3, %c0_17, %c0_18] : memref<9x32x64xbf16, #tpu.memory_space<vmem>>, vector<1x32x64xbf16>
    %24 = vector.shape_cast %23 : vector<1x32x64xbf16> to vector<32x64xbf16>
    %cst_19 = arith.constant dense<0.000000e+00> : vector<4x64xf32>
    %25 = tpu.matmul %22, %24, %cst_19 {dimension_numbers = #tpu.dot_dimension_numbers<[1], [0], [0], [1], [0, 0, 1, 1], [], []>} : vector<4x32xbf16>, vector<32x64xbf16>, vector<4x64xf32> -> vector<4x64xf32>
    %26 = arith.addf %18, %25 : vector<4x64xf32>
    %27 = vector.extract_strided_slice %21 {offsets = [1, 0], sizes = [4, 32], strides = [1, 1]} : vector<6x32xbf16> to vector<4x32xbf16>
    %c4 = arith.constant 4 : index
    %c0_20 = arith.constant 0 : index
    %c0_21 = arith.constant 0 : index
    %28 = vector.load %arg6[%c4, %c0_20, %c0_21] : memref<9x32x64xbf16, #tpu.memory_space<vmem>>, vector<1x32x64xbf16>
    %29 = vector.shape_cast %28 : vector<1x32x64xbf16> to vector<32x64xbf16>
    %cst_22 = arith.constant dense<0.000000e+00> : vector<4x64xf32>
    %30 = tpu.matmul %27, %29, %cst_22 {dimension_numbers = #tpu.dot_dimension_numbers<[1], [0], [0], [1], [0, 0, 1, 1], [], []>} : vector<4x32xbf16>, vector<32x64xbf16>, vector<4x64xf32> -> vector<4x64xf32>
    %31 = arith.addf %26, %30 : vector<4x64xf32>
    %32 = vector.extract_strided_slice %21 {offsets = [2, 0], sizes = [4, 32], strides = [1, 1]} : vector<6x32xbf16> to vector<4x32xbf16>
    %c5 = arith.constant 5 : index
    %c0_23 = arith.constant 0 : index
    %c0_24 = arith.constant 0 : index
    %33 = vector.load %arg6[%c5, %c0_23, %c0_24] : memref<9x32x64xbf16, #tpu.memory_space<vmem>>, vector<1x32x64xbf16>
    %34 = vector.shape_cast %33 : vector<1x32x64xbf16> to vector<32x64xbf16>
    %cst_25 = arith.constant dense<0.000000e+00> : vector<4x64xf32>
    %35 = tpu.matmul %32, %34, %cst_25 {dimension_numbers = #tpu.dot_dimension_numbers<[1], [0], [0], [1], [0, 0, 1, 1], [], []>} : vector<4x32xbf16>, vector<32x64xbf16>, vector<4x64xf32> -> vector<4x64xf32>
    %36 = arith.addf %31, %35 : vector<4x64xf32>
    %c0_26 = arith.constant 0 : index
    %c0_27 = arith.constant 0 : index
    %c0_28 = arith.constant 0 : index
    %c0_29 = arith.constant 0 : index
    %37 = vector.load %arg5[%c0_26, %c0_27, %c0_28, %c0_29] : memref<1x1x6x32xf32, #tpu.memory_space<vmem>>, vector<1x1x6x32xf32>
    %38 = vector.shape_cast %37 : vector<1x1x6x32xf32> to vector<6x32xf32>
    %39 = arith.truncf %38 : vector<6x32xf32> to vector<6x32xbf16>
    %40 = vector.extract_strided_slice %39 {offsets = [0, 0], sizes = [4, 32], strides = [1, 1]} : vector<6x32xbf16> to vector<4x32xbf16>
    %c6 = arith.constant 6 : index
    %c0_30 = arith.constant 0 : index
    %c0_31 = arith.constant 0 : index
    %41 = vector.load %arg6[%c6, %c0_30, %c0_31] : memref<9x32x64xbf16, #tpu.memory_space<vmem>>, vector<1x32x64xbf16>
    %42 = vector.shape_cast %41 : vector<1x32x64xbf16> to vector<32x64xbf16>
    %cst_32 = arith.constant dense<0.000000e+00> : vector<4x64xf32>
    %43 = tpu.matmul %40, %42, %cst_32 {dimension_numbers = #tpu.dot_dimension_numbers<[1], [0], [0], [1], [0, 0, 1, 1], [], []>} : vector<4x32xbf16>, vector<32x64xbf16>, vector<4x64xf32> -> vector<4x64xf32>
    %44 = arith.addf %36, %43 : vector<4x64xf32>
    %45 = vector.extract_strided_slice %39 {offsets = [1, 0], sizes = [4, 32], strides = [1, 1]} : vector<6x32xbf16> to vector<4x32xbf16>
    %c7 = arith.constant 7 : index
    %c0_33 = arith.constant 0 : index
    %c0_34 = arith.constant 0 : index
    %46 = vector.load %arg6[%c7, %c0_33, %c0_34] : memref<9x32x64xbf16, #tpu.memory_space<vmem>>, vector<1x32x64xbf16>
    %47 = vector.shape_cast %46 : vector<1x32x64xbf16> to vector<32x64xbf16>
    %cst_35 = arith.constant dense<0.000000e+00> : vector<4x64xf32>
    %48 = tpu.matmul %45, %47, %cst_35 {dimension_numbers = #tpu.dot_dimension_numbers<[1], [0], [0], [1], [0, 0, 1, 1], [], []>} : vector<4x32xbf16>, vector<32x64xbf16>, vector<4x64xf32> -> vector<4x64xf32>
    %49 = arith.addf %44, %48 : vector<4x64xf32>
    %50 = vector.extract_strided_slice %39 {offsets = [2, 0], sizes = [4, 32], strides = [1, 1]} : vector<6x32xbf16> to vector<4x32xbf16>
    %c8 = arith.constant 8 : index
    %c0_36 = arith.constant 0 : index
    %c0_37 = arith.constant 0 : index
    %51 = vector.load %arg6[%c8, %c0_36, %c0_37] : memref<9x32x64xbf16, #tpu.memory_space<vmem>>, vector<1x32x64xbf16>
    %52 = vector.shape_cast %51 : vector<1x32x64xbf16> to vector<32x64xbf16>
    %cst_38 = arith.constant dense<0.000000e+00> : vector<4x64xf32>
    %53 = tpu.matmul %50, %52, %cst_38 {dimension_numbers = #tpu.dot_dimension_numbers<[1], [0], [0], [1], [0, 0, 1, 1], [], []>} : vector<4x32xbf16>, vector<32x64xbf16>, vector<4x64xf32> -> vector<4x64xf32>
    %54 = arith.addf %49, %53 : vector<4x64xf32>
    %c0_39 = arith.constant 0 : index
    %c0_40 = arith.constant 0 : index
    %55 = vector.load %arg7[%c0_39, %c0_40] : memref<1x64xf32, #tpu.memory_space<vmem>>, vector<1x64xf32>
    %56 = vector.broadcast %55 : vector<1x64xf32> to vector<4x64xf32>
    %57 = arith.addf %54, %56 : vector<4x64xf32>
    %c0_41 = arith.constant 0 : index
    %c0_42 = arith.constant 0 : index
    %c0_43 = arith.constant 0 : index
    %c0_44 = arith.constant 0 : index
    %58 = vector.load %arg8[%c0_41, %c0_42, %c0_43, %c0_44] : memref<1x1x4x64xf32, #tpu.memory_space<vmem>>, vector<1x1x4x64xf32>
    %59 = vector.shape_cast %58 : vector<1x1x4x64xf32> to vector<4x64xf32>
    %60 = vector.shape_cast %57 : vector<4x64xf32> to vector<1x1x4x64xf32>
    tpu.vector_store %arg8[%c0_41, %c0_42, %c0_43, %c0_44], %60 {strides = array<i32>} : memref<1x1x4x64xf32, #tpu.memory_space<vmem>>, vector<1x1x4x64xf32>,
    return
  }
  func.func @transform_0(%arg0: i32, %arg1: i32, %arg2: i32) -> (i32, i32, i32, i32) {
    %c0_i32 = arith.constant 0 : i32
    %0 = arith.addi %arg2, %c0_i32 : i32
    %c0_i32_0 = arith.constant 0 : i32
    %c0_i32_1 = arith.constant 0 : i32
    %c0_i32_2 = arith.constant 0 : i32
    return %arg1, %0, %c0_i32_0, %c0_i32_1 : i32, i32, i32, i32
  }
  func.func @transform_1(%arg0: i32, %arg1: i32, %arg2: i32) -> (i32, i32, i32, i32) {
    %c1_i32 = arith.constant 1 : i32
    %0 = arith.addi %arg2, %c1_i32 : i32
    %c0_i32 = arith.constant 0 : i32
    %c0_i32_0 = arith.constant 0 : i32
    %c0_i32_1 = arith.constant 0 : i32
    return %arg1, %0, %c0_i32, %c0_i32_0 : i32, i32, i32, i32
  }
  func.func @transform_2(%arg0: i32, %arg1: i32, %arg2: i32) -> (i32, i32, i32, i32) {
    %c2_i32 = arith.constant 2 : i32
    %0 = arith.addi %arg2, %c2_i32 : i32
    %c0_i32 = arith.constant 0 : i32
    %c0_i32_0 = arith.constant 0 : i32
    %c0_i32_1 = arith.constant 0 : i32
    return %arg1, %0, %c0_i32, %c0_i32_0 : i32, i32, i32, i32
  }
  func.func @transform_3(%arg0: i32, %arg1: i32, %arg2: i32) -> (i32, i32, i32) {
    %c0_i32 = arith.constant 0 : i32
    %c0_i32_0 = arith.constant 0 : i32
    %c0_i32_1 = arith.constant 0 : i32
    return %c0_i32, %c0_i32_0, %arg0 : i32, i32, i32
  }
  func.func @transform_4(%arg0: i32, %arg1: i32, %arg2: i32) -> (i32, i32) {
    %c0_i32 = arith.constant 0 : i32
    %c0_i32_0 = arith.constant 0 : i32
    return %c0_i32, %arg0 : i32, i32
  }
  func.func @transform_5(%arg0: i32, %arg1: i32, %arg2: i32) -> (i32, i32, i32, i32) {
    %c0_i32 = arith.constant 0 : i32
    %c0_i32_0 = arith.constant 0 : i32
    return %arg1, %arg2, %c0_i32, %arg0 : i32, i32, i32, i32
  }
}

module attributes {stable_mosaic.version = 11 : i64} {
  func.func @_affine_relu_kernel(%arg0: i32, %arg1: memref<32x64xf32, #tpu.memory_space<vmem>>, %arg2: memref<1x64xf32, #tpu.memory_space<vmem>>, %arg3: memref<1x64xf32, #tpu.memory_space<vmem>>, %arg4: memref<32x64xf32, #tpu.memory_space<vmem>>) attributes {dimension_semantics = [#tpu.dimension_semantics<parallel>], iteration_bounds = array<i64: 1>, scalar_prefetch = 0 : i64, scratch_operands = 0 : i64, tpu.core_type = #tpu.core_type<tc>, window_params = [{transform_indices = @transform_0, window_bounds = array<i64: 32, 64>}, {pipeline_mode = #tpu.pipeline_mode<synchronous>, transform_indices = @transform_1, window_bounds = array<i64: 1, 64>}, {pipeline_mode = #tpu.pipeline_mode<synchronous>, transform_indices = @transform_2, window_bounds = array<i64: 1, 64>}, {transform_indices = @transform_3, window_bounds = array<i64: 32, 64>}]} {
    %c0 = arith.constant 0 : index
    %c0_0 = arith.constant 0 : index
    %0 = vector.load %arg1[%c0, %c0_0] : memref<32x64xf32, #tpu.memory_space<vmem>>, vector<32x64xf32>
    %c0_1 = arith.constant 0 : index
    %c0_2 = arith.constant 0 : index
    %1 = vector.load %arg2[%c0_1, %c0_2] : memref<1x64xf32, #tpu.memory_space<vmem>>, vector<1x64xf32>
    %2 = vector.broadcast %1 : vector<1x64xf32> to vector<32x64xf32>
    %3 = arith.mulf %0, %2 : vector<32x64xf32>
    %c0_3 = arith.constant 0 : index
    %c0_4 = arith.constant 0 : index
    %4 = vector.load %arg3[%c0_3, %c0_4] : memref<1x64xf32, #tpu.memory_space<vmem>>, vector<1x64xf32>
    %5 = vector.broadcast %4 : vector<1x64xf32> to vector<32x64xf32>
    %6 = arith.addf %3, %5 : vector<32x64xf32>
    %cst = arith.constant 0.000000e+00 : f32
    %7 = vector.broadcast %cst : f32 to vector<32x64xf32>
    %8 = arith.maximumf %6, %7 : vector<32x64xf32>
    %c0_5 = arith.constant 0 : index
    %c0_6 = arith.constant 0 : index
    %9 = vector.load %arg4[%c0_5, %c0_6] : memref<32x64xf32, #tpu.memory_space<vmem>>, vector<32x64xf32>
    tpu.vector_store %arg4[%c0_5, %c0_6], %8 {strides = array<i32>} : memref<32x64xf32, #tpu.memory_space<vmem>>, vector<32x64xf32>,
    return
  }
  func.func @transform_0(%arg0: i32) -> (i32, i32) {
    %c0_i32 = arith.constant 0 : i32
    %c0_i32_0 = arith.constant 0 : i32
    return %arg0, %c0_i32 : i32, i32
  }
  func.func @transform_1(%arg0: i32) -> (i32, i32) {
    %c0_i32 = arith.constant 0 : i32
    %c0_i32_0 = arith.constant 0 : i32
    %c0_i32_1 = arith.constant 0 : i32
    return %c0_i32, %c0_i32_0 : i32, i32
  }
  func.func @transform_2(%arg0: i32) -> (i32, i32) {
    %c0_i32 = arith.constant 0 : i32
    %c0_i32_0 = arith.constant 0 : i32
    %c0_i32_1 = arith.constant 0 : i32
    return %c0_i32, %c0_i32_0 : i32, i32
  }
  func.func @transform_3(%arg0: i32) -> (i32, i32) {
    %c0_i32 = arith.constant 0 : i32
    %c0_i32_0 = arith.constant 0 : i32
    return %arg0, %c0_i32 : i32, i32
  }
}

module attributes {stable_mosaic.version = 11 : i64} {
  func.func @_conv_row_kernel(%arg0: i32, %arg1: i32, %arg2: i32, %arg3: memref<1x1x6x64xf32, #tpu.memory_space<vmem>>, %arg4: memref<1x1x6x64xf32, #tpu.memory_space<vmem>>, %arg5: memref<1x1x6x64xf32, #tpu.memory_space<vmem>>, %arg6: memref<9x64x64xbf16, #tpu.memory_space<vmem>>, %arg7: memref<1x64xf32, #tpu.memory_space<vmem>>, %arg8: memref<1x1x4x64xf32, #tpu.memory_space<vmem>>) attributes {dimension_semantics = [#tpu.dimension_semantics<parallel>, #tpu.dimension_semantics<parallel>, #tpu.dimension_semantics<parallel>], iteration_bounds = array<i64: 1, 2, 4>, scalar_prefetch = 0 : i64, scratch_operands = 0 : i64, tpu.core_type = #tpu.core_type<tc>, window_params = [{transform_indices = @transform_0, window_bounds = array<i64: 1, 1, 6, 64>}, {transform_indices = @transform_1, window_bounds = array<i64: 1, 1, 6, 64>}, {transform_indices = @transform_2, window_bounds = array<i64: 1, 1, 6, 64>}, {transform_indices = @transform_3, window_bounds = array<i64: 9, 64, 64>}, {transform_indices = @transform_4, window_bounds = array<i64: 1, 64>}, {transform_indices = @transform_5, window_bounds = array<i64: 1, 1, 4, 64>}]} {
    %cst = arith.constant 0.000000e+00 : f32
    %0 = vector.broadcast %cst : f32 to vector<4x64xf32>
    %c0 = arith.constant 0 : index
    %c0_0 = arith.constant 0 : index
    %c0_1 = arith.constant 0 : index
    %c0_2 = arith.constant 0 : index
    %1 = vector.load %arg3[%c0, %c0_0, %c0_1, %c0_2] : memref<1x1x6x64xf32, #tpu.memory_space<vmem>>, vector<1x1x6x64xf32>
    %2 = vector.shape_cast %1 : vector<1x1x6x64xf32> to vector<6x64xf32>
    %3 = arith.truncf %2 : vector<6x64xf32> to vector<6x64xbf16>
    %4 = vector.extract_strided_slice %3 {offsets = [0, 0], sizes = [4, 64], strides = [1, 1]} : vector<6x64xbf16> to vector<4x64xbf16>
    %c0_3 = arith.constant 0 : index
    %c0_4 = arith.constant 0 : index
    %c0_5 = arith.constant 0 : index
    %5 = vector.load %arg6[%c0_3, %c0_4, %c0_5] : memref<9x64x64xbf16, #tpu.memory_space<vmem>>, vector<1x64x64xbf16>
    %6 = vector.shape_cast %5 : vector<1x64x64xbf16> to vector<64x64xbf16>
    %cst_6 = arith.constant dense<0.000000e+00> : vector<4x64xf32>
    %7 = tpu.matmul %4, %6, %cst_6 {dimension_numbers = #tpu.dot_dimension_numbers<[1], [0], [0], [1], [0, 0, 1, 1], [], []>} : vector<4x64xbf16>, vector<64x64xbf16>, vector<4x64xf32> -> vector<4x64xf32>
    %8 = arith.addf %0, %7 : vector<4x64xf32>
    %9 = vector.extract_strided_slice %3 {offsets = [1, 0], sizes = [4, 64], strides = [1, 1]} : vector<6x64xbf16> to vector<4x64xbf16>
    %c1 = arith.constant 1 : index
    %c0_7 = arith.constant 0 : index
    %c0_8 = arith.constant 0 : index
    %10 = vector.load %arg6[%c1, %c0_7, %c0_8] : memref<9x64x64xbf16, #tpu.memory_space<vmem>>, vector<1x64x64xbf16>
    %11 = vector.shape_cast %10 : vector<1x64x64xbf16> to vector<64x64xbf16>
    %cst_9 = arith.constant dense<0.000000e+00> : vector<4x64xf32>
    %12 = tpu.matmul %9, %11, %cst_9 {dimension_numbers = #tpu.dot_dimension_numbers<[1], [0], [0], [1], [0, 0, 1, 1], [], []>} : vector<4x64xbf16>, vector<64x64xbf16>, vector<4x64xf32> -> vector<4x64xf32>
    %13 = arith.addf %8, %12 : vector<4x64xf32>
    %14 = vector.extract_strided_slice %3 {offsets = [2, 0], sizes = [4, 64], strides = [1, 1]} : vector<6x64xbf16> to vector<4x64xbf16>
    %c2 = arith.constant 2 : index
    %c0_10 = arith.constant 0 : index
    %c0_11 = arith.constant 0 : index
    %15 = vector.load %arg6[%c2, %c0_10, %c0_11] : memref<9x64x64xbf16, #tpu.memory_space<vmem>>, vector<1x64x64xbf16>
    %16 = vector.shape_cast %15 : vector<1x64x64xbf16> to vector<64x64xbf16>
    %cst_12 = arith.constant dense<0.000000e+00> : vector<4x64xf32>
    %17 = tpu.matmul %14, %16, %cst_12 {dimension_numbers = #tpu.dot_dimension_numbers<[1], [0], [0], [1], [0, 0, 1, 1], [], []>} : vector<4x64xbf16>, vector<64x64xbf16>, vector<4x64xf32> -> vector<4x64xf32>
    %18 = arith.addf %13, %17 : vector<4x64xf32>
    %c0_13 = arith.constant 0 : index
    %c0_14 = arith.constant 0 : index
    %c0_15 = arith.constant 0 : index
    %c0_16 = arith.constant 0 : index
    %19 = vector.load %arg4[%c0_13, %c0_14, %c0_15, %c0_16] : memref<1x1x6x64xf32, #tpu.memory_space<vmem>>, vector<1x1x6x64xf32>
    %20 = vector.shape_cast %19 : vector<1x1x6x64xf32> to vector<6x64xf32>
    %21 = arith.truncf %20 : vector<6x64xf32> to vector<6x64xbf16>
    %22 = vector.extract_strided_slice %21 {offsets = [0, 0], sizes = [4, 64], strides = [1, 1]} : vector<6x64xbf16> to vector<4x64xbf16>
    %c3 = arith.constant 3 : index
    %c0_17 = arith.constant 0 : index
    %c0_18 = arith.constant 0 : index
    %23 = vector.load %arg6[%c3, %c0_17, %c0_18] : memref<9x64x64xbf16, #tpu.memory_space<vmem>>, vector<1x64x64xbf16>
    %24 = vector.shape_cast %23 : vector<1x64x64xbf16> to vector<64x64xbf16>
    %cst_19 = arith.constant dense<0.000000e+00> : vector<4x64xf32>
    %25 = tpu.matmul %22, %24, %cst_19 {dimension_numbers = #tpu.dot_dimension_numbers<[1], [0], [0], [1], [0, 0, 1, 1], [], []>} : vector<4x64xbf16>, vector<64x64xbf16>, vector<4x64xf32> -> vector<4x64xf32>
    %26 = arith.addf %18, %25 : vector<4x64xf32>
    %27 = vector.extract_strided_slice %21 {offsets = [1, 0], sizes = [4, 64], strides = [1, 1]} : vector<6x64xbf16> to vector<4x64xbf16>
    %c4 = arith.constant 4 : index
    %c0_20 = arith.constant 0 : index
    %c0_21 = arith.constant 0 : index
    %28 = vector.load %arg6[%c4, %c0_20, %c0_21] : memref<9x64x64xbf16, #tpu.memory_space<vmem>>, vector<1x64x64xbf16>
    %29 = vector.shape_cast %28 : vector<1x64x64xbf16> to vector<64x64xbf16>
    %cst_22 = arith.constant dense<0.000000e+00> : vector<4x64xf32>
    %30 = tpu.matmul %27, %29, %cst_22 {dimension_numbers = #tpu.dot_dimension_numbers<[1], [0], [0], [1], [0, 0, 1, 1], [], []>} : vector<4x64xbf16>, vector<64x64xbf16>, vector<4x64xf32> -> vector<4x64xf32>
    %31 = arith.addf %26, %30 : vector<4x64xf32>
    %32 = vector.extract_strided_slice %21 {offsets = [2, 0], sizes = [4, 64], strides = [1, 1]} : vector<6x64xbf16> to vector<4x64xbf16>
    %c5 = arith.constant 5 : index
    %c0_23 = arith.constant 0 : index
    %c0_24 = arith.constant 0 : index
    %33 = vector.load %arg6[%c5, %c0_23, %c0_24] : memref<9x64x64xbf16, #tpu.memory_space<vmem>>, vector<1x64x64xbf16>
    %34 = vector.shape_cast %33 : vector<1x64x64xbf16> to vector<64x64xbf16>
    %cst_25 = arith.constant dense<0.000000e+00> : vector<4x64xf32>
    %35 = tpu.matmul %32, %34, %cst_25 {dimension_numbers = #tpu.dot_dimension_numbers<[1], [0], [0], [1], [0, 0, 1, 1], [], []>} : vector<4x64xbf16>, vector<64x64xbf16>, vector<4x64xf32> -> vector<4x64xf32>
    %36 = arith.addf %31, %35 : vector<4x64xf32>
    %c0_26 = arith.constant 0 : index
    %c0_27 = arith.constant 0 : index
    %c0_28 = arith.constant 0 : index
    %c0_29 = arith.constant 0 : index
    %37 = vector.load %arg5[%c0_26, %c0_27, %c0_28, %c0_29] : memref<1x1x6x64xf32, #tpu.memory_space<vmem>>, vector<1x1x6x64xf32>
    %38 = vector.shape_cast %37 : vector<1x1x6x64xf32> to vector<6x64xf32>
    %39 = arith.truncf %38 : vector<6x64xf32> to vector<6x64xbf16>
    %40 = vector.extract_strided_slice %39 {offsets = [0, 0], sizes = [4, 64], strides = [1, 1]} : vector<6x64xbf16> to vector<4x64xbf16>
    %c6 = arith.constant 6 : index
    %c0_30 = arith.constant 0 : index
    %c0_31 = arith.constant 0 : index
    %41 = vector.load %arg6[%c6, %c0_30, %c0_31] : memref<9x64x64xbf16, #tpu.memory_space<vmem>>, vector<1x64x64xbf16>
    %42 = vector.shape_cast %41 : vector<1x64x64xbf16> to vector<64x64xbf16>
    %cst_32 = arith.constant dense<0.000000e+00> : vector<4x64xf32>
    %43 = tpu.matmul %40, %42, %cst_32 {dimension_numbers = #tpu.dot_dimension_numbers<[1], [0], [0], [1], [0, 0, 1, 1], [], []>} : vector<4x64xbf16>, vector<64x64xbf16>, vector<4x64xf32> -> vector<4x64xf32>
    %44 = arith.addf %36, %43 : vector<4x64xf32>
    %45 = vector.extract_strided_slice %39 {offsets = [1, 0], sizes = [4, 64], strides = [1, 1]} : vector<6x64xbf16> to vector<4x64xbf16>
    %c7 = arith.constant 7 : index
    %c0_33 = arith.constant 0 : index
    %c0_34 = arith.constant 0 : index
    %46 = vector.load %arg6[%c7, %c0_33, %c0_34] : memref<9x64x64xbf16, #tpu.memory_space<vmem>>, vector<1x64x64xbf16>
    %47 = vector.shape_cast %46 : vector<1x64x64xbf16> to vector<64x64xbf16>
    %cst_35 = arith.constant dense<0.000000e+00> : vector<4x64xf32>
    %48 = tpu.matmul %45, %47, %cst_35 {dimension_numbers = #tpu.dot_dimension_numbers<[1], [0], [0], [1], [0, 0, 1, 1], [], []>} : vector<4x64xbf16>, vector<64x64xbf16>, vector<4x64xf32> -> vector<4x64xf32>
    %49 = arith.addf %44, %48 : vector<4x64xf32>
    %50 = vector.extract_strided_slice %39 {offsets = [2, 0], sizes = [4, 64], strides = [1, 1]} : vector<6x64xbf16> to vector<4x64xbf16>
    %c8 = arith.constant 8 : index
    %c0_36 = arith.constant 0 : index
    %c0_37 = arith.constant 0 : index
    %51 = vector.load %arg6[%c8, %c0_36, %c0_37] : memref<9x64x64xbf16, #tpu.memory_space<vmem>>, vector<1x64x64xbf16>
    %52 = vector.shape_cast %51 : vector<1x64x64xbf16> to vector<64x64xbf16>
    %cst_38 = arith.constant dense<0.000000e+00> : vector<4x64xf32>
    %53 = tpu.matmul %50, %52, %cst_38 {dimension_numbers = #tpu.dot_dimension_numbers<[1], [0], [0], [1], [0, 0, 1, 1], [], []>} : vector<4x64xbf16>, vector<64x64xbf16>, vector<4x64xf32> -> vector<4x64xf32>
    %54 = arith.addf %49, %53 : vector<4x64xf32>
    %c0_39 = arith.constant 0 : index
    %c0_40 = arith.constant 0 : index
    %55 = vector.load %arg7[%c0_39, %c0_40] : memref<1x64xf32, #tpu.memory_space<vmem>>, vector<1x64xf32>
    %56 = vector.broadcast %55 : vector<1x64xf32> to vector<4x64xf32>
    %57 = arith.addf %54, %56 : vector<4x64xf32>
    %c0_41 = arith.constant 0 : index
    %c0_42 = arith.constant 0 : index
    %c0_43 = arith.constant 0 : index
    %c0_44 = arith.constant 0 : index
    %58 = vector.load %arg8[%c0_41, %c0_42, %c0_43, %c0_44] : memref<1x1x4x64xf32, #tpu.memory_space<vmem>>, vector<1x1x4x64xf32>
    %59 = vector.shape_cast %58 : vector<1x1x4x64xf32> to vector<4x64xf32>
    %60 = vector.shape_cast %57 : vector<4x64xf32> to vector<1x1x4x64xf32>
    tpu.vector_store %arg8[%c0_41, %c0_42, %c0_43, %c0_44], %60 {strides = array<i32>} : memref<1x1x4x64xf32, #tpu.memory_space<vmem>>, vector<1x1x4x64xf32>,
    return
  }
  func.func @transform_0(%arg0: i32, %arg1: i32, %arg2: i32) -> (i32, i32, i32, i32) {
    %c0_i32 = arith.constant 0 : i32
    %0 = arith.addi %arg2, %c0_i32 : i32
    %c0_i32_0 = arith.constant 0 : i32
    %c0_i32_1 = arith.constant 0 : i32
    %c0_i32_2 = arith.constant 0 : i32
    return %arg1, %0, %c0_i32_0, %c0_i32_1 : i32, i32, i32, i32
  }
  func.func @transform_1(%arg0: i32, %arg1: i32, %arg2: i32) -> (i32, i32, i32, i32) {
    %c1_i32 = arith.constant 1 : i32
    %0 = arith.addi %arg2, %c1_i32 : i32
    %c0_i32 = arith.constant 0 : i32
    %c0_i32_0 = arith.constant 0 : i32
    %c0_i32_1 = arith.constant 0 : i32
    return %arg1, %0, %c0_i32, %c0_i32_0 : i32, i32, i32, i32
  }
  func.func @transform_2(%arg0: i32, %arg1: i32, %arg2: i32) -> (i32, i32, i32, i32) {
    %c2_i32 = arith.constant 2 : i32
    %0 = arith.addi %arg2, %c2_i32 : i32
    %c0_i32 = arith.constant 0 : i32
    %c0_i32_0 = arith.constant 0 : i32
    %c0_i32_1 = arith.constant 0 : i32
    return %arg1, %0, %c0_i32, %c0_i32_0 : i32, i32, i32, i32
  }
  func.func @transform_3(%arg0: i32, %arg1: i32, %arg2: i32) -> (i32, i32, i32) {
    %c0_i32 = arith.constant 0 : i32
    %c0_i32_0 = arith.constant 0 : i32
    %c0_i32_1 = arith.constant 0 : i32
    return %c0_i32, %c0_i32_0, %arg0 : i32, i32, i32
  }
  func.func @transform_4(%arg0: i32, %arg1: i32, %arg2: i32) -> (i32, i32) {
    %c0_i32 = arith.constant 0 : i32
    %c0_i32_0 = arith.constant 0 : i32
    return %c0_i32, %arg0 : i32, i32
  }
  func.func @transform_5(%arg0: i32, %arg1: i32, %arg2: i32) -> (i32, i32, i32, i32) {
    %c0_i32 = arith.constant 0 : i32
    %c0_i32_0 = arith.constant 0 : i32
    return %arg1, %arg2, %c0_i32, %arg0 : i32, i32, i32, i32
  }
}

module attributes {stable_mosaic.version = 11 : i64} {
  func.func @_maxpool_kernel(%arg0: i32, %arg1: i32, %arg2: memref<1x2x4x64xf32, #tpu.memory_space<vmem>>, %arg3: memref<1x1x4x64xf32, #tpu.memory_space<vmem>>) attributes {dimension_semantics = [#tpu.dimension_semantics<parallel>, #tpu.dimension_semantics<parallel>], iteration_bounds = array<i64: 2, 2>, scalar_prefetch = 0 : i64, scratch_operands = 0 : i64, tpu.core_type = #tpu.core_type<tc>, window_params = [{transform_indices = @transform_0, window_bounds = array<i64: 1, 2, 4, 64>}, {transform_indices = @transform_1, window_bounds = array<i64: 1, 1, 4, 64>}]} {
    %c0 = arith.constant 0 : index
    %c0_0 = arith.constant 0 : index
    %c0_1 = arith.constant 0 : index
    %c0_2 = arith.constant 0 : index
    %0 = vector.load %arg2[%c0, %c0_0, %c0_1, %c0_2] : memref<1x2x4x64xf32, #tpu.memory_space<vmem>>, vector<1x1x4x64xf32>
    %1 = vector.shape_cast %0 : vector<1x1x4x64xf32> to vector<4x64xf32>
    %c0_3 = arith.constant 0 : index
    %c1 = arith.constant 1 : index
    %c0_4 = arith.constant 0 : index
    %c0_5 = arith.constant 0 : index
    %2 = vector.load %arg2[%c0_3, %c1, %c0_4, %c0_5] : memref<1x2x4x64xf32, #tpu.memory_space<vmem>>, vector<1x1x4x64xf32>
    %3 = vector.shape_cast %2 : vector<1x1x4x64xf32> to vector<4x64xf32>
    %4 = arith.maximumf %1, %3 : vector<4x64xf32>
    %c0_6 = arith.constant 0 : index
    %c0_7 = arith.constant 0 : index
    %c0_8 = arith.constant 0 : index
    %c0_9 = arith.constant 0 : index
    %5 = vector.load %arg3[%c0_6, %c0_7, %c0_8, %c0_9] : memref<1x1x4x64xf32, #tpu.memory_space<vmem>>, vector<1x1x4x64xf32>
    %6 = vector.shape_cast %5 : vector<1x1x4x64xf32> to vector<4x64xf32>
    %7 = vector.shape_cast %4 : vector<4x64xf32> to vector<1x1x4x64xf32>
    tpu.vector_store %arg3[%c0_6, %c0_7, %c0_8, %c0_9], %7 {strides = array<i32>} : memref<1x1x4x64xf32, #tpu.memory_space<vmem>>, vector<1x1x4x64xf32>,
    return
  }
  func.func @transform_0(%arg0: i32, %arg1: i32) -> (i32, i32, i32, i32) {
    %c0_i32 = arith.constant 0 : i32
    %c0_i32_0 = arith.constant 0 : i32
    %c0_i32_1 = arith.constant 0 : i32
    return %arg0, %arg1, %c0_i32, %c0_i32_0 : i32, i32, i32, i32
  }
  func.func @transform_1(%arg0: i32, %arg1: i32) -> (i32, i32, i32, i32) {
    %c0_i32 = arith.constant 0 : i32
    %c0_i32_0 = arith.constant 0 : i32
    %c0_i32_1 = arith.constant 0 : i32
    return %arg0, %arg1, %c0_i32, %c0_i32_0 : i32, i32, i32, i32
  }
}

module attributes {stable_mosaic.version = 11 : i64} {
  func.func @_conv_row_kernel(%arg0: i32, %arg1: i32, %arg2: i32, %arg3: memref<1x1x4x64xf32, #tpu.memory_space<vmem>>, %arg4: memref<1x1x4x64xf32, #tpu.memory_space<vmem>>, %arg5: memref<4x64x64xbf16, #tpu.memory_space<vmem>>, %arg6: memref<1x64xf32, #tpu.memory_space<vmem>>, %arg7: memref<1x1x3x64xf32, #tpu.memory_space<vmem>>) attributes {dimension_semantics = [#tpu.dimension_semantics<parallel>, #tpu.dimension_semantics<parallel>, #tpu.dimension_semantics<parallel>], iteration_bounds = array<i64: 1, 2, 1>, scalar_prefetch = 0 : i64, scratch_operands = 0 : i64, tpu.core_type = #tpu.core_type<tc>, window_params = [{transform_indices = @transform_0, window_bounds = array<i64: 1, 1, 4, 64>}, {transform_indices = @transform_1, window_bounds = array<i64: 1, 1, 4, 64>}, {transform_indices = @transform_2, window_bounds = array<i64: 4, 64, 64>}, {transform_indices = @transform_3, window_bounds = array<i64: 1, 64>}, {transform_indices = @transform_4, window_bounds = array<i64: 1, 1, 3, 64>}]} {
    %cst = arith.constant 0.000000e+00 : f32
    %0 = vector.broadcast %cst : f32 to vector<3x64xf32>
    %c0 = arith.constant 0 : index
    %c0_0 = arith.constant 0 : index
    %c0_1 = arith.constant 0 : index
    %c0_2 = arith.constant 0 : index
    %1 = vector.load %arg3[%c0, %c0_0, %c0_1, %c0_2] : memref<1x1x4x64xf32, #tpu.memory_space<vmem>>, vector<1x1x4x64xf32>
    %2 = vector.shape_cast %1 : vector<1x1x4x64xf32> to vector<4x64xf32>
    %3 = arith.truncf %2 : vector<4x64xf32> to vector<4x64xbf16>
    %4 = vector.extract_strided_slice %3 {offsets = [0, 0], sizes = [3, 64], strides = [1, 1]} : vector<4x64xbf16> to vector<3x64xbf16>
    %c0_3 = arith.constant 0 : index
    %c0_4 = arith.constant 0 : index
    %c0_5 = arith.constant 0 : index
    %5 = vector.load %arg5[%c0_3, %c0_4, %c0_5] : memref<4x64x64xbf16, #tpu.memory_space<vmem>>, vector<1x64x64xbf16>
    %6 = vector.shape_cast %5 : vector<1x64x64xbf16> to vector<64x64xbf16>
    %cst_6 = arith.constant dense<0.000000e+00> : vector<3x64xf32>
    %7 = tpu.matmul %4, %6, %cst_6 {dimension_numbers = #tpu.dot_dimension_numbers<[1], [0], [0], [1], [0, 0, 1, 1], [], []>} : vector<3x64xbf16>, vector<64x64xbf16>, vector<3x64xf32> -> vector<3x64xf32>
    %8 = arith.addf %0, %7 : vector<3x64xf32>
    %9 = vector.extract_strided_slice %3 {offsets = [1, 0], sizes = [3, 64], strides = [1, 1]} : vector<4x64xbf16> to vector<3x64xbf16>
    %c1 = arith.constant 1 : index
    %c0_7 = arith.constant 0 : index
    %c0_8 = arith.constant 0 : index
    %10 = vector.load %arg5[%c1, %c0_7, %c0_8] : memref<4x64x64xbf16, #tpu.memory_space<vmem>>, vector<1x64x64xbf16>
    %11 = vector.shape_cast %10 : vector<1x64x64xbf16> to vector<64x64xbf16>
    %cst_9 = arith.constant dense<0.000000e+00> : vector<3x64xf32>
    %12 = tpu.matmul %9, %11, %cst_9 {dimension_numbers = #tpu.dot_dimension_numbers<[1], [0], [0], [1], [0, 0, 1, 1], [], []>} : vector<3x64xbf16>, vector<64x64xbf16>, vector<3x64xf32> -> vector<3x64xf32>
    %13 = arith.addf %8, %12 : vector<3x64xf32>
    %c0_10 = arith.constant 0 : index
    %c0_11 = arith.constant 0 : index
    %c0_12 = arith.constant 0 : index
    %c0_13 = arith.constant 0 : index
    %14 = vector.load %arg4[%c0_10, %c0_11, %c0_12, %c0_13] : memref<1x1x4x64xf32, #tpu.memory_space<vmem>>, vector<1x1x4x64xf32>
    %15 = vector.shape_cast %14 : vector<1x1x4x64xf32> to vector<4x64xf32>
    %16 = arith.truncf %15 : vector<4x64xf32> to vector<4x64xbf16>
    %17 = vector.extract_strided_slice %16 {offsets = [0, 0], sizes = [3, 64], strides = [1, 1]} : vector<4x64xbf16> to vector<3x64xbf16>
    %c2 = arith.constant 2 : index
    %c0_14 = arith.constant 0 : index
    %c0_15 = arith.constant 0 : index
    %18 = vector.load %arg5[%c2, %c0_14, %c0_15] : memref<4x64x64xbf16, #tpu.memory_space<vmem>>, vector<1x64x64xbf16>
    %19 = vector.shape_cast %18 : vector<1x64x64xbf16> to vector<64x64xbf16>
    %cst_16 = arith.constant dense<0.000000e+00> : vector<3x64xf32>
    %20 = tpu.matmul %17, %19, %cst_16 {dimension_numbers = #tpu.dot_dimension_numbers<[1], [0], [0], [1], [0, 0, 1, 1], [], []>} : vector<3x64xbf16>, vector<64x64xbf16>, vector<3x64xf32> -> vector<3x64xf32>
    %21 = arith.addf %13, %20 : vector<3x64xf32>
    %22 = vector.extract_strided_slice %16 {offsets = [1, 0], sizes = [3, 64], strides = [1, 1]} : vector<4x64xbf16> to vector<3x64xbf16>
    %c3 = arith.constant 3 : index
    %c0_17 = arith.constant 0 : index
    %c0_18 = arith.constant 0 : index
    %23 = vector.load %arg5[%c3, %c0_17, %c0_18] : memref<4x64x64xbf16, #tpu.memory_space<vmem>>, vector<1x64x64xbf16>
    %24 = vector.shape_cast %23 : vector<1x64x64xbf16> to vector<64x64xbf16>
    %cst_19 = arith.constant dense<0.000000e+00> : vector<3x64xf32>
    %25 = tpu.matmul %22, %24, %cst_19 {dimension_numbers = #tpu.dot_dimension_numbers<[1], [0], [0], [1], [0, 0, 1, 1], [], []>} : vector<3x64xbf16>, vector<64x64xbf16>, vector<3x64xf32> -> vector<3x64xf32>
    %26 = arith.addf %21, %25 : vector<3x64xf32>
    %c0_20 = arith.constant 0 : index
    %c0_21 = arith.constant 0 : index
    %27 = vector.load %arg6[%c0_20, %c0_21] : memref<1x64xf32, #tpu.memory_space<vmem>>, vector<1x64xf32>
    %28 = vector.broadcast %27 : vector<1x64xf32> to vector<3x64xf32>
    %29 = arith.addf %26, %28 : vector<3x64xf32>
    %cst_22 = arith.constant 0.000000e+00 : f32
    %30 = vector.broadcast %cst_22 : f32 to vector<3x64xf32>
    %31 = arith.maximumf %29, %30 : vector<3x64xf32>
    %c0_23 = arith.constant 0 : index
    %c0_24 = arith.constant 0 : index
    %c0_25 = arith.constant 0 : index
    %c0_26 = arith.constant 0 : index
    %32 = vector.load %arg7[%c0_23, %c0_24, %c0_25, %c0_26] : memref<1x1x3x64xf32, #tpu.memory_space<vmem>>, vector<1x1x3x64xf32>
    %33 = vector.shape_cast %32 : vector<1x1x3x64xf32> to vector<3x64xf32>
    %34 = vector.shape_cast %31 : vector<3x64xf32> to vector<1x1x3x64xf32>
    tpu.vector_store %arg7[%c0_23, %c0_24, %c0_25, %c0_26], %34 {strides = array<i32>} : memref<1x1x3x64xf32, #tpu.memory_space<vmem>>, vector<1x1x3x64xf32>,
    return
  }
  func.func @transform_0(%arg0: i32, %arg1: i32, %arg2: i32) -> (i32, i32, i32, i32) {
    %c0_i32 = arith.constant 0 : i32
    %0 = arith.addi %arg2, %c0_i32 : i32
    %c0_i32_0 = arith.constant 0 : i32
    %c0_i32_1 = arith.constant 0 : i32
    %c0_i32_2 = arith.constant 0 : i32
    return %arg1, %0, %c0_i32_0, %c0_i32_1 : i32, i32, i32, i32
  }
  func.func @transform_1(%arg0: i32, %arg1: i32, %arg2: i32) -> (i32, i32, i32, i32) {
    %c1_i32 = arith.constant 1 : i32
    %0 = arith.addi %arg2, %c1_i32 : i32
    %c0_i32 = arith.constant 0 : i32
    %c0_i32_0 = arith.constant 0 : i32
    %c0_i32_1 = arith.constant 0 : i32
    return %arg1, %0, %c0_i32, %c0_i32_0 : i32, i32, i32, i32
  }
  func.func @transform_2(%arg0: i32, %arg1: i32, %arg2: i32) -> (i32, i32, i32) {
    %c0_i32 = arith.constant 0 : i32
    %c0_i32_0 = arith.constant 0 : i32
    %c0_i32_1 = arith.constant 0 : i32
    return %c0_i32, %c0_i32_0, %arg0 : i32, i32, i32
  }
  func.func @transform_3(%arg0: i32, %arg1: i32, %arg2: i32) -> (i32, i32) {
    %c0_i32 = arith.constant 0 : i32
    %c0_i32_0 = arith.constant 0 : i32
    return %c0_i32, %arg0 : i32, i32
  }
  func.func @transform_4(%arg0: i32, %arg1: i32, %arg2: i32) -> (i32, i32, i32, i32) {
    %c0_i32 = arith.constant 0 : i32
    %c0_i32_0 = arith.constant 0 : i32
    return %arg1, %arg2, %c0_i32, %arg0 : i32, i32, i32, i32
  }
}

</mosaic_0001>

<bundles_post_ra>
// kernel: vgg_feature_extractor.13
= control target key start
LH: loop header
LB: loop body
LE: loop exit
PB: predicated region body
PF: predicated region fallthrough
CT: control target
= control target key end

     0   :  { %s1326_s18 = smov 0   ;;  %s1328_s19 = smov 0   ;;  %s1485_s0 = inlined_call_operand.vmem [shape: f32[2,34,18,4], index: 0, kind: input, shape index: {}, may-alias: {0,1,2}]   ;;  %s1486_s1 = inlined_call_operand.vmem [shape: f32[2,34,18,4], index: 1, kind: input, shape index: {}, may-alias: {0,1,2}]   ;;  %s1487_s2 = inlined_call_operand.vmem [shape: f32[2,34,18,4], index: 2, kind: input, shape index: {}, may-alias: {0,1,2}]   ;;  %s1488_s3 = inlined_call_operand.vmem [shape: bf16[9,4,8], index: 3, kind: input, shape index: {}]   ;;  %s1489_s4 = inlined_call_operand.vmem [shape: f32[1,8], index: 4, kind: input, shape index: {}]   ;;  %s1490_s5 = inlined_call_operand.vmem [shape: f32[2,32,16,8], index: 5, kind: output, shape index: {}]  }
   0x1   :  { %s1330_s20 = smov 0   ;;  %s1332_s21 = smov 0  }
   0x2   :  { %s1334_s22 = smov 0  }
   0x3 LB: > { %s27_s23 = sadd.s32 1, %s1284_s20  ;;  %s30_s24 = sadd.s32 1, %s1288_s21  ;;  %s1292_s22 = sphi %s1334_s22, %s15_s22   ;;  %s1288_s21 = sphi %s1332_s21, %s1494_s21   ;;  %s1284_s20 = sphi %s1330_s20, %s1493_s20   ;;  %s1280_s19 = sphi %s1328_s19, %s1492_s19   ;;  %s1276_s18 = sphi %s1326_s18, %s1491_s18  }
   0x4   : > { %p28_p0 = scmp.ge.s32.totalorder %s27_s23, 32  ;;  %p1109_p1 = scmp.ge.s32.totalorder %s1292_s22, 1 }
   0x5   : > { %p273_p2 = scmp.lt.s32.totalorder %s1292_s22, 65 }
   0x6   : > { %s1496_s23 = smov (%p28_p0, %s27_s23), 0  ;;  %s1498_s24 = smov (!%p28_p0, %s30_s24), %s1288_s21 }
   0x7   : > { %p274_p3 = pnand %p1109_p1, %p273_p2  ;;  %p32_p4 = scmp.ge.s32.totalorder %s1498_s24, 2 }
   0x8   : > { %p339_p5 = scmp.lt.s32.totalorder (!%p274_p3), %s1280_s19, 1  ;;  %p341_p6 = scmp.lt.s32.totalorder (!%p274_p3), %s1276_s18, 33 }
   0x9   : > { %s1500_s24 = smov (%p32_p4, %s1498_s24), 0  ;;  %277 = sbr.rel (%p274_p3) target bundleno = 269 (0x10d), region = 40 }
   0xa   : > { %s348_s6 = sadd.s32 (!%p274_p3), 1, %s1276_s18  ;;  %s359_s8 = sadd.s32 (!%p274_p3), 2, %s1276_s18 }
   0xb   : > { %p351_p7 = scmp.lt.s32.totalorder (!%p274_p3), %s348_s6, 33  ;;  %p362_p8 = scmp.lt.s32.totalorder (!%p274_p3), %s359_s8, 33 }
   0xc   : > { %p379_p9 = scmp.lt.s32.totalorder (!%p274_p3), %s1276_s18, 31 }
   0xe   : > { %v1116_v0 = vld [vmem:[%s1488_s3 + $0x2] sm:$0x3]  ;;  %vm415_vm0 = vcmask 1041408   ;;  %v395_v1 = vld [vmem:[%s1488_s3] sm:$0x3]  ;;  %v1294_v2 = vmov 0.0  }
   0xf   : > { %1154 = vmatprep.subr.bf16.mxu0 %v1294_v2  ;;  %v417_v3 = vsel %vm415_vm0, %v1116_v0, 0  ;;  %1160 = vmatprep.subr.bf16.mxu1 %v1294_v2  ;;  %v463_v4 = vsel %vm415_vm0, %v395_v1, 0  ;;  %vm1295_vm1 = vmmov 0   ;;  %s1502_s19 = smov (!%p339_p5, %s1280_s19), 1  ;;  %v1121_v5 = vld [vmem:[%s1488_s3 + $0x6] sm:$0x3] }
  0x10   : > { %1155 = vmatpush3.bf16.msra.mxu0 %v417_v3  ;;  %1161 = vmatpush3.bf16.msra.mxu1 %v463_v4  ;;  %s342_s29 = scalar_select %p341_p6, %s1276_s18, 33  ;;  %vm411_vm2 = vcmask 31744   ;;  %v574_v11 = vsel %vm415_vm0, %v1121_v5, 0  ;;  %v1119_v17 = vld [vmem:[%s1488_s3 + $0x4] sm:$0x3]  ;;  %vm510_vm4 = vcmask 1046528  }
  0x11   : > { %1156 = vmatprep.mubr.msk.bf16.mxu0 %vm1295_vm1, %v1294_v2  ;;  %1162 = vmatprep.mubr.msk.bf16.mxu1 %vm1295_vm1, %v1294_v2  ;;  %s1383_s30 = smul.u32 102, %s1502_s19  ;;  %s1504_s6 = smov (!%p351_p7, %s348_s6), 33  ;;  %vm398_vm3 = vsmask.f32 7424  ;;  %v1125_v21 = vld [vmem:[%s1488_s3 + $0xa] sm:$0x3] }
  0x12   : > { %1166 = vmatprep.subr.bf16.mxu0 %v1294_v2  ;;  %1172 = vmatprep.subr.bf16.mxu1 %v1294_v2  ;;  %s1208_s7 = smul.u32 3, %s342_s29  ;;  %s1506_s8 = smov (!%p362_p8, %s359_s8), 33  ;;  %v518_v22 = vsel %vm415_vm0, %v1119_v17, 0  ;;  %v692_v29 = vsel %vm415_vm0, %v1125_v21, 0  ;;  %v1123_v35 = vld [vmem:[%s1488_s3 + $0x8] sm:$0x3] }
  0x13   : > { %s1210_s16 = smul.u32 3, %s1504_s6  ;;  %v1129_v44 = vld [vmem:[%s1488_s3 + $0xe] sm:$0x3]  ;;  %v636_v45 = vsel %vm415_vm0, %v1123_v35, 0  ;;  %v1127_v53 = vld [vmem:[%s1488_s3 + $0xc] sm:$0x3] }
  0x14   : > { %s345_s9 = sadd.s32 %s1383_s30, %s1208_s7  ;;  %s1211_s17 = smul.u32 3, %s1506_s8  ;;  %v810_v50 = vsel %vm415_vm0, %v1129_v44, 0  ;;  %v748_v57 = vsel %vm415_vm0, %v1127_v53, 0  ;;  %v1131_v59 = vld [vmem:[%s1488_s3 + $0x10] sm:$0x3]  ;;  %vm922_vm5 = vcmask 64512  }
  0x15   : > { %s1110_s10 = sshll.u32 %s345_s9, 3  ;;  %s355_s25 = sadd.s32 %s1210_s16, %s1383_s30  ;;  %v866_v60 = vsel %vm415_vm0, %v1131_v59, 0 }
  0x16   : > { %s347_s15 = scalar_lea.vmem %s1485_s0, %s1110_s10  ;;  %s1111_s28 = sshll.u32 %s355_s25, 3 }
  0x17   : > { %v390_v6 = vld [vmem:[%s347_s15] sm:$0xff]  ;;  %v391_v7 = vld [vmem:[%s347_s15 + $0x8] sm:$0xff]  ;;  %v392_v8 = vld [vmem:[%s347_s15 + $0x10] sm:$0x3]  ;;  %s366_s29 = sadd.s32 %s1211_s17, %s1383_s30  ;;  %s357_s8 = scalar_lea.vmem %s1486_s1, %s1111_s28 }
  0x18   : > { %v393_v9 = vpack.c.bf16 %v391_v7, %v390_v6  ;;  %v394_v10 = vpack.c.bf16 %v392_v8, %v392_v8  ;;  %s1112_s9 = sshll.u32 %s366_s29, 3  ;;  %v563_v19 = vld [vmem:[%s357_s8] sm:$0xff]  ;;  %v564_v20 = vld [vmem:[%s357_s8 + $0x8] sm:$0xff]  ;;  %v565_v24 = vld [vmem:[%s357_s8 + $0x10] sm:$0x3]  ;;  %s1508_s18 = smov (!%p379_p9, %s1276_s18), 31 }
  0x19   : > { %s368_s14 = scalar_lea.vmem %s1487_s2, %s1112_s9  ;;  %v566_v23 = vpack.c.bf16 %v564_v20, %v563_v19  ;;  %v567_v33 = vpack.c.bf16 %v565_v24, %v565_v24  ;;  %s1113_s29 = sshll.u32 %s1508_s18, 1 }
  0x1a   : > { %v400_v12 = vshrl.u32 %v393_v9, 16  ;;  %v402_v13 = vshll.u32 %v393_v9, 16  ;;  %v407_v14 = vshll.u32 %v394_v10, 16  ;;  %1163 = vmatmul.mubr.msk.bf16.vlgmr.msra.gmra.mxu1 %vm411_vm2, %v393_v9  ;;  %v737_v25 = vld [vmem:[%s368_s14] sm:$0xff]  ;;  %v738_v26 = vld [vmem:[%s368_s14 + $0x8] sm:$0xff]  ;;  %v511_v31 = vrot.slane %v393_v9, 1 }
  0x1b   : > { %1173 = vmatpush3.bf16.msra.mxu1 %v574_v11  ;;  %1174 = vmatprep.mubr.msk.bf16.mxu1 %vm1295_vm1, %v1294_v2  ;;  %v740_v28 = vpack.c.bf16 %v738_v26, %v737_v25  ;;  %v739_v30 = vld [vmem:[%s368_s14 + $0x10] sm:$0x3]  ;;  %v512_v32 = vrot.slane %v394_v10, 1  ;;  %v623_v34 = vshll.u32 %v566_v23, 16  ;;  %v685_v36 = vrot.slane %v566_v23, 1  ;;  %s1114_s6 = sshll.u32 %s1502_s19, 6 }
  0x1c   : > { %v404_v15 = vrot.slane %v402_v13, 1  ;;  %v409_v16 = vrot.slane %v407_v14, 1  ;;  %1184 = vmatprep.subr.bf16.mxu1 %v1294_v2  ;;  %v686_v37 = vrot.slane %v567_v33, 1  ;;  %v741_v38 = vpack.c.bf16 %v739_v30, %v739_v30  ;;  %s386_s7 = sadd.s32 %s1114_s6, %s1113_s29 }
  0x1d   : > { %v797_v39 = vshll.u32 %v740_v28, 16  ;;  %v513_v40 = vsel %vm510_vm4, %v511_v31, %v512_v32  ;;  %v621_v41 = vshrl.u32 %v566_v23, 16  ;;  %v625_v42 = vrot.slane %v623_v34, 1  ;;  %s1115_s10 = sshll.u32 %s386_s7, 3 }
  0x1e   : > { %v405_v18 = vor.u32 %v404_v15, %v400_v12  ;;  %v628_v43 = vshll.u32 %v567_v33, 16  ;;  %v687_v46 = vsel %vm510_vm4, %v685_v36, %v686_v37  ;;  %v795_v47 = vshrl.u32 %v740_v28, 16  ;;  %s388_s18 = scalar_lea.vmem %s1490_s5, %s1115_s10 }
  0x1f   : > { %v799_v48 = vrot.slane %v797_v39, 1  ;;  %v802_v49 = vshll.u32 %v741_v38, 16  ;;  %v626_v51 = vor.u32 %v625_v42, %v621_v41  ;;  %v859_v61 = vrot.slane %v740_v28, 1 }
  0x20   : > { %v410_v27 = vsel %vm398_vm3, %v405_v18, %v409_v16  ;;  %v630_v52 = vrot.slane %v628_v43, 1  ;;  %v860_v62 = vrot.slane %v741_v38, 1 }
  0x21   : > { %1157 = vmatmul.mubr.msk.bf16.vlgmr.msra.gmra.mxu0 %vm411_vm2, %v410_v27  ;;  %v800_v54 = vor.u32 %v799_v48, %v795_v47  ;;  %v804_v55 = vrot.slane %v802_v49, 1 }
  0x22   : > { %1167 = vmatpush3.bf16.msra.mxu0 %v518_v22  ;;  %1168 = vmatprep.mubr.msk.bf16.mxu0 %vm1295_vm1, %v1294_v2  ;;  %v631_v56 = vsel %vm398_vm3, %v626_v51, %v630_v52  ;;  %v861_v63 = vsel %vm510_vm4, %v859_v61, %v860_v62 }
  0x23   : > { %1178 = vmatprep.subr.bf16.mxu0 %v1294_v2  ;;  %1175 = vmatmul.mubr.msk.bf16.vlgmr.msra.gmra.mxu1 %vm411_vm2, %v566_v23  ;;  %v805_v58 = vsel %vm398_vm3, %v800_v54, %v804_v55 }
  0x24   : > { %1185 = vmatpush3.bf16.msra.mxu1 %v692_v29  ;;  %1186 = vmatprep.mubr.msk.bf16.mxu1 %vm1295_vm1, %v1294_v2 }
  0x25   : > { %1196 = vmatprep.subr.bf16.mxu1 %v1294_v2 }
  0x29   : > { %1169 = vmatmul.mubr.msk.bf16.vlgmr.msra.gmra.mxu0 %vm411_vm2, %v513_v40 }
  0x2a   : > { %1179 = vmatpush3.bf16.msra.mxu0 %v636_v45  ;;  %1180 = vmatprep.mubr.msk.bf16.mxu0 %vm1295_vm1, %v1294_v2 }
  0x2b   : > { %1190 = vmatprep.subr.bf16.mxu0 %v1294_v2  ;;  %1187 = vmatmul.mubr.msk.bf16.vlgmr.msra.gmra.mxu1 %vm411_vm2, %v687_v46  ;;  %v1133_v46 = vld [vmem:[%s1489_s4] ss:$0 sm:$0xff] }
  0x2c   : > { %1197 = vmatpush3.bf16.msra.mxu1 %v810_v50  ;;  %1198 = vmatprep.mubr.msk.bf16.mxu1 %vm1295_vm1, %v1294_v2 }
  0x31   : > { %1181 = vmatmul.mubr.msk.bf16.vlgmr.msra.gmra.mxu0 %vm411_vm2, %v631_v56 }
  0x32   : > { %1191 = vmatpush3.bf16.msra.mxu0 %v748_v57  ;;  %1192 = vmatprep.mubr.msk.bf16.mxu0 %vm1295_vm1, %v1294_v2 }
  0x33   : > { %1202 = vmatprep.subr.bf16.mxu0 %v1294_v2  ;;  %1199 = vmatmul.mubr.msk.bf16.vlgmr.msra.gmra.mxu1 %vm411_vm2, %v805_v58 }
  0x39   : > { %1193 = vmatmul.mubr.msk.bf16.vlgmr.msra.gmra.mxu0 %vm411_vm2, %v740_v28 }
  0x3a   : > { %1203 = vmatpush3.bf16.msra.mxu0 %v866_v60  ;;  %1204 = vmatprep.mubr.msk.bf16.mxu0 %vm1295_vm1, %v1294_v2 }
  0x41   : > { %1205 = vmatmul.mubr.msk.bf16.vlgmr.msra.gmra.mxu0 %vm411_vm2, %v861_v63 }
  0xda   : > { %v499_v0 = vpop.f32.mrf.mxu1 }
  0xdc   : > { %v1164_v1 = vpop.f32.mrf.mxu1 }
  0xde   : > { %v502_v3 = vpop.f32.mrf.mxu1 }
  0xe0   : > { %v1165_v4 = vpop.f32.mrf.mxu1 }
  0xe1   : > { %v453_v5 = vpop.f32.mrf.mxu0 }
  0xe2   : > { %v500_v17 = vadd.f32 %v499_v0, %v453_v5 }
  0xe3   : > { %v1158_v6 = vpop.f32.mrf.mxu0  ;;  %v610_v7 = vpop.f32.mrf.mxu1 }
  0xe5   : > { %v456_v8 = vpop.f32.mrf.mxu0  ;;  %v1176_v9 = vpop.f32.mrf.mxu1 }
  0xe6   : > { %v503_v23 = vadd.f32 %v502_v3, %v456_v8 }
  0xe7   : > { %v1159_v10 = vpop.f32.mrf.mxu0  ;;  %v613_v11 = vpop.f32.mrf.mxu1 }
  0xe9   : > { %v554_v12 = vpop.f32.mrf.mxu0  ;;  %v1177_v13 = vpop.f32.mrf.mxu1 }
  0xea   : > { %v561_v20 = vadd.f32 %v554_v12, %v500_v17 }
  0xeb   : > { %v1170_v2 = vpop.f32.mrf.mxu0  ;;  %v728_v14 = vpop.f32.mrf.mxu1 }
  0xec   : > { %v617_v26 = vadd.f32 %v610_v7, %v561_v20 }
  0xed   : > { %v557_v15 = vpop.f32.mrf.mxu0  ;;  %v1188_v16 = vpop.f32.mrf.mxu1 }
  0xee   : > { %v562_v27 = vadd.f32 %v557_v15, %v503_v23 }
  0xef   : > { %v1171_v18 = vpop.f32.mrf.mxu0  ;;  %v731_v19 = vpop.f32.mrf.mxu1 }
  0xf0   : > { %v618_v33 = vadd.f32 %v613_v11, %v562_v27 }
  0xf1   : > { %v672_v21 = vpop.f32.mrf.mxu0  ;;  %v1189_v22 = vpop.f32.mrf.mxu1 }
  0xf2   : > { %v679_v30 = vadd.f32 %v672_v21, %v617_v26 }
  0xf3   : > { %v1182_v24 = vpop.f32.mrf.mxu0  ;;  %v846_v25 = vpop.f32.mrf.mxu1 }
  0xf4   : > { %v735_v36 = vadd.f32 %v728_v14, %v679_v30 }
  0xf5   : > { %v675_v28 = vpop.f32.mrf.mxu0  ;;  %v1200_v29 = vpop.f32.mrf.mxu1 }
  0xf6   : > { %v680_v37 = vadd.f32 %v675_v28, %v618_v33 }
  0xf7   : > { %v1183_v31 = vpop.f32.mrf.mxu0  ;;  %v849_v32 = vpop.f32.mrf.mxu1 }
  0xf8   : > { %v736_v41 = vadd.f32 %v731_v19, %v680_v37 }
  0xf9   : > { %v784_v34 = vpop.f32.mrf.mxu0  ;;  %v1201_v35 = vpop.f32.mrf.mxu1 }
  0xfa   : > { %v791_v39 = vadd.f32 %v784_v34, %v735_v36 }
  0xfb   : > { %v1194_v38 = vpop.f32.mrf.mxu0 }
  0xfc   : > { %v853_v43 = vadd.f32 %v846_v25, %v791_v39 }
  0xfd   : > { %v787_v40 = vpop.f32.mrf.mxu0 }
  0xfe   : > { %v792_v44 = vadd.f32 %v787_v40, %v736_v41 }
  0xff   : > { %v1195_v42 = vpop.f32.mrf.mxu0 }
 0x100   : > { %v854_v49 = vadd.f32 %v849_v32, %v792_v44 }
 0x101   : > { %v902_v45 = vpop.f32.mrf.mxu0 }
 0x102   : > { %v909_v47 = vadd.f32 %v902_v45, %v853_v43 }
 0x103   : > { %v1206_v48 = vpop.f32.mrf.mxu0 }
 0x104   : > { %v918_v50 = vadd.f32 %v1133_v46, %v909_v47 }
 0x105   : > { %v905_v51 = vpop.f32.mrf.mxu0 }
 0x106   : > { %v920_v52 = vmax.f32 %v918_v50, 0.0  ;;  %v910_v53 = vadd.f32 %v905_v51, %v854_v49 }
 0x107   : > { %v1207_v54 = vpop.f32.mrf.mxu0 }
 0x108   : > { %923 = vst.msk [vmem:[%s388_s18] sm:$0xff] %vm922_vm5, %v920_v52  ;;  %v919_v55 = vadd.f32 %v1133_v46, %v910_v53 }
 0x10a   : > { %v921_v56 = vmax.f32 %v919_v55, 0.0 }
 0x10c   : > { %924 = vst.msk [vmem:[%s388_s18 + $0x8] sm:$0xff] %vm922_vm5, %v921_v56 }
 0x10d PF: > { %s15_s22 = sadd.s32 1, %s1292_s22   ;;  %s1491_s18 = smov %s1284_s20 }
 0x10e   : > { %p12_p10 = scmp.ge.s32.totalorder %s15_s22, 66   ;;  %s1492_s19 = smov %s1288_s21 }
 0x10f   : > { %s1493_s20 = smov %s1496_s23  ;;  %s1494_s21 = smov %s1500_s24 }
 0x110   :  { %14 = sbr.rel (!%p12_p10) target bundleno = 3 (0x3), region = 90 }

// kernel: vgg_feature_extractor.14
= control target key start
LH: loop header
LB: loop body
LE: loop exit
PB: predicated region body
PF: predicated region fallthrough
CT: control target
= control target key end

     0   :  { %s355_s6 = smov 0   ;;  %s357_s7 = smov 0   ;;  %s411_s0 = inlined_call_operand.vmem [shape: f32[2,32,8,16], index: 0, kind: input, shape index: {}]   ;;  %s412_s1 = inlined_call_operand.vmem [shape: f32[2,16,8,8], index: 1, kind: output, shape index: {}]  }
   0x1   :  { %s359_s8 = smov 0   ;;  %s361_s9 = smov 0  }
   0x2   :  { %s363_s10 = smov 0  }
   0x3 LB: > { %s20_s11 = sadd.s32 1, %s334_s8  ;;  %s23_s12 = sadd.s32 1, %s338_s9  ;;  %s342_s10 = sphi %s363_s10, %s11_s10   ;;  %s338_s9 = sphi %s361_s9, %s416_s9   ;;  %s334_s8 = sphi %s359_s8, %s415_s8   ;;  %s330_s7 = sphi %s357_s7, %s414_s7   ;;  %s326_s6 = sphi %s355_s6, %s413_s6  }
   0x4   : > { %p21_p0 = scmp.ge.s32.totalorder %s20_s11, 16  ;;  %p254_p1 = scmp.ge.s32.totalorder %s342_s10, 1 }
   0x5   : > { %p108_p2 = scmp.lt.s32.totalorder %s342_s10, 33 }
   0x6   : > { %s418_s11 = smov (%p21_p0, %s20_s11), 0  ;;  %s420_s12 = smov (!%p21_p0, %s23_s12), %s338_s9 }
   0x7   : > { %p109_p3 = pnand %p254_p1, %p108_p2  ;;  %p25_p4 = scmp.ge.s32.totalorder %s420_s12, 2 }
   0x8   : > { %s255_s13 = sshll.u32 (!%p109_p3), %s326_s6, 1  ;;  %p136_p5 = scmp.lt.s32.totalorder (!%p109_p3), %s330_s7, 1 }
   0x9   : > { %s422_s12 = smov (%p25_p4, %s420_s12), 0  ;;  %112 = sbr.rel (%p109_p3) target bundleno = 140 (0x8c), region = 24 }
   0xa   : > { %p138_p6 = scmp.lt.s32.totalorder (!%p109_p3), %s255_s13, 31  ;;  %s344_s20 = smov (!%p109_p3), 120  }
   0xb   : > { %p147_p7 = scmp.lt.s32.totalorder (!%p109_p3), %s326_s6, 15 }
   0xe   : > { %s424_s7 = smov (!%p136_p5, %s330_s7), 1  ;;  %s426_s13 = smov (!%p138_p6, %s255_s13), 31  ;;  %vm162_vm0 = vcmask 64512  }
   0xf   : > { %s256_s14 = sshll.u32 %s424_s7, 5  ;;  %s428_s6 = smov (!%p147_p7, %s326_s6), 15 }
  0x10   : > { %s141_s15 = sadd.s32 %s256_s14, %s426_s13  ;;  %s258_s21 = sshll.u32 %s424_s7, 4 }
  0x11   : > { %s257_s16 = sshll.u32 %s141_s15, 3  ;;  %s150_s22 = sadd.s32 %s258_s21, %s428_s6 }
  0x12   : > { %s143_s19 = scalar_lea.vmem %s411_s0, %s257_s16  ;;  %s259_s23 = sshll.u32 %s150_s22, 3 }
  0x13   : > { %v153_v0 = vld [vmem:[%s143_s19] sm:$0xff]  ;;  %v260_v1 = vld [vmem:[%s143_s19 + $0x8] sm:$0xff]  ;;  %s152_s26 = scalar_lea.vmem %s412_s1, %s259_s23 }
  0x14   : > { %v156_v2 = vmax.f32 %v153_v0, %v260_v1 }
  0x16   : > { %158 = vrot.lane.b32.xlu0 %v156_v2, %s344_s20 }
  0x88   : > { %v159_v3 = vpop.permute.xlu0 %158 }
  0x89   : > { %v161_v4 = vmax.f32 %v156_v2, %v159_v3 }
  0x8b   : > { %163 = vst.msk [vmem:[%s152_s26] sm:$0xff] %vm162_vm0, %v161_v4 }
  0x8c PF: > { %s11_s10 = sadd.s32 1, %s342_s10   ;;  %s413_s6 = smov %s334_s8 }
  0x8d   : > { %p8_p8 = scmp.ge.s32.totalorder %s11_s10, 34   ;;  %s414_s7 = smov %s338_s9 }
  0x8e   : > { %s415_s8 = smov %s418_s11  ;;  %s416_s9 = smov %s422_s12 }
  0x8f   :  { %10 = sbr.rel (!%p8_p8) target bundleno = 3 (0x3), region = 55 }

// kernel: vgg_feature_extractor.15
= control target key start
LH: loop header
LB: loop body
LE: loop exit
PB: predicated region body
PF: predicated region fallthrough
CT: control target
= control target key end

     0   :  { %s1266_s18 = smov 0   ;;  %s1268_s19 = smov 0   ;;  %s1414_s0 = inlined_call_operand.vmem [shape: f32[2,18,10,8], index: 0, kind: input, shape index: {}, may-alias: {0,1,2}]   ;;  %s1415_s1 = inlined_call_operand.vmem [shape: f32[2,18,10,8], index: 1, kind: input, shape index: {}, may-alias: {0,1,2}]   ;;  %s1416_s2 = inlined_call_operand.vmem [shape: f32[2,18,10,8], index: 2, kind: input, shape index: {}, may-alias: {0,1,2}]   ;;  %s1417_s3 = inlined_call_operand.vmem [shape: bf16[9,8,16], index: 3, kind: input, shape index: {}]   ;;  %s1418_s4 = inlined_call_operand.vmem [shape: f32[1,16], index: 4, kind: input, shape index: {}]   ;;  %s1419_s5 = inlined_call_operand.vmem [shape: f32[2,16,8,16], index: 5, kind: output, shape index: {}]  }
   0x1   :  { %s1270_s20 = smov 0   ;;  %s1272_s21 = smov 0  }
   0x2   :  { %s1274_s22 = smov 0  }
   0x3 LB: > { %s27_s23 = sadd.s32 1, %s1224_s20  ;;  %s30_s24 = sadd.s32 1, %s1228_s21  ;;  %s1232_s22 = sphi %s1274_s22, %s15_s22   ;;  %s1228_s21 = sphi %s1272_s21, %s1423_s21   ;;  %s1224_s20 = sphi %s1270_s20, %s1422_s20   ;;  %s1220_s19 = sphi %s1268_s19, %s1421_s19   ;;  %s1216_s18 = sphi %s1266_s18, %s1420_s18  }
   0x4   : > { %p28_p0 = scmp.ge.s32.totalorder %s27_s23, 16  ;;  %p1050_p1 = scmp.ge.s32.totalorder %s1232_s22, 1 }
   0x5   : > { %p273_p2 = scmp.lt.s32.totalorder %s1232_s22, 33 }
   0x6   : > { %s1425_s23 = smov (%p28_p0, %s27_s23), 0  ;;  %s1427_s24 = smov (!%p28_p0, %s30_s24), %s1228_s21 }
   0x7   : > { %p274_p3 = pnand %p1050_p1, %p273_p2  ;;  %p32_p4 = scmp.ge.s32.totalorder %s1427_s24, 2 }
   0x8   : > { %p338_p5 = scmp.lt.s32.totalorder (!%p274_p3), %s1220_s19, 1  ;;  %p340_p6 = scmp.lt.s32.totalorder (!%p274_p3), %s1216_s18, 17 }
   0x9   : > { %s1429_s24 = smov (%p32_p4, %s1427_s24), 0  ;;  %277 = sbr.rel (%p274_p3) target bundleno = 263 (0x107), region = 40 }
   0xa   : > { %s347_s29 = sadd.s32 (!%p274_p3), 1, %s1216_s18  ;;  %s358_s30 = sadd.s32 (!%p274_p3), 2, %s1216_s18 }
   0xb   : > { %p350_p7 = scmp.lt.s32.totalorder (!%p274_p3), %s347_s29, 17  ;;  %p361_p8 = scmp.lt.s32.totalorder (!%p274_p3), %s358_s30, 17 }
   0xc   : > { %p378_p9 = scmp.lt.s32.totalorder (!%p274_p3), %s1216_s18, 15 }
   0xe   : > { %v1059_v0 = vld [vmem:[%s1417_s3 + $0x4] sm:$0xf]  ;;  %vm405_vm0 = vcmask 1043456   ;;  %v391_v1 = vld [vmem:[%s1417_s3] sm:$0xf]  ;;  %v1234_v2 = vmov 0.0  }
   0xf   : > { %1097 = vmatprep.subr.bf16.mxu0 %v1234_v2  ;;  %v407_v3 = vsel %vm405_vm0, %v1059_v0, 0  ;;  %1103 = vmatprep.subr.bf16.mxu1 %v1234_v2  ;;  %v452_v4 = vsel %vm405_vm0, %v391_v1, 0  ;;  %vm1235_vm1 = vmmov 0   ;;  %s1431_s19 = smov (!%p338_p5, %s1220_s19), 1  ;;  %v1064_v5 = vld [vmem:[%s1417_s3 + $0xc] sm:$0xf] }
  0x10   : > { %1098 = vmatpush3.bf16.msra.mxu0 %v407_v3  ;;  %1104 = vmatpush3.bf16.msra.mxu1 %v452_v4  ;;  %s341_s6 = scalar_select %p340_p6, %s1216_s18, 17  ;;  %vm401_vm2 = vcmask 64512   ;;  %v554_v9 = vsel %vm405_vm0, %v1064_v5, 0  ;;  %v1062_v12 = vld [vmem:[%s1417_s3 + $0x8] sm:$0xf]  ;;  %vm870_vm3 = vcmask 130048  }
  0x11   : > { %1099 = vmatprep.mubr.msk.bf16.mxu0 %vm1235_vm1, %v1234_v2  ;;  %1105 = vmatprep.mubr.msk.bf16.mxu1 %vm1235_vm1, %v1234_v2  ;;  %s1151_s7 = smul.u32 36, %s1431_s19  ;;  %s1433_s29 = smov (!%p350_p7, %s347_s29), 17  ;;  %v1068_v16 = vld [vmem:[%s1417_s3 + $0x14] sm:$0xf]  ;;  %v502_v18 = vsel %vm405_vm0, %v1062_v12, 0 }
  0x12   : > { %1109 = vmatprep.subr.bf16.mxu0 %v1234_v2  ;;  %1115 = vmatprep.subr.bf16.mxu1 %v1234_v2  ;;  %s1051_s8 = sshll.u32 %s341_s6, 1  ;;  %s1435_s30 = smov (!%p361_p8, %s358_s30), 17  ;;  %v660_v22 = vsel %vm405_vm0, %v1068_v16, 0  ;;  %v1066_v24 = vld [vmem:[%s1417_s3 + $0x10] sm:$0xf] }
  0x13   : > { %s344_s9 = sadd.s32 %s1151_s7, %s1051_s8  ;;  %s1053_s16 = sshll.u32 %s1433_s29, 1  ;;  %v1072_v27 = vld [vmem:[%s1417_s3 + $0x1c] sm:$0xf]  ;;  %v609_v28 = vsel %vm405_vm0, %v1066_v24, 0  ;;  %v1070_v36 = vld [vmem:[%s1417_s3 + $0x18] sm:$0xf] }
  0x14   : > { %s1052_s10 = sshll.u32 %s344_s9, 3  ;;  %s354_s17 = sadd.s32 %s1151_s7, %s1053_s16  ;;  %v767_v33 = vsel %vm405_vm0, %v1072_v27, 0  ;;  %v712_v38 = vsel %vm405_vm0, %v1070_v36, 0  ;;  %v1074_v40 = vld [vmem:[%s1417_s3 + $0x20] sm:$0xf] }
  0x15   : > { %s346_s15 = scalar_lea.vmem %s1414_s0, %s1052_s10  ;;  %s1055_s25 = sshll.u32 %s1435_s30, 1  ;;  %v818_v41 = vsel %vm405_vm0, %v1074_v40, 0 }
  0x16   : > { %v388_v6 = vld [vmem:[%s346_s15] sm:$0xff]  ;;  %v389_v7 = vld [vmem:[%s346_s15 + $0x8] sm:$0x3]  ;;  %s1054_s28 = sshll.u32 %s354_s17, 3  ;;  %s365_s6 = sadd.s32 %s1151_s7, %s1055_s25 }
  0x17   : > { %v390_v8 = vpack.c.bf16 %v389_v7, %v388_v6  ;;  %s356_s29 = scalar_lea.vmem %s1415_s1, %s1054_s28  ;;  %s1056_s10 = sshll.u32 %s365_s6, 3 }
  0x18   : > { %v545_v14 = vld [vmem:[%s356_s29] sm:$0xff]  ;;  %v546_v15 = vld [vmem:[%s356_s29 + $0x8] sm:$0x3]  ;;  %s367_s14 = scalar_lea.vmem %s1416_s2, %s1056_s10  ;;  %s1437_s18 = smov (!%p378_p9, %s1216_s18), 15 }
  0x19   : > { %v395_v10 = vshrl.u32 %v390_v8, 16  ;;  %v397_v11 = vshll.u32 %v390_v8, 16  ;;  %1106 = vmatmul.mubr.msk.bf16.vlgmr.msra.gmra.mxu1 %vm401_vm2, %v390_v8  ;;  %v547_v19 = vpack.c.bf16 %v546_v15, %v545_v14  ;;  %v703_v20 = vld [vmem:[%s367_s14] sm:$0xff]  ;;  %v704_v21 = vld [vmem:[%s367_s14 + $0x8] sm:$0x3]  ;;  %v497_v25 = vrot.slane %v390_v8, 1 }
  0x1a   : > { %1116 = vmatpush3.bf16.msra.mxu1 %v554_v9  ;;  %1117 = vmatprep.mubr.msk.bf16.mxu1 %vm1235_vm1, %v1234_v2  ;;  %v705_v23 = vpack.c.bf16 %v704_v21, %v703_v20  ;;  %s1057_s6 = sshll.u32 %s1431_s19, 4 }
  0x1b   : > { %v399_v13 = vrot.slane %v397_v11, 1  ;;  %1127 = vmatprep.subr.bf16.mxu1 %v1234_v2  ;;  %v601_v26 = vshll.u32 %v547_v19, 16  ;;  %v655_v29 = vrot.slane %v547_v19, 1  ;;  %v599_v31 = vshrl.u32 %v547_v19, 16  ;;  %s384_s8 = sadd.s32 %s1057_s6, %s1437_s18 }
  0x1c   : > { %v759_v30 = vshll.u32 %v705_v23, 16  ;;  %v757_v34 = vshrl.u32 %v705_v23, 16  ;;  %v813_v42 = vrot.slane %v705_v23, 1  ;;  %s1058_s10 = sshll.u32 %s384_s8, 3 }
  0x1d   : > { %v400_v17 = vor.u32 %v399_v13, %v395_v10  ;;  %v603_v32 = vrot.slane %v601_v26, 1  ;;  %s386_s12 = scalar_lea.vmem %s1419_s5, %s1058_s10 }
  0x1e   : > { %v761_v35 = vrot.slane %v759_v30, 1 }
  0x1f   : > { %1100 = vmatmul.mubr.msk.bf16.vlgmr.msra.gmra.mxu0 %vm401_vm2, %v400_v17  ;;  %v604_v37 = vor.u32 %v603_v32, %v599_v31 }
  0x20   : > { %1110 = vmatpush3.bf16.msra.mxu0 %v502_v18  ;;  %1111 = vmatprep.mubr.msk.bf16.mxu0 %vm1235_vm1, %v1234_v2  ;;  %v762_v39 = vor.u32 %v761_v35, %v757_v34 }
  0x21   : > { %1121 = vmatprep.subr.bf16.mxu0 %v1234_v2  ;;  %1118 = vmatmul.mubr.msk.bf16.vlgmr.msra.gmra.mxu1 %vm401_vm2, %v547_v19  ;;  %v1076_v19 = vld [vmem:[%s1418_s4] ss:$0 sm:$0xff] }
  0x22   : > { %1128 = vmatpush3.bf16.msra.mxu1 %v660_v22  ;;  %1129 = vmatprep.mubr.msk.bf16.mxu1 %vm1235_vm1, %v1234_v2 }
  0x23   : > { %1139 = vmatprep.subr.bf16.mxu1 %v1234_v2 }
  0x27   : > { %1112 = vmatmul.mubr.msk.bf16.vlgmr.msra.gmra.mxu0 %vm401_vm2, %v497_v25 }
  0x28   : > { %1122 = vmatpush3.bf16.msra.mxu0 %v609_v28  ;;  %1123 = vmatprep.mubr.msk.bf16.mxu0 %vm1235_vm1, %v1234_v2 }
  0x29   : > { %1133 = vmatprep.subr.bf16.mxu0 %v1234_v2  ;;  %1130 = vmatmul.mubr.msk.bf16.vlgmr.msra.gmra.mxu1 %vm401_vm2, %v655_v29 }
  0x2a   : > { %1140 = vmatpush3.bf16.msra.mxu1 %v767_v33  ;;  %1141 = vmatprep.mubr.msk.bf16.mxu1 %vm1235_vm1, %v1234_v2 }
  0x2f   : > { %1124 = vmatmul.mubr.msk.bf16.vlgmr.msra.gmra.mxu0 %vm401_vm2, %v604_v37 }
  0x30   : > { %1134 = vmatpush3.bf16.msra.mxu0 %v712_v38  ;;  %1135 = vmatprep.mubr.msk.bf16.mxu0 %vm1235_vm1, %v1234_v2 }
  0x31   : > { %1145 = vmatprep.subr.bf16.mxu0 %v1234_v2  ;;  %1142 = vmatmul.mubr.msk.bf16.vlgmr.msra.gmra.mxu1 %vm401_vm2, %v762_v39 }
  0x37   : > { %1136 = vmatmul.mubr.msk.bf16.vlgmr.msra.gmra.mxu0 %vm401_vm2, %v705_v23 }
  0x38   : > { %1146 = vmatpush3.bf16.msra.mxu0 %v818_v41  ;;  %1147 = vmatprep.mubr.msk.bf16.mxu0 %vm1235_vm1, %v1234_v2 }
  0x3f   : > { %1148 = vmatmul.mubr.msk.bf16.vlgmr.msra.gmra.mxu0 %vm401_vm2, %v813_v42 }
  0xd9   : > { %v488_v43 = vpop.f32.mrf.mxu1 }
  0xdb   : > { %v1107_v44 = vpop.f32.mrf.mxu1 }
  0xdd   : > { %v491_v45 = vpop.f32.mrf.mxu1 }
  0xdf   : > { %v443_v46 = vpop.f32.mrf.mxu0  ;;  %v1108_v47 = vpop.f32.mrf.mxu1 }
  0xe0   : > { %v489_v60 = vadd.f32 %v488_v43, %v443_v46 }
  0xe1   : > { %v1101_v48 = vpop.f32.mrf.mxu0  ;;  %v590_v49 = vpop.f32.mrf.mxu1 }
  0xe3   : > { %v446_v50 = vpop.f32.mrf.mxu0  ;;  %v1119_v51 = vpop.f32.mrf.mxu1 }
  0xe5   : > { %v1102_v52 = vpop.f32.mrf.mxu0  ;;  %v593_v53 = vpop.f32.mrf.mxu1 }
  0xe7   : > { %v538_v54 = vpop.f32.mrf.mxu0  ;;  %v1120_v55 = vpop.f32.mrf.mxu1 }
  0xe8   : > { %v544_v63 = vadd.f32 %v538_v54, %v489_v60 }
  0xe9   : > { %v1113_v56 = vpop.f32.mrf.mxu0  ;;  %v696_v57 = vpop.f32.mrf.mxu1 }
  0xea   : > { %v596_v4 = vadd.f32 %v590_v49, %v544_v63 }
  0xeb   : > { %v541_v58 = vpop.f32.mrf.mxu0  ;;  %v1131_v59 = vpop.f32.mrf.mxu1 }
  0xed   : > { %v1114_v61 = vpop.f32.mrf.mxu0  ;;  %v699_v62 = vpop.f32.mrf.mxu1 }
  0xef   : > { %v645_v0 = vpop.f32.mrf.mxu0  ;;  %v1132_v1 = vpop.f32.mrf.mxu1 }
  0xf0   : > { %v651_v7 = vadd.f32 %v645_v0, %v596_v4 }
  0xf1   : > { %v1125_v2 = vpop.f32.mrf.mxu0  ;;  %v803_v3 = vpop.f32.mrf.mxu1 }
  0xf2   : > { %v702_v12 = vadd.f32 %v696_v57, %v651_v7 }
  0xf3   : > { %v648_v5 = vpop.f32.mrf.mxu0  ;;  %v1143_v6 = vpop.f32.mrf.mxu1 }
  0xf5   : > { %v1126_v8 = vpop.f32.mrf.mxu0  ;;  %v806_v9 = vpop.f32.mrf.mxu1 }
  0xf7   : > { %v748_v10 = vpop.f32.mrf.mxu0  ;;  %v1144_v11 = vpop.f32.mrf.mxu1 }
  0xf8   : > { %v754_v14 = vadd.f32 %v748_v10, %v702_v12 }
  0xf9   : > { %v1137_v13 = vpop.f32.mrf.mxu0 }
  0xfa   : > { %v809_v17 = vadd.f32 %v803_v3, %v754_v14 }
  0xfb   : > { %v751_v15 = vpop.f32.mrf.mxu0 }
  0xfd   : > { %v1138_v16 = vpop.f32.mrf.mxu0 }
  0xff   : > { %v854_v18 = vpop.f32.mrf.mxu0 }
 0x100   : > { %v860_v20 = vadd.f32 %v854_v18, %v809_v17 }
 0x101   : > { %v1149_v21 = vpop.f32.mrf.mxu0 }
 0x102   : > { %v868_v22 = vadd.f32 %v1076_v19, %v860_v20 }
 0x103   : > { %v857_v23 = vpop.f32.mrf.mxu0 }
 0x104   : > { %v869_v24 = vmax.f32 %v868_v22, 0.0 }
 0x105   : > { %v1150_v25 = vpop.f32.mrf.mxu0 }
 0x106   : > { %871 = vst.msk [vmem:[%s386_s12] sm:$0xff] %vm870_vm3, %v869_v24 }
 0x107 PF: > { %s15_s22 = sadd.s32 1, %s1232_s22   ;;  %s1420_s18 = smov %s1224_s20 }
 0x108   : > { %p12_p10 = scmp.ge.s32.totalorder %s15_s22, 34   ;;  %s1421_s19 = smov %s1228_s21 }
 0x109   : > { %s1422_s20 = smov %s1425_s23  ;;  %s1423_s21 = smov %s1429_s24 }
 0x10a   :  { %14 = sbr.rel (!%p12_p10) target bundleno = 3 (0x3), region = 90 }

// kernel: vgg_feature_extractor.16
= control target key start
LH: loop header
LB: loop body
LE: loop exit
PB: predicated region body
PF: predicated region fallthrough
CT: control target
= control target key end

     0   :  { %s355_s6 = smov 0   ;;  %s357_s7 = smov 0   ;;  %s411_s0 = inlined_call_operand.vmem [shape: f32[2,16,4,32], index: 0, kind: input, shape index: {}]   ;;  %s412_s1 = inlined_call_operand.vmem [shape: f32[2,8,4,16], index: 1, kind: output, shape index: {}]  }
   0x1   :  { %s359_s8 = smov 0   ;;  %s361_s9 = smov 0  }
   0x2   :  { %s363_s10 = smov 0  }
   0x3 LB: > { %s20_s11 = sadd.s32 1, %s334_s8  ;;  %s23_s12 = sadd.s32 1, %s338_s9  ;;  %s342_s10 = sphi %s363_s10, %s11_s10   ;;  %s338_s9 = sphi %s361_s9, %s416_s9   ;;  %s334_s8 = sphi %s359_s8, %s415_s8   ;;  %s330_s7 = sphi %s357_s7, %s414_s7   ;;  %s326_s6 = sphi %s355_s6, %s413_s6  }
   0x4   : > { %p21_p0 = scmp.ge.s32.totalorder %s20_s11, 8  ;;  %p254_p1 = scmp.ge.s32.totalorder %s342_s10, 1 }
   0x5   : > { %p108_p2 = scmp.lt.s32.totalorder %s342_s10, 17 }
   0x6   : > { %s418_s11 = smov (%p21_p0, %s20_s11), 0  ;;  %s420_s12 = smov (!%p21_p0, %s23_s12), %s338_s9 }
   0x7   : > { %p109_p3 = pnand %p254_p1, %p108_p2  ;;  %p25_p4 = scmp.ge.s32.totalorder %s420_s12, 2 }
   0x8   : > { %s255_s13 = sshll.u32 (!%p109_p3), %s326_s6, 1  ;;  %p136_p5 = scmp.lt.s32.totalorder (!%p109_p3), %s330_s7, 1 }
   0x9   : > { %s422_s12 = smov (%p25_p4, %s420_s12), 0  ;;  %112 = sbr.rel (%p109_p3) target bundleno = 140 (0x8c), region = 24 }
   0xa   : > { %p138_p6 = scmp.lt.s32.totalorder (!%p109_p3), %s255_s13, 15  ;;  %s344_s20 = smov (!%p109_p3), 112  }
   0xb   : > { %p147_p7 = scmp.lt.s32.totalorder (!%p109_p3), %s326_s6, 7 }
   0xe   : > { %s424_s7 = smov (!%p136_p5, %s330_s7), 1  ;;  %s426_s13 = smov (!%p138_p6, %s255_s13), 15  ;;  %vm162_vm0 = vcmask 125952  }
   0xf   : > { %s256_s14 = sshll.u32 %s424_s7, 4  ;;  %s428_s6 = smov (!%p147_p7, %s326_s6), 7 }
  0x10   : > { %s141_s15 = sadd.s32 %s256_s14, %s426_s13  ;;  %s258_s21 = sshll.u32 %s424_s7, 3 }
  0x11   : > { %s257_s16 = sshll.u32 %s141_s15, 2  ;;  %s150_s22 = sadd.s32 %s258_s21, %s428_s6 }
  0x12   : > { %s143_s19 = scalar_lea.vmem %s411_s0, %s257_s16  ;;  %s259_s23 = sshll.u32 %s150_s22, 2 }
  0x13   : > { %v153_v0 = vld [vmem:[%s143_s19] sm:$0xf]  ;;  %v260_v1 = vld [vmem:[%s143_s19 + $0x4] sm:$0xf]  ;;  %s152_s26 = scalar_lea.vmem %s412_s1, %s259_s23 }
  0x14   : > { %v156_v2 = vmax.f32 %v153_v0, %v260_v1 }
  0x16   : > { %158 = vrot.lane.b32.xlu0 %v156_v2, %s344_s20 }
  0x88   : > { %v159_v3 = vpop.permute.xlu0 %158 }
  0x89   : > { %v161_v4 = vmax.f32 %v156_v2, %v159_v3 }
  0x8b   : > { %163 = vst.msk [vmem:[%s152_s26] sm:$0xf] %vm162_vm0, %v161_v4 }
  0x8c PF: > { %s11_s10 = sadd.s32 1, %s342_s10   ;;  %s413_s6 = smov %s334_s8 }
  0x8d   : > { %p8_p8 = scmp.ge.s32.totalorder %s11_s10, 18   ;;  %s414_s7 = smov %s338_s9 }
  0x8e   : > { %s415_s8 = smov %s418_s11  ;;  %s416_s9 = smov %s422_s12 }
  0x8f   :  { %10 = sbr.rel (!%p8_p8) target bundleno = 3 (0x3), region = 55 }

// kernel: vgg_feature_extractor.17
= control target key start
LH: loop header
LB: loop body
LE: loop exit
PB: predicated region body
PF: predicated region fallthrough
CT: control target
= control target key end

     0   :  { %s1303_s18 = smov 0   ;;  %s1305_s19 = smov 0   ;;  %s1438_s0 = inlined_call_operand.vmem [shape: f32[2,10,6,16], index: 0, kind: input, shape index: {}, may-alias: {0,1,2}]   ;;  %s1439_s1 = inlined_call_operand.vmem [shape: f32[2,10,6,16], index: 1, kind: input, shape index: {}, may-alias: {0,1,2}]   ;;  %s1440_s2 = inlined_call_operand.vmem [shape: f32[2,10,6,16], index: 2, kind: input, shape index: {}, may-alias: {0,1,2}]   ;;  %s1441_s3 = inlined_call_operand.vmem [shape: bf16[9,16,32], index: 3, kind: input, shape index: {}]   ;;  %s1442_s4 = inlined_call_operand.vmem [shape: f32[1,32], index: 4, kind: input, shape index: {}]   ;;  %s1443_s5 = inlined_call_operand.vmem [shape: f32[2,8,4,32], index: 5, kind: output, shape index: {}]  }
   0x1   :  { %s1307_s20 = smov 0   ;;  %s1309_s21 = smov 0  }
   0x2   :  { %s1311_s22 = smov 0  }
   0x3 LB: > { %s27_s23 = sadd.s32 1, %s1261_s20  ;;  %s30_s24 = sadd.s32 1, %s1265_s21  ;;  %s1269_s22 = sphi %s1311_s22, %s15_s22   ;;  %s1265_s21 = sphi %s1309_s21, %s1447_s21   ;;  %s1261_s20 = sphi %s1307_s20, %s1446_s20   ;;  %s1257_s19 = sphi %s1305_s19, %s1445_s19   ;;  %s1253_s18 = sphi %s1303_s18, %s1444_s18  }
   0x4   : > { %p28_p0 = scmp.ge.s32.totalorder %s27_s23, 8  ;;  %p1064_p1 = scmp.ge.s32.totalorder %s1269_s22, 1 }
   0x5   : > { %p270_p2 = scmp.lt.s32.totalorder %s1269_s22, 17 }
   0x6   : > { %s1449_s23 = smov (%p28_p0, %s27_s23), 0  ;;  %s1451_s24 = smov (!%p28_p0, %s30_s24), %s1265_s21 }
   0x7   : > { %p271_p3 = pnand %p1064_p1, %p270_p2  ;;  %p32_p4 = scmp.ge.s32.totalorder %s1451_s24, 2 }
   0x8   : > { %p332_p5 = scmp.lt.s32.totalorder (!%p271_p3), %s1257_s19, 1  ;;  %p334_p6 = scmp.lt.s32.totalorder (!%p271_p3), %s1253_s18, 9 }
   0x9   : > { %s1453_s24 = smov (%p32_p4, %s1451_s24), 0  ;;  %274 = sbr.rel (%p271_p3) target bundleno = 262 (0x106), region = 40 }
   0xa   : > { %s340_s6 = sadd.s32 (!%p271_p3), 1, %s1253_s18  ;;  %s350_s8 = sadd.s32 (!%p271_p3), 2, %s1253_s18 }
   0xb   : > { %p343_p7 = scmp.lt.s32.totalorder (!%p271_p3), %s340_s6, 9  ;;  %p353_p8 = scmp.lt.s32.totalorder (!%p271_p3), %s350_s8, 9 }
   0xc   : > { %p369_p9 = scmp.lt.s32.totalorder (!%p271_p3), %s1253_s18, 7 }
   0xe   : > { %v1222_v0 = vld [vmem:[%s1441_s3 + $0x8] sm:$0xff]   ;;  %v1271_v1 = vmov 0.0   ;;  %v1223_v2 = vld [vmem:[%s1441_s3] sm:$0xff]   ;;  %vm1272_vm0 = vmmov 0   ;;  %s1455_s19 = smov (!%p332_p5, %s1257_s19), 1  ;;  %vm399_vm1 = vcmask 130048  }
   0xf   : > { %1125 = vmatprep.subr.bf16.mxu0 %v1271_v1  ;;  %1131 = vmatprep.subr.bf16.mxu1 %v1271_v1  ;;  %s335_s29 = scalar_select %p334_p6, %s1253_s18, 9  ;;  %v1225_v4 = vld [vmem:[%s1441_s3 + $0x18] sm:$0xff]   ;;  %v1224_v10 = vld [vmem:[%s1441_s3 + $0x10] sm:$0xff]   ;;  %v1227_v13 = vld [vmem:[%s1441_s3 + $0x28] sm:$0xff]   ;;  %vm893_vm2 = vcmask 257024  }
  0x10   : > { %1126 = vmatpush3.bf16.msra.mxu0 %v1222_v0  ;;  %1127 = vmatprep.mubr.msk.bf16.mxu0 %vm1272_vm0, %v1271_v1  ;;  %s1179_s30 = smul.u32 10, %s1455_s19  ;;  %s1457_s6 = smov (!%p343_p7, %s340_s6), 9  ;;  %v1226_v18 = vld [vmem:[%s1441_s3 + $0x20] sm:$0xff]   ;;  %v1229_v21 = vld [vmem:[%s1441_s3 + $0x38] sm:$0xff]   ;;  %v1228_v27 = vld [vmem:[%s1441_s3 + $0x30] sm:$0xff]  }
  0x11   : > { %1132 = vmatpush3.bf16.msra.mxu1 %v1223_v2  ;;  %1133 = vmatprep.mubr.msk.bf16.mxu1 %vm1272_vm0, %v1271_v1  ;;  %s1459_s8 = smov (!%p353_p8, %s350_s8), 9  ;;  %v1230_v29 = vld [vmem:[%s1441_s3 + $0x40] sm:$0xff]   ;;  %s1461_s18 = smov (!%p369_p9, %s1253_s18), 7 }
  0x12   : > { %1137 = vmatprep.subr.bf16.mxu0 %v1271_v1  ;;  %1143 = vmatprep.subr.bf16.mxu1 %v1271_v1  ;;  %s337_s7 = sadd.s32 %s1179_s30, %s335_s29  ;;  %s346_s15 = sadd.s32 %s1179_s30, %s1457_s6 }
  0x13   : > { %s1065_s9 = sshll.u32 %s337_s7, 3  ;;  %s1066_s16 = sshll.u32 %s346_s15, 3 }
  0x14   : > { %s339_s12 = scalar_lea.vmem %s1438_s0, %s1065_s9  ;;  %s356_s17 = sadd.s32 %s1179_s30, %s1459_s8 }
  0x15   : > { %v379_v3 = vld [vmem:[%s339_s12] sm:$0x3f]  ;;  %s348_s27 = scalar_lea.vmem %s1439_s1, %s1066_s16  ;;  %s1067_s28 = sshll.u32 %s356_s17, 3 }
  0x16   : > { %v380_v5 = vpack.c.bf16 %v379_v3, %v379_v3  ;;  %v546_v9 = vld [vmem:[%s348_s27] sm:$0x3f]  ;;  %s358_s7 = scalar_lea.vmem %s1440_s2, %s1067_s28  ;;  %s1068_s26 = sshll.u32 %s1455_s19, 3 }
  0x17   : > { %v547_v12 = vpack.c.bf16 %v546_v9, %v546_v9  ;;  %v715_v14 = vld [vmem:[%s358_s7] sm:$0x3f]  ;;  %s375_s27 = sadd.s32 %s1068_s26, %s1461_s18 }
  0x18   : > { %v387_v6 = vshrl.u32 %v380_v5, 16  ;;  %v389_v7 = vshll.u32 %v380_v5, 16  ;;  %1134 = vmatmul.mubr.msk.bf16.vlgmr.msra.gmra.mxu1 %vm399_vm1, %v380_v5  ;;  %v716_v15 = vpack.c.bf16 %v715_v14, %v715_v14  ;;  %v495_v16 = vrot.slane %v380_v5, 1  ;;  %s1069_s6 = sshll.u32 %s375_s27, 2 }
  0x19   : > { %1144 = vmatpush3.bf16.msra.mxu1 %v1225_v4  ;;  %1145 = vmatprep.mubr.msk.bf16.mxu1 %vm1272_vm0, %v1271_v1  ;;  %v606_v17 = vshll.u32 %v547_v12, 16  ;;  %v664_v19 = vrot.slane %v547_v12, 1  ;;  %v604_v22 = vshrl.u32 %v547_v12, 16  ;;  %s377_s10 = scalar_lea.vmem %s1443_s5, %s1069_s6 }
  0x1a   : > { %v391_v8 = vrot.slane %v389_v7, 1  ;;  %1155 = vmatprep.subr.bf16.mxu1 %v1271_v1  ;;  %v775_v20 = vshll.u32 %v716_v15, 16  ;;  %v773_v24 = vshrl.u32 %v716_v15, 16  ;;  %v833_v30 = vrot.slane %v716_v15, 1  ;;  %v1104_v7 = vld [vmem:[%s1442_s4] ss:$0 sm:$0xff] }
  0x1b   : > { %v608_v23 = vrot.slane %v606_v17, 1 }
  0x1c   : > { %v392_v11 = vor.u32 %v391_v8, %v387_v6  ;;  %v777_v25 = vrot.slane %v775_v20, 1 }
  0x1d   : > { %v609_v26 = vor.u32 %v608_v23, %v604_v22 }
  0x1e   : > { %1128 = vmatmul.mubr.msk.bf16.vlgmr.msra.gmra.mxu0 %vm399_vm1, %v392_v11  ;;  %v778_v28 = vor.u32 %v777_v25, %v773_v24 }
  0x1f   : > { %1138 = vmatpush3.bf16.msra.mxu0 %v1224_v10  ;;  %1139 = vmatprep.mubr.msk.bf16.mxu0 %vm1272_vm0, %v1271_v1 }
  0x20   : > { %1149 = vmatprep.subr.bf16.mxu0 %v1271_v1  ;;  %1146 = vmatmul.mubr.msk.bf16.vlgmr.msra.gmra.mxu1 %vm399_vm1, %v547_v12 }
  0x21   : > { %1156 = vmatpush3.bf16.msra.mxu1 %v1227_v13  ;;  %1157 = vmatprep.mubr.msk.bf16.mxu1 %vm1272_vm0, %v1271_v1 }
  0x22   : > { %1167 = vmatprep.subr.bf16.mxu1 %v1271_v1 }
  0x26   : > { %1140 = vmatmul.mubr.msk.bf16.vlgmr.msra.gmra.mxu0 %vm399_vm1, %v495_v16 }
  0x27   : > { %1150 = vmatpush3.bf16.msra.mxu0 %v1226_v18  ;;  %1151 = vmatprep.mubr.msk.bf16.mxu0 %vm1272_vm0, %v1271_v1 }
  0x28   : > { %1161 = vmatprep.subr.bf16.mxu0 %v1271_v1  ;;  %1158 = vmatmul.mubr.msk.bf16.vlgmr.msra.gmra.mxu1 %vm399_vm1, %v664_v19 }
  0x29   : > { %1168 = vmatpush3.bf16.msra.mxu1 %v1229_v21  ;;  %1169 = vmatprep.mubr.msk.bf16.mxu1 %vm1272_vm0, %v1271_v1 }
  0x2e   : > { %1152 = vmatmul.mubr.msk.bf16.vlgmr.msra.gmra.mxu0 %vm399_vm1, %v609_v26 }
  0x2f   : > { %1162 = vmatpush3.bf16.msra.mxu0 %v1228_v27  ;;  %1163 = vmatprep.mubr.msk.bf16.mxu0 %vm1272_vm0, %v1271_v1 }
  0x30   : > { %1173 = vmatprep.subr.bf16.mxu0 %v1271_v1  ;;  %1170 = vmatmul.mubr.msk.bf16.vlgmr.msra.gmra.mxu1 %vm399_vm1, %v778_v28 }
  0x36   : > { %1164 = vmatmul.mubr.msk.bf16.vlgmr.msra.gmra.mxu0 %vm399_vm1, %v716_v15 }
  0x37   : > { %1174 = vmatpush3.bf16.msra.mxu0 %v1230_v29  ;;  %1175 = vmatprep.mubr.msk.bf16.mxu0 %vm1272_vm0, %v1271_v1 }
  0x3e   : > { %1176 = vmatmul.mubr.msk.bf16.vlgmr.msra.gmra.mxu0 %vm399_vm1, %v833_v30 }
  0xd8   : > { %v485_v31 = vpop.f32.mrf.mxu1 }
  0xda   : > { %v1135_v32 = vpop.f32.mrf.mxu1 }
  0xdc   : > { %v488_v33 = vpop.f32.mrf.mxu1 }
  0xde   : > { %v437_v34 = vpop.f32.mrf.mxu0  ;;  %v1136_v35 = vpop.f32.mrf.mxu1 }
  0xdf   : > { %v486_v48 = vadd.f32 %v485_v31, %v437_v34 }
  0xe0   : > { %v1129_v36 = vpop.f32.mrf.mxu0  ;;  %v594_v37 = vpop.f32.mrf.mxu1 }
  0xe2   : > { %v440_v38 = vpop.f32.mrf.mxu0  ;;  %v1147_v39 = vpop.f32.mrf.mxu1 }
  0xe4   : > { %v1130_v40 = vpop.f32.mrf.mxu0  ;;  %v597_v41 = vpop.f32.mrf.mxu1 }
  0xe6   : > { %v539_v42 = vpop.f32.mrf.mxu0  ;;  %v1148_v43 = vpop.f32.mrf.mxu1 }
  0xe7   : > { %v545_v51 = vadd.f32 %v539_v42, %v486_v48 }
  0xe8   : > { %v1141_v44 = vpop.f32.mrf.mxu0  ;;  %v708_v45 = vpop.f32.mrf.mxu1 }
  0xe9   : > { %v600_v56 = vadd.f32 %v594_v37, %v545_v51 }
  0xea   : > { %v542_v46 = vpop.f32.mrf.mxu0  ;;  %v1159_v47 = vpop.f32.mrf.mxu1 }
  0xec   : > { %v1142_v49 = vpop.f32.mrf.mxu0  ;;  %v711_v50 = vpop.f32.mrf.mxu1 }
  0xee   : > { %v653_v52 = vpop.f32.mrf.mxu0  ;;  %v1160_v53 = vpop.f32.mrf.mxu1 }
  0xef   : > { %v659_v59 = vadd.f32 %v653_v52, %v600_v56 }
  0xf0   : > { %v1153_v54 = vpop.f32.mrf.mxu0  ;;  %v822_v55 = vpop.f32.mrf.mxu1 }
  0xf1   : > { %v714_v0 = vadd.f32 %v708_v45, %v659_v59 }
  0xf2   : > { %v656_v57 = vpop.f32.mrf.mxu0  ;;  %v1171_v58 = vpop.f32.mrf.mxu1 }
  0xf4   : > { %v1154_v60 = vpop.f32.mrf.mxu0  ;;  %v825_v61 = vpop.f32.mrf.mxu1 }
  0xf6   : > { %v763_v62 = vpop.f32.mrf.mxu0  ;;  %v1172_v63 = vpop.f32.mrf.mxu1 }
  0xf7   : > { %v769_v2 = vadd.f32 %v763_v62, %v714_v0 }
  0xf8   : > { %v1165_v1 = vpop.f32.mrf.mxu0 }
  0xf9   : > { %v828_v5 = vadd.f32 %v822_v55, %v769_v2 }
  0xfa   : > { %v766_v3 = vpop.f32.mrf.mxu0 }
  0xfc   : > { %v1166_v4 = vpop.f32.mrf.mxu0 }
  0xfe   : > { %v877_v6 = vpop.f32.mrf.mxu0 }
  0xff   : > { %v883_v8 = vadd.f32 %v877_v6, %v828_v5 }
 0x100   : > { %v1177_v9 = vpop.f32.mrf.mxu0 }
 0x101   : > { %v891_v10 = vadd.f32 %v1104_v7, %v883_v8 }
 0x102   : > { %v880_v11 = vpop.f32.mrf.mxu0 }
 0x103   : > { %v892_v12 = vmax.f32 %v891_v10, 0.0 }
 0x104   : > { %v1178_v13 = vpop.f32.mrf.mxu0 }
 0x105   : > { %894 = vst.msk [vmem:[%s377_s10] sm:$0xf] %vm893_vm2, %v892_v12 }
 0x106 PF: > { %s15_s22 = sadd.s32 1, %s1269_s22   ;;  %s1444_s18 = smov %s1261_s20 }
 0x107   : > { %p12_p10 = scmp.ge.s32.totalorder %s15_s22, 18   ;;  %s1445_s19 = smov %s1265_s21 }
 0x108   : > { %s1446_s20 = smov %s1449_s23  ;;  %s1447_s21 = smov %s1453_s24 }
 0x109   :  { %14 = sbr.rel (!%p12_p10) target bundleno = 3 (0x3), region = 90 }

// kernel: vgg_feature_extractor.18
= control target key start
LH: loop header
LB: loop body
LE: loop exit
PB: predicated region body
PF: predicated region fallthrough
CT: control target
= control target key end

     0   :  { %s1436_s18 = smov 0   ;;  %s1438_s19 = smov 0   ;;  %s1616_s0 = inlined_call_operand.vmem [shape: f32[2,10,6,32], index: 0, kind: input, shape index: {}, may-alias: {0,1,2}]   ;;  %s1617_s1 = inlined_call_operand.vmem [shape: f32[2,10,6,32], index: 1, kind: input, shape index: {}, may-alias: {0,1,2}]   ;;  %s1618_s2 = inlined_call_operand.vmem [shape: f32[2,10,6,32], index: 2, kind: input, shape index: {}, may-alias: {0,1,2}]   ;;  %s1619_s3 = inlined_call_operand.vmem [shape: bf16[9,32,32], index: 3, kind: input, shape index: {}]   ;;  %s1620_s4 = inlined_call_operand.vmem [shape: f32[1,32], index: 4, kind: input, shape index: {}]   ;;  %s1621_s5 = inlined_call_operand.vmem [shape: f32[2,8,4,32], index: 5, kind: output, shape index: {}]  }
   0x1   :  { %s1440_s20 = smov 0   ;;  %s1442_s21 = smov 0  }
   0x2   :  { %s1444_s22 = smov 0  }
   0x3 LB: > { %s27_s23 = sadd.s32 1, %s1394_s20  ;;  %s30_s24 = sadd.s32 1, %s1398_s21  ;;  %s1402_s22 = sphi %s1444_s22, %s15_s22   ;;  %s1398_s21 = sphi %s1442_s21, %s1625_s21   ;;  %s1394_s20 = sphi %s1440_s20, %s1624_s20   ;;  %s1390_s19 = sphi %s1438_s19, %s1623_s19   ;;  %s1386_s18 = sphi %s1436_s18, %s1622_s18  }
   0x4   : > { %p28_p0 = scmp.ge.s32.totalorder %s27_s23, 8  ;;  %p1136_p1 = scmp.ge.s32.totalorder %s1402_s22, 1 }
   0x5   : > { %p270_p2 = scmp.lt.s32.totalorder %s1402_s22, 17 }
   0x6   : > { %s1627_s23 = smov (%p28_p0, %s27_s23), 0  ;;  %s1629_s24 = smov (!%p28_p0, %s30_s24), %s1398_s21 }
   0x7   : > { %p271_p3 = pnand %p1136_p1, %p270_p2  ;;  %p32_p4 = scmp.ge.s32.totalorder %s1629_s24, 2 }
   0x8   : > { %p332_p5 = scmp.lt.s32.totalorder (!%p271_p3), %s1390_s19, 1  ;;  %p334_p6 = scmp.lt.s32.totalorder (!%p271_p3), %s1386_s18, 9 }
   0x9   : > { %s1631_s24 = smov (%p32_p4, %s1629_s24), 0  ;;  %274 = sbr.rel (%p271_p3) target bundleno = 262 (0x106), region = 40 }
   0xa   : > { %s340_s10 = sadd.s32 (!%p271_p3), 1, %s1386_s18  ;;  %s350_s16 = sadd.s32 (!%p271_p3), 2, %s1386_s18 }
   0xb   : > { %p343_p7 = scmp.lt.s32.totalorder (!%p271_p3), %s340_s10, 9  ;;  %p353_p8 = scmp.lt.s32.totalorder (!%p271_p3), %s350_s16, 9 }
   0xc   : > { %p369_p9 = scmp.lt.s32.totalorder (!%p271_p3), %s1386_s18, 7 }
   0xe   : > { %v1346_v0 = vld [vmem:[%s1619_s3 + $0x18] sm:$0xff]   ;;  %v1404_v1 = vmov 0.0   ;;  %v1347_v2 = vld [vmem:[%s1619_s3 + $0x8] sm:$0xff]   ;;  %v1348_v3 = vld [vmem:[%s1619_s3 + $0x10] sm:$0xff]   ;;  %vm1405_vm0 = vmmov 0   ;;  %s1633_s19 = smov (!%p332_p5, %s1390_s19), 1 }
   0xf   : > { %1231 = vmatprep.subr.bf16.mxu0 %v1404_v1  ;;  %1239 = vmatprep.subr.bf16.mxu1 %v1404_v1  ;;  %v1349_v4 = vld [vmem:[%s1619_s3] sm:$0xff]   ;;  %s335_s8 = scalar_select %p334_p6, %s1386_s18, 9  ;;  %vm409_vm1 = vcmask 261120   ;;  %v1351_v6 = vld [vmem:[%s1619_s3 + $0x38] sm:$0xff]   ;;  %v1353_v10 = vld [vmem:[%s1619_s3 + $0x30] sm:$0xff]   ;;  %vm965_vm2 = vcmask 257024  }
  0x10   : > { %1232 = vmatpush3.bf16.msra.mxu0 %v1346_v0  ;;  %1235 = vmatprep.mubr.msk.bf16.mxu0 %vm1405_vm0, %v1404_v1  ;;  %s1497_s9 = smul.u32 10, %s1633_s19  ;;  %s1635_s10 = smov (!%p343_p7, %s340_s10), 9  ;;  %v1350_v13 = vld [vmem:[%s1619_s3 + $0x28] sm:$0xff]   ;;  %v1355_v16 = vld [vmem:[%s1619_s3 + $0x58] sm:$0xff]   ;;  %v1352_v17 = vld [vmem:[%s1619_s3 + $0x20] sm:$0xff]  }
  0x11   : > { %1240 = vmatpush3.bf16.msra.mxu1 %v1347_v2  ;;  %1233 = vmatprep.subr.bf16.mxu0 %v1404_v1  ;;  %s1637_s16 = smov (!%p353_p8, %s350_s16), 9  ;;  %v1357_v19 = vld [vmem:[%s1619_s3 + $0x50] sm:$0xff]   ;;  %v1354_v23 = vld [vmem:[%s1619_s3 + $0x48] sm:$0xff]   ;;  %v1359_v26 = vld [vmem:[%s1619_s3 + $0x78] sm:$0xff]   ;;  %s1639_s18 = smov (!%p369_p9, %s1386_s18), 7 }
  0x12   : > { %1241 = vmatprep.subr.bf16.mxu1 %v1404_v1  ;;  %1243 = vmatprep.mubr.msk.bf16.mxu1 %vm1405_vm0, %v1404_v1  ;;  %s337_s11 = sadd.s32 %s1497_s9, %s335_s8  ;;  %s346_s26 = sadd.s32 %s1497_s9, %s1635_s10  ;;  %v1356_v29 = vld [vmem:[%s1619_s3 + $0x40] sm:$0xff]   ;;  %v1361_v32 = vld [vmem:[%s1619_s3 + $0x70] sm:$0xff]   ;;  %v1358_v34 = vld [vmem:[%s1619_s3 + $0x68] sm:$0xff]  }
  0x13   : > { %s1137_s12 = sshll.u32 %s337_s11, 3  ;;  %s1138_s27 = sshll.u32 %s346_s26, 3  ;;  %v1360_v36 = vld [vmem:[%s1619_s3 + $0x60] sm:$0xff]   ;;  %v1362_v37 = vld [vmem:[%s1619_s3 + $0x88] sm:$0xff]  }
  0x14   : > { %1234 = vmatpush3.bf16.msra.mxu0 %v1348_v3  ;;  %s339_s15 = scalar_lea.vmem %s1616_s0, %s1137_s12  ;;  %s348_s7 = scalar_lea.vmem %s1617_s1, %s1138_s27  ;;  %v1363_v38 = vld [vmem:[%s1619_s3 + $0x80] sm:$0xff]  }
  0x15   : > { %1242 = vmatpush3.bf16.msra.mxu1 %v1349_v4  ;;  %1247 = vmatprep.subr.bf16.mxu0 %v1404_v1  ;;  %v379_v5 = vld [vmem:[%s339_s15] sm:$0x3f]  ;;  %s356_s13 = sadd.s32 %s1497_s9, %s1637_s16  ;;  %s1140_s9 = sshll.u32 %s1633_s19, 3 }
  0x16   : > { %1255 = vmatprep.subr.bf16.mxu1 %v1404_v1  ;;  %v380_v7 = vpack.c.bf16 %v379_v5, %v379_v5  ;;  %v570_v12 = vld [vmem:[%s348_s7] sm:$0x3f]  ;;  %s1139_s14 = sshll.u32 %s356_s13, 3  ;;  %s375_s16 = sadd.s32 %s1140_s9, %s1639_s18 }
  0x17   : > { %v571_v15 = vpack.c.bf16 %v570_v12, %v570_v12  ;;  %s358_s27 = scalar_lea.vmem %s1618_s2, %s1139_s14  ;;  %s1141_s30 = sshll.u32 %s375_s16, 2 }
  0x18   : > { %v391_v8 = vshrl.u32 %v380_v7, 16  ;;  %v393_v9 = vshll.u32 %v380_v7, 16  ;;  %1244 = vmatmul.mubr.msk.bf16.vlgmr.msra.gmra.mxu1 %vm409_vm1, %v380_v7  ;;  %v763_v18 = vld [vmem:[%s358_s27] sm:$0x3f]  ;;  %v513_v21 = vrot.slane %v380_v7, 1  ;;  %s377_s8 = scalar_lea.vmem %s1621_s5, %s1141_s30 }
  0x19   : > { %1256 = vmatpush3.bf16.msra.mxu1 %v1351_v6  ;;  %1259 = vmatprep.mubr.msk.bf16.mxu1 %vm1405_vm0, %v1404_v1  ;;  %v764_v20 = vpack.c.bf16 %v763_v18, %v763_v18  ;;  %v640_v22 = vshll.u32 %v571_v15, 16  ;;  %v706_v24 = vrot.slane %v571_v15, 1  ;;  %v638_v27 = vshrl.u32 %v571_v15, 16 }
  0x1a   : > { %v395_v11 = vrot.slane %v393_v9, 1  ;;  %1257 = vmatprep.subr.bf16.mxu1 %v1404_v1 }
  0x1b   : > { %v833_v25 = vshll.u32 %v764_v20, 16  ;;  %v642_v28 = vrot.slane %v640_v22, 1  ;;  %v831_v30 = vshrl.u32 %v764_v20, 16  ;;  %v899_v39 = vrot.slane %v764_v20, 1 }
  0x1c   : > { %v396_v14 = vor.u32 %v395_v11, %v391_v8 }
  0x1d   : > { %1258 = vmatpush3.bf16.msra.mxu1 %v1353_v10  ;;  %v835_v31 = vrot.slane %v833_v25, 1  ;;  %v643_v33 = vor.u32 %v642_v28, %v638_v27 }
  0x1e   : > { %1236 = vmatmul.mubr.msk.bf16.vlgmr.msra.gmra.mxu0 %vm409_vm1, %v396_v14  ;;  %1271 = vmatprep.subr.bf16.mxu1 %v1404_v1 }
  0x1f   : > { %1248 = vmatpush3.bf16.msra.mxu0 %v1350_v13  ;;  %1251 = vmatprep.mubr.msk.bf16.mxu0 %vm1405_vm0, %v1404_v1  ;;  %v836_v35 = vor.u32 %v835_v31, %v831_v30 }
  0x20   : > { %1249 = vmatprep.subr.bf16.mxu0 %v1404_v1  ;;  %1260 = vmatmul.mubr.msk.bf16.vlgmr.msra.gmra.mxu1 %vm409_vm1, %v571_v15 }
  0x21   : > { %1272 = vmatpush3.bf16.msra.mxu1 %v1355_v16  ;;  %1275 = vmatprep.mubr.msk.bf16.mxu1 %vm1405_vm0, %v1404_v1  ;;  %v1201_v16 = vld [vmem:[%s1620_s4] ss:$0 sm:$0xff] }
  0x22   : > { %1273 = vmatprep.subr.bf16.mxu1 %v1404_v1 }
  0x23   : > { %1250 = vmatpush3.bf16.msra.mxu0 %v1352_v17 }
  0x24   : > { %1263 = vmatprep.subr.bf16.mxu0 %v1404_v1 }
  0x25   : > { %1274 = vmatpush3.bf16.msra.mxu1 %v1357_v19 }
  0x26   : > { %1252 = vmatmul.mubr.msk.bf16.vlgmr.msra.gmra.mxu0 %vm409_vm1, %v513_v21  ;;  %1287 = vmatprep.subr.bf16.mxu1 %v1404_v1 }
  0x27   : > { %1264 = vmatpush3.bf16.msra.mxu0 %v1354_v23  ;;  %1267 = vmatprep.mubr.msk.bf16.mxu0 %vm1405_vm0, %v1404_v1 }
  0x28   : > { %1265 = vmatprep.subr.bf16.mxu0 %v1404_v1  ;;  %1276 = vmatmul.mubr.msk.bf16.vlgmr.msra.gmra.mxu1 %vm409_vm1, %v706_v24 }
  0x29   : > { %1288 = vmatpush3.bf16.msra.mxu1 %v1359_v26  ;;  %1291 = vmatprep.mubr.msk.bf16.mxu1 %vm1405_vm0, %v1404_v1 }
  0x2a   : > { %1289 = vmatprep.subr.bf16.mxu1 %v1404_v1 }
  0x2b   : > { %1266 = vmatpush3.bf16.msra.mxu0 %v1356_v29 }
  0x2c   : > { %1279 = vmatprep.subr.bf16.mxu0 %v1404_v1 }
  0x2d   : > { %1290 = vmatpush3.bf16.msra.mxu1 %v1361_v32 }
  0x2e   : > { %1268 = vmatmul.mubr.msk.bf16.vlgmr.msra.gmra.mxu0 %vm409_vm1, %v643_v33 }
  0x2f   : > { %1280 = vmatpush3.bf16.msra.mxu0 %v1358_v34  ;;  %1283 = vmatprep.mubr.msk.bf16.mxu0 %vm1405_vm0, %v1404_v1 }
  0x30   : > { %1281 = vmatprep.subr.bf16.mxu0 %v1404_v1  ;;  %1292 = vmatmul.mubr.msk.bf16.vlgmr.msra.gmra.mxu1 %vm409_vm1, %v836_v35 }
  0x33   : > { %1282 = vmatpush3.bf16.msra.mxu0 %v1360_v36 }
  0x34   : > { %1295 = vmatprep.subr.bf16.mxu0 %v1404_v1 }
  0x36   : > { %1284 = vmatmul.mubr.msk.bf16.vlgmr.msra.gmra.mxu0 %vm409_vm1, %v764_v20 }
  0x37   : > { %1296 = vmatpush3.bf16.msra.mxu0 %v1362_v37  ;;  %1299 = vmatprep.mubr.msk.bf16.mxu0 %vm1405_vm0, %v1404_v1 }
  0x38   : > { %1297 = vmatprep.subr.bf16.mxu0 %v1404_v1 }
  0x3b   : > { %1298 = vmatpush3.bf16.msra.mxu0 %v1363_v38 }
  0x3e   : > { %1300 = vmatmul.mubr.msk.bf16.vlgmr.msra.gmra.mxu0 %vm409_vm1, %v899_v39 }
  0xd8   : > { %v501_v40 = vpop.f32.mrf.mxu1 }
  0xda   : > { %v1245_v41 = vpop.f32.mrf.mxu1 }
  0xdc   : > { %v504_v42 = vpop.f32.mrf.mxu1 }
  0xde   : > { %v447_v43 = vpop.f32.mrf.mxu0  ;;  %v1246_v44 = vpop.f32.mrf.mxu1 }
  0xdf   : > { %v502_v57 = vadd.f32 %v501_v40, %v447_v43 }
  0xe0   : > { %v1237_v45 = vpop.f32.mrf.mxu0  ;;  %v626_v46 = vpop.f32.mrf.mxu1 }
  0xe2   : > { %v450_v47 = vpop.f32.mrf.mxu0  ;;  %v1261_v48 = vpop.f32.mrf.mxu1 }
  0xe4   : > { %v1238_v49 = vpop.f32.mrf.mxu0  ;;  %v629_v50 = vpop.f32.mrf.mxu1 }
  0xe6   : > { %v563_v51 = vpop.f32.mrf.mxu0  ;;  %v1262_v52 = vpop.f32.mrf.mxu1 }
  0xe7   : > { %v569_v60 = vadd.f32 %v563_v51, %v502_v57 }
  0xe8   : > { %v1253_v53 = vpop.f32.mrf.mxu0  ;;  %v756_v54 = vpop.f32.mrf.mxu1 }
  0xe9   : > { %v632_v1 = vadd.f32 %v626_v46, %v569_v60 }
  0xea   : > { %v566_v55 = vpop.f32.mrf.mxu0  ;;  %v1277_v56 = vpop.f32.mrf.mxu1 }
  0xec   : > { %v1254_v58 = vpop.f32.mrf.mxu0  ;;  %v759_v59 = vpop.f32.mrf.mxu1 }
  0xee   : > { %v693_v61 = vpop.f32.mrf.mxu0  ;;  %v1278_v62 = vpop.f32.mrf.mxu1 }
  0xef   : > { %v699_v4 = vadd.f32 %v693_v61, %v632_v1 }
  0xf0   : > { %v1269_v63 = vpop.f32.mrf.mxu0  ;;  %v886_v0 = vpop.f32.mrf.mxu1 }
  0xf1   : > { %v762_v9 = vadd.f32 %v756_v54, %v699_v4 }
  0xf2   : > { %v696_v2 = vpop.f32.mrf.mxu0  ;;  %v1293_v3 = vpop.f32.mrf.mxu1 }
  0xf4   : > { %v1270_v5 = vpop.f32.mrf.mxu0  ;;  %v889_v6 = vpop.f32.mrf.mxu1 }
  0xf6   : > { %v819_v7 = vpop.f32.mrf.mxu0  ;;  %v1294_v8 = vpop.f32.mrf.mxu1 }
  0xf7   : > { %v825_v11 = vadd.f32 %v819_v7, %v762_v9 }
  0xf8   : > { %v1285_v10 = vpop.f32.mrf.mxu0 }
  0xf9   : > { %v892_v14 = vadd.f32 %v886_v0, %v825_v11 }
  0xfa   : > { %v822_v12 = vpop.f32.mrf.mxu0 }
  0xfc   : > { %v1286_v13 = vpop.f32.mrf.mxu0 }
  0xfe   : > { %v949_v15 = vpop.f32.mrf.mxu0 }
  0xff   : > { %v955_v17 = vadd.f32 %v949_v15, %v892_v14 }
 0x100   : > { %v1301_v18 = vpop.f32.mrf.mxu0 }
 0x101   : > { %v963_v19 = vadd.f32 %v1201_v16, %v955_v17 }
 0x102   : > { %v952_v20 = vpop.f32.mrf.mxu0 }
 0x103   : > { %v964_v21 = vmax.f32 %v963_v19, 0.0 }
 0x104   : > { %v1302_v22 = vpop.f32.mrf.mxu0 }
 0x105   : > { %966 = vst.msk [vmem:[%s377_s8] sm:$0xf] %vm965_vm2, %v964_v21 }
 0x106 PF: > { %s15_s22 = sadd.s32 1, %s1402_s22   ;;  %s1622_s18 = smov %s1394_s20 }
 0x107   : > { %p12_p10 = scmp.ge.s32.totalorder %s15_s22, 18   ;;  %s1623_s19 = smov %s1398_s21 }
 0x108   : > { %s1624_s20 = smov %s1627_s23  ;;  %s1625_s21 = smov %s1631_s24 }
 0x109   :  { %14 = sbr.rel (!%p12_p10) target bundleno = 3 (0x3), region = 90 }

// kernel: vgg_feature_extractor.19
= control target key start
LH: loop header
LB: loop body
LE: loop exit
PB: predicated region body
PF: predicated region fallthrough
CT: control target
= control target key end

     0   :  { %s348_s6 = smov 0   ;;  %s350_s7 = smov 0   ;;  %s396_s0 = inlined_call_operand.vmem [shape: f32[2,8,4,32], index: 0, kind: input, shape index: {}]   ;;  %s397_s1 = inlined_call_operand.vmem [shape: f32[2,4,4,32], index: 1, kind: output, shape index: {}]  }
   0x1   :  { %s352_s8 = smov 0   ;;  %s354_s9 = smov 0  }
   0x2   :  { %s356_s10 = smov 0  }
   0x3 LB: > { %s20_s11 = sadd.s32 1, %s328_s8  ;;  %s23_s12 = sadd.s32 1, %s332_s9  ;;  %s336_s10 = sphi %s356_s10, %s11_s10   ;;  %s332_s9 = sphi %s354_s9, %s401_s9   ;;  %s328_s8 = sphi %s352_s8, %s400_s8   ;;  %s324_s7 = sphi %s350_s7, %s399_s7   ;;  %s320_s6 = sphi %s348_s6, %s398_s6  }
   0x4   : > { %p21_p0 = scmp.ge.s32.totalorder %s20_s11, 4  ;;  %p249_p1 = scmp.ge.s32.totalorder %s336_s10, 1 }
   0x5   : > { %p108_p2 = scmp.lt.s32.totalorder %s336_s10, 9 }
   0x6   : > { %s403_s11 = smov (%p21_p0, %s20_s11), 0  ;;  %s405_s12 = smov (!%p21_p0, %s23_s12), %s332_s9 }
   0x7   : > { %p109_p3 = pnand %p249_p1, %p108_p2  ;;  %p25_p4 = scmp.ge.s32.totalorder %s405_s12, 2 }
   0x8   : > { %s250_s13 = sshll.u32 (!%p109_p3), %s320_s6, 1  ;;  %p136_p5 = scmp.lt.s32.totalorder (!%p109_p3), %s324_s7, 1 }
   0x9   : > { %s407_s12 = smov (%p25_p4, %s405_s12), 0  ;;  %112 = sbr.rel (%p109_p3) target bundleno = 23 (0x17), region = 24 }
   0xa   : > { %p138_p6 = scmp.lt.s32.totalorder (!%p109_p3), %s250_s13, 7  ;;  %p147_p7 = scmp.lt.s32.totalorder (!%p109_p3), %s320_s6, 3 }
   0xe   : > { %s409_s7 = smov (!%p136_p5, %s324_s7), 1  ;;  %s411_s13 = smov (!%p138_p6, %s250_s13), 7  ;;  %vm157_vm0 = vcmask 257024  }
   0xf   : > { %s251_s14 = sshll.u32 %s409_s7, 3  ;;  %s253_s20 = sshll.u32 %s409_s7, 2 }
  0x10   : > { %s141_s15 = sadd.s32 %s251_s14, %s411_s13  ;;  %s413_s6 = smov (!%p147_p7, %s320_s6), 3 }
  0x11   : > { %s252_s16 = sshll.u32 %s141_s15, 2  ;;  %s150_s21 = sadd.s32 %s253_s20, %s413_s6 }
  0x12   : > { %s143_s19 = scalar_lea.vmem %s396_s0, %s252_s16  ;;  %s254_s22 = sshll.u32 %s150_s21, 2 }
  0x13   : > { %v153_v0 = vld [vmem:[%s143_s19] sm:$0xf]  ;;  %v255_v1 = vld [vmem:[%s143_s19 + $0x4] sm:$0xf]  ;;  %s152_s25 = scalar_lea.vmem %s397_s1, %s254_s22 }
  0x14   : > { %v156_v2 = vmax.f32 %v153_v0, %v255_v1 }
  0x16   : > { %158 = vst.msk [vmem:[%s152_s25] sm:$0xf] %vm157_vm0, %v156_v2 }
  0x17 PF: > { %s11_s10 = sadd.s32 1, %s336_s10   ;;  %s398_s6 = smov %s328_s8 }
  0x18   : > { %p8_p8 = scmp.ge.s32.totalorder %s11_s10, 10   ;;  %s399_s7 = smov %s332_s9 }
  0x19   : > { %s400_s8 = smov %s403_s11  ;;  %s401_s9 = smov %s407_s12 }
  0x1a   :  { %10 = sbr.rel (!%p8_p8) target bundleno = 3 (0x3), region = 55 }

// kernel: vgg_feature_extractor.20
= control target key start
LH: loop header
LB: loop body
LE: loop exit
PB: predicated region body
PF: predicated region fallthrough
CT: control target
= control target key end

     0   :  { %s1435_s18 = smov 0   ;;  %s1437_s19 = smov 0   ;;  %s1615_s0 = inlined_call_operand.vmem [shape: f32[2,6,6,32], index: 0, kind: input, shape index: {}, may-alias: {0,1,2}]   ;;  %s1616_s1 = inlined_call_operand.vmem [shape: f32[2,6,6,32], index: 1, kind: input, shape index: {}, may-alias: {0,1,2}]   ;;  %s1617_s2 = inlined_call_operand.vmem [shape: f32[2,6,6,32], index: 2, kind: input, shape index: {}, may-alias: {0,1,2}]   ;;  %s1618_s3 = inlined_call_operand.vmem [shape: bf16[9,32,64], index: 3, kind: input, shape index: {}]   ;;  %s1619_s4 = inlined_call_operand.vmem [shape: f32[1,64], index: 4, kind: input, shape index: {}]   ;;  %s1620_s5 = inlined_call_operand.vmem [shape: f32[2,4,4,64], index: 5, kind: output, shape index: {}]  }
   0x1   :  { %s1439_s20 = smov 0   ;;  %s1441_s21 = smov 0  }
   0x2   :  { %s1443_s22 = smov 0  }
   0x3 LB: > { %s27_s23 = sadd.s32 1, %s1393_s20  ;;  %s30_s24 = sadd.s32 1, %s1397_s21  ;;  %s1401_s22 = sphi %s1443_s22, %s15_s22   ;;  %s1397_s21 = sphi %s1441_s21, %s1624_s21   ;;  %s1393_s20 = sphi %s1439_s20, %s1623_s20   ;;  %s1389_s19 = sphi %s1437_s19, %s1622_s19   ;;  %s1385_s18 = sphi %s1435_s18, %s1621_s18  }
   0x4   : > { %p28_p0 = scmp.ge.s32.totalorder %s27_s23, 4  ;;  %p1135_p1 = scmp.ge.s32.totalorder %s1401_s22, 1 }
   0x5   : > { %p270_p2 = scmp.lt.s32.totalorder %s1401_s22, 9 }
   0x6   : > { %s1626_s23 = smov (%p28_p0, %s27_s23), 0  ;;  %s1628_s24 = smov (!%p28_p0, %s30_s24), %s1397_s21 }
   0x7   : > { %p271_p3 = pnand %p1135_p1, %p270_p2  ;;  %p32_p4 = scmp.ge.s32.totalorder %s1628_s24, 2 }
   0x8   : > { %p332_p5 = scmp.lt.s32.totalorder (!%p271_p3), %s1389_s19, 1  ;;  %p334_p6 = scmp.lt.s32.totalorder (!%p271_p3), %s1385_s18, 5 }
   0x9   : > { %s1630_s24 = smov (%p32_p4, %s1628_s24), 0  ;;  %274 = sbr.rel (%p271_p3) target bundleno = 261 (0x105), region = 40 }
   0xa   : > { %s340_s10 = sadd.s32 (!%p271_p3), 1, %s1385_s18  ;;  %s350_s16 = sadd.s32 (!%p271_p3), 2, %s1385_s18 }
   0xb   : > { %p343_p7 = scmp.lt.s32.totalorder (!%p271_p3), %s340_s10, 5  ;;  %p353_p8 = scmp.lt.s32.totalorder (!%p271_p3), %s350_s16, 5 }
   0xc   : > { %p369_p9 = scmp.lt.s32.totalorder (!%p271_p3), %s1385_s18, 3 }
   0xe   : > { %v1345_v0 = vld [vmem:[%s1618_s3 + $0x18] sm:$0xff]   ;;  %v1403_v1 = vmov 0.0   ;;  %v1346_v2 = vld [vmem:[%s1618_s3 + $0x8] sm:$0xff]   ;;  %v1347_v3 = vld [vmem:[%s1618_s3 + $0x10] sm:$0xff]   ;;  %vm1404_vm0 = vmmov 0   ;;  %s1632_s19 = smov (!%p332_p5, %s1389_s19), 1 }
   0xf   : > { %1230 = vmatprep.subr.bf16.mxu0 %v1403_v1  ;;  %1238 = vmatprep.subr.bf16.mxu1 %v1403_v1  ;;  %v1348_v4 = vld [vmem:[%s1618_s3] sm:$0xff]   ;;  %s335_s8 = scalar_select %p334_p6, %s1385_s18, 5  ;;  %vm409_vm1 = vcmask 261120   ;;  %v1350_v6 = vld [vmem:[%s1618_s3 + $0x38] sm:$0xff]   ;;  %v1352_v10 = vld [vmem:[%s1618_s3 + $0x30] sm:$0xff]   ;;  %vm964_vm2 = vcmask 519168  }
  0x10   : > { %1231 = vmatpush3.bf16.msra.mxu0 %v1345_v0  ;;  %1234 = vmatprep.mubr.msk.bf16.mxu0 %vm1404_vm0, %v1403_v1  ;;  %s1496_s9 = smul.u32 6, %s1632_s19  ;;  %s1634_s10 = smov (!%p343_p7, %s340_s10), 5  ;;  %v1349_v13 = vld [vmem:[%s1618_s3 + $0x28] sm:$0xff]   ;;  %v1354_v16 = vld [vmem:[%s1618_s3 + $0x58] sm:$0xff]   ;;  %v1351_v17 = vld [vmem:[%s1618_s3 + $0x20] sm:$0xff]  }
  0x11   : > { %1239 = vmatpush3.bf16.msra.mxu1 %v1346_v2  ;;  %1232 = vmatprep.subr.bf16.mxu0 %v1403_v1  ;;  %s1636_s16 = smov (!%p353_p8, %s350_s16), 5  ;;  %v1356_v19 = vld [vmem:[%s1618_s3 + $0x50] sm:$0xff]   ;;  %v1353_v23 = vld [vmem:[%s1618_s3 + $0x48] sm:$0xff]   ;;  %v1358_v26 = vld [vmem:[%s1618_s3 + $0x78] sm:$0xff]   ;;  %s1638_s18 = smov (!%p369_p9, %s1385_s18), 3 }
  0x12   : > { %1240 = vmatprep.subr.bf16.mxu1 %v1403_v1  ;;  %1242 = vmatprep.mubr.msk.bf16.mxu1 %vm1404_vm0, %v1403_v1  ;;  %s337_s11 = sadd.s32 %s1496_s9, %s335_s8  ;;  %s346_s26 = sadd.s32 %s1496_s9, %s1634_s10  ;;  %v1355_v29 = vld [vmem:[%s1618_s3 + $0x40] sm:$0xff]   ;;  %v1360_v32 = vld [vmem:[%s1618_s3 + $0x70] sm:$0xff]   ;;  %v1357_v34 = vld [vmem:[%s1618_s3 + $0x68] sm:$0xff]  }
  0x13   : > { %s1136_s12 = sshll.u32 %s337_s11, 3  ;;  %s1137_s27 = sshll.u32 %s346_s26, 3  ;;  %v1359_v36 = vld [vmem:[%s1618_s3 + $0x60] sm:$0xff]   ;;  %v1361_v37 = vld [vmem:[%s1618_s3 + $0x88] sm:$0xff]  }
  0x14   : > { %1233 = vmatpush3.bf16.msra.mxu0 %v1347_v3  ;;  %s339_s15 = scalar_lea.vmem %s1615_s0, %s1136_s12  ;;  %s348_s7 = scalar_lea.vmem %s1616_s1, %s1137_s27  ;;  %v1362_v38 = vld [vmem:[%s1618_s3 + $0x80] sm:$0xff]  }
  0x15   : > { %1241 = vmatpush3.bf16.msra.mxu1 %v1348_v4  ;;  %1246 = vmatprep.subr.bf16.mxu0 %v1403_v1  ;;  %v379_v5 = vld [vmem:[%s339_s15] sm:$0x3f]  ;;  %s356_s13 = sadd.s32 %s1496_s9, %s1636_s16  ;;  %s1139_s9 = sshll.u32 %s1632_s19, 2 }
  0x16   : > { %1254 = vmatprep.subr.bf16.mxu1 %v1403_v1  ;;  %v380_v7 = vpack.c.bf16 %v379_v5, %v379_v5  ;;  %v570_v12 = vld [vmem:[%s348_s7] sm:$0x3f]  ;;  %s1138_s14 = sshll.u32 %s356_s13, 3  ;;  %s375_s16 = sadd.s32 %s1139_s9, %s1638_s18 }
  0x17   : > { %v571_v15 = vpack.c.bf16 %v570_v12, %v570_v12  ;;  %s358_s27 = scalar_lea.vmem %s1617_s2, %s1138_s14  ;;  %s1140_s28 = sshll.u32 %s375_s16, 2 }
  0x18   : > { %v391_v8 = vshrl.u32 %v380_v7, 16  ;;  %v393_v9 = vshll.u32 %v380_v7, 16  ;;  %1243 = vmatmul.mubr.msk.bf16.vlgmr.msra.gmra.mxu1 %vm409_vm1, %v380_v7  ;;  %v763_v18 = vld [vmem:[%s358_s27] sm:$0x3f]  ;;  %v513_v21 = vrot.slane %v380_v7, 1  ;;  %s377_s8 = scalar_lea.vmem %s1620_s5, %s1140_s28 }
  0x19   : > { %1255 = vmatpush3.bf16.msra.mxu1 %v1350_v6  ;;  %1258 = vmatprep.mubr.msk.bf16.mxu1 %vm1404_vm0, %v1403_v1  ;;  %v764_v20 = vpack.c.bf16 %v763_v18, %v763_v18  ;;  %v640_v22 = vshll.u32 %v571_v15, 16  ;;  %v706_v24 = vrot.slane %v571_v15, 1  ;;  %v638_v27 = vshrl.u32 %v571_v15, 16 }
  0x1a   : > { %v395_v11 = vrot.slane %v393_v9, 1  ;;  %1256 = vmatprep.subr.bf16.mxu1 %v1403_v1 }
  0x1b   : > { %v833_v25 = vshll.u32 %v764_v20, 16  ;;  %v642_v28 = vrot.slane %v640_v22, 1  ;;  %v831_v30 = vshrl.u32 %v764_v20, 16  ;;  %v899_v39 = vrot.slane %v764_v20, 1 }
  0x1c   : > { %v396_v14 = vor.u32 %v395_v11, %v391_v8 }
  0x1d   : > { %1257 = vmatpush3.bf16.msra.mxu1 %v1352_v10  ;;  %v835_v31 = vrot.slane %v833_v25, 1  ;;  %v643_v33 = vor.u32 %v642_v28, %v638_v27 }
  0x1e   : > { %1235 = vmatmul.mubr.msk.bf16.vlgmr.msra.gmra.mxu0 %vm409_vm1, %v396_v14  ;;  %1270 = vmatprep.subr.bf16.mxu1 %v1403_v1 }
  0x1f   : > { %1247 = vmatpush3.bf16.msra.mxu0 %v1349_v13  ;;  %1250 = vmatprep.mubr.msk.bf16.mxu0 %vm1404_vm0, %v1403_v1  ;;  %v836_v35 = vor.u32 %v835_v31, %v831_v30 }
  0x20   : > { %1248 = vmatprep.subr.bf16.mxu0 %v1403_v1  ;;  %1259 = vmatmul.mubr.msk.bf16.vlgmr.msra.gmra.mxu1 %vm409_vm1, %v571_v15 }
  0x21   : > { %1271 = vmatpush3.bf16.msra.mxu1 %v1354_v16  ;;  %1274 = vmatprep.mubr.msk.bf16.mxu1 %vm1404_vm0, %v1403_v1  ;;  %v1200_v16 = vld [vmem:[%s1619_s4] ss:$0 sm:$0xff] }
  0x22   : > { %1272 = vmatprep.subr.bf16.mxu1 %v1403_v1 }
  0x23   : > { %1249 = vmatpush3.bf16.msra.mxu0 %v1351_v17 }
  0x24   : > { %1262 = vmatprep.subr.bf16.mxu0 %v1403_v1 }
  0x25   : > { %1273 = vmatpush3.bf16.msra.mxu1 %v1356_v19 }
  0x26   : > { %1251 = vmatmul.mubr.msk.bf16.vlgmr.msra.gmra.mxu0 %vm409_vm1, %v513_v21  ;;  %1286 = vmatprep.subr.bf16.mxu1 %v1403_v1 }
  0x27   : > { %1263 = vmatpush3.bf16.msra.mxu0 %v1353_v23  ;;  %1266 = vmatprep.mubr.msk.bf16.mxu0 %vm1404_vm0, %v1403_v1 }
  0x28   : > { %1264 = vmatprep.subr.bf16.mxu0 %v1403_v1  ;;  %1275 = vmatmul.mubr.msk.bf16.vlgmr.msra.gmra.mxu1 %vm409_vm1, %v706_v24 }
  0x29   : > { %1287 = vmatpush3.bf16.msra.mxu1 %v1358_v26  ;;  %1290 = vmatprep.mubr.msk.bf16.mxu1 %vm1404_vm0, %v1403_v1 }
  0x2a   : > { %1288 = vmatprep.subr.bf16.mxu1 %v1403_v1 }
  0x2b   : > { %1265 = vmatpush3.bf16.msra.mxu0 %v1355_v29 }
  0x2c   : > { %1278 = vmatprep.subr.bf16.mxu0 %v1403_v1 }
  0x2d   : > { %1289 = vmatpush3.bf16.msra.mxu1 %v1360_v32 }
  0x2e   : > { %1267 = vmatmul.mubr.msk.bf16.vlgmr.msra.gmra.mxu0 %vm409_vm1, %v643_v33 }
  0x2f   : > { %1279 = vmatpush3.bf16.msra.mxu0 %v1357_v34  ;;  %1282 = vmatprep.mubr.msk.bf16.mxu0 %vm1404_vm0, %v1403_v1 }
  0x30   : > { %1280 = vmatprep.subr.bf16.mxu0 %v1403_v1  ;;  %1291 = vmatmul.mubr.msk.bf16.vlgmr.msra.gmra.mxu1 %vm409_vm1, %v836_v35 }
  0x33   : > { %1281 = vmatpush3.bf16.msra.mxu0 %v1359_v36 }
  0x34   : > { %1294 = vmatprep.subr.bf16.mxu0 %v1403_v1 }
  0x36   : > { %1283 = vmatmul.mubr.msk.bf16.vlgmr.msra.gmra.mxu0 %vm409_vm1, %v764_v20 }
  0x37   : > { %1295 = vmatpush3.bf16.msra.mxu0 %v1361_v37  ;;  %1298 = vmatprep.mubr.msk.bf16.mxu0 %vm1404_vm0, %v1403_v1 }
  0x38   : > { %1296 = vmatprep.subr.bf16.mxu0 %v1403_v1 }
  0x3b   : > { %1297 = vmatpush3.bf16.msra.mxu0 %v1362_v38 }
  0x3e   : > { %1299 = vmatmul.mubr.msk.bf16.vlgmr.msra.gmra.mxu0 %vm409_vm1, %v899_v39 }
  0xd8   : > { %v501_v40 = vpop.f32.mrf.mxu1 }
  0xda   : > { %v1244_v41 = vpop.f32.mrf.mxu1 }
  0xdc   : > { %v504_v42 = vpop.f32.mrf.mxu1 }
  0xde   : > { %v447_v43 = vpop.f32.mrf.mxu0  ;;  %v1245_v44 = vpop.f32.mrf.mxu1 }
  0xdf   : > { %v502_v57 = vadd.f32 %v501_v40, %v447_v43 }
  0xe0   : > { %v1236_v45 = vpop.f32.mrf.mxu0  ;;  %v626_v46 = vpop.f32.mrf.mxu1 }
  0xe2   : > { %v450_v47 = vpop.f32.mrf.mxu0  ;;  %v1260_v48 = vpop.f32.mrf.mxu1 }
  0xe4   : > { %v1237_v49 = vpop.f32.mrf.mxu0  ;;  %v629_v50 = vpop.f32.mrf.mxu1 }
  0xe6   : > { %v563_v51 = vpop.f32.mrf.mxu0  ;;  %v1261_v52 = vpop.f32.mrf.mxu1 }
  0xe7   : > { %v569_v60 = vadd.f32 %v563_v51, %v502_v57 }
  0xe8   : > { %v1252_v53 = vpop.f32.mrf.mxu0  ;;  %v756_v54 = vpop.f32.mrf.mxu1 }
  0xe9   : > { %v632_v1 = vadd.f32 %v626_v46, %v569_v60 }
  0xea   : > { %v566_v55 = vpop.f32.mrf.mxu0  ;;  %v1276_v56 = vpop.f32.mrf.mxu1 }
  0xec   : > { %v1253_v58 = vpop.f32.mrf.mxu0  ;;  %v759_v59 = vpop.f32.mrf.mxu1 }
  0xee   : > { %v693_v61 = vpop.f32.mrf.mxu0  ;;  %v1277_v62 = vpop.f32.mrf.mxu1 }
  0xef   : > { %v699_v4 = vadd.f32 %v693_v61, %v632_v1 }
  0xf0   : > { %v1268_v63 = vpop.f32.mrf.mxu0  ;;  %v886_v0 = vpop.f32.mrf.mxu1 }
  0xf1   : > { %v762_v9 = vadd.f32 %v756_v54, %v699_v4 }
  0xf2   : > { %v696_v2 = vpop.f32.mrf.mxu0  ;;  %v1292_v3 = vpop.f32.mrf.mxu1 }
  0xf4   : > { %v1269_v5 = vpop.f32.mrf.mxu0  ;;  %v889_v6 = vpop.f32.mrf.mxu1 }
  0xf6   : > { %v819_v7 = vpop.f32.mrf.mxu0  ;;  %v1293_v8 = vpop.f32.mrf.mxu1 }
  0xf7   : > { %v825_v11 = vadd.f32 %v819_v7, %v762_v9 }
  0xf8   : > { %v1284_v10 = vpop.f32.mrf.mxu0 }
  0xf9   : > { %v892_v14 = vadd.f32 %v886_v0, %v825_v11 }
  0xfa   : > { %v822_v12 = vpop.f32.mrf.mxu0 }
  0xfc   : > { %v1285_v13 = vpop.f32.mrf.mxu0 }
  0xfe   : > { %v949_v15 = vpop.f32.mrf.mxu0 }
  0xff   : > { %v955_v17 = vadd.f32 %v949_v15, %v892_v14 }
 0x100   : > { %v1300_v18 = vpop.f32.mrf.mxu0 }
 0x101   : > { %v963_v19 = vadd.f32 %v1200_v16, %v955_v17 }
 0x102   : > { %v952_v20 = vpop.f32.mrf.mxu0 }
 0x103   : > { %965 = vst.msk [vmem:[%s377_s8] sm:$0xf] %vm964_vm2, %v963_v19 }
 0x104   : > { %v1301_v21 = vpop.f32.mrf.mxu0 }
 0x105 PF: > { %s15_s22 = sadd.s32 1, %s1401_s22   ;;  %s1621_s18 = smov %s1393_s20 }
 0x106   : > { %p12_p10 = scmp.ge.s32.totalorder %s15_s22, 10   ;;  %s1622_s19 = smov %s1397_s21 }
 0x107   : > { %s1623_s20 = smov %s1626_s23  ;;  %s1624_s21 = smov %s1630_s24 }
 0x108   :  { %14 = sbr.rel (!%p12_p10) target bundleno = 3 (0x3), region = 90 }

// kernel: vgg_feature_extractor.21
= control target key start
LH: loop header
LB: loop body
LE: loop exit
PB: predicated region body
PF: predicated region fallthrough
CT: control target
= control target key end

     0   :  { %vm44_vm0 = vcmask 523264   ;;  %s105_s0 = inlined_call_operand.vmem [shape: f32[32,64], index: 0, kind: input, shape index: {}]   ;;  %s106_s1 = inlined_call_operand.vmem [shape: f32[1,64], index: 1, kind: input, shape index: {}]   ;;  %s107_s2 = inlined_call_operand.vmem [shape: f32[1,64], index: 2, kind: input, shape index: {}]   ;;  %s108_s3 = inlined_call_operand.vmem [shape: f32[32,64], index: 3, kind: output, shape index: {}]  }
   0x1   :  { %v14_v0 = vld [vmem:[%s105_s0] sm:$0xff]  ;;  %v15_v4 = vld [vmem:[%s105_s0 + $0x8] sm:$0xff]  ;;  %v16_v5 = vld [vmem:[%s105_s0 + $0x10] sm:$0xff] }
   0x2   :  { %v53_v1 = vld [vmem:[%s106_s1] ss:$0 sm:$0xff]  ;;  %v17_v6 = vld [vmem:[%s105_s0 + $0x18] sm:$0xff] }
   0x3   :  { %v54_v2 = vld [vmem:[%s107_s2] ss:$0 sm:$0xff]  ;;  %v25_v3 = vmul.f32 %v53_v1, %v14_v0  ;;  %v26_v7 = vmul.f32 %v53_v1, %v15_v4  ;;  %v27_v8 = vmul.f32 %v53_v1, %v16_v5  ;;  %v28_v9 = vmul.f32 %v53_v1, %v17_v6 }
   0x5   :  { %v36_v10 = vadd.f32 %v54_v2, %v25_v3  ;;  %v37_v11 = vadd.f32 %v54_v2, %v26_v7  ;;  %v38_v12 = vadd.f32 %v54_v2, %v27_v8  ;;  %v39_v13 = vadd.f32 %v54_v2, %v28_v9 }
   0x7   :  { %v40_v14 = vmax.f32 %v36_v10, 0.0  ;;  %v41_v15 = vmax.f32 %v37_v11, 0.0  ;;  %v42_v16 = vmax.f32 %v38_v12, 0.0  ;;  %v43_v17 = vmax.f32 %v39_v13, 0.0 }
   0x9   :  { %45 = vst.msk [vmem:[%s108_s3] sm:$0xff] %vm44_vm0, %v40_v14  ;;  %46 = vst.msk [vmem:[%s108_s3 + $0x8] sm:$0xff] %vm44_vm0, %v41_v15 }
   0xa   :  { %47 = vst.msk [vmem:[%s108_s3 + $0x10] sm:$0xff] %vm44_vm0, %v42_v16  ;;  %48 = vst.msk [vmem:[%s108_s3 + $0x18] sm:$0xff] %vm44_vm0, %v43_v17 }

// kernel: vgg_feature_extractor.24
= control target key start
LH: loop header
LB: loop body
LE: loop exit
PB: predicated region body
PF: predicated region fallthrough
CT: control target
= control target key end

     0   :  { %s348_s6 = smov 0   ;;  %s350_s7 = smov 0   ;;  %s396_s0 = inlined_call_operand.vmem [shape: f32[2,4,4,64], index: 0, kind: input, shape index: {}]   ;;  %s397_s1 = inlined_call_operand.vmem [shape: f32[2,2,4,64], index: 1, kind: output, shape index: {}]  }
   0x1   :  { %s352_s8 = smov 0   ;;  %s354_s9 = smov 0  }
   0x2   :  { %s356_s10 = smov 0  }
   0x3 LB: > { %s20_s11 = sadd.s32 1, %s328_s8  ;;  %s23_s12 = sadd.s32 1, %s332_s9  ;;  %s336_s10 = sphi %s356_s10, %s11_s10   ;;  %s332_s9 = sphi %s354_s9, %s401_s9   ;;  %s328_s8 = sphi %s352_s8, %s400_s8   ;;  %s324_s7 = sphi %s350_s7, %s399_s7   ;;  %s320_s6 = sphi %s348_s6, %s398_s6  }
   0x4   : > { %p21_p0 = scmp.ge.s32.totalorder %s20_s11, 2  ;;  %p249_p1 = scmp.ge.s32.totalorder %s336_s10, 1 }
   0x5   : > { %p108_p2 = scmp.lt.s32.totalorder %s336_s10, 5 }
   0x6   : > { %s403_s11 = smov (%p21_p0, %s20_s11), 0  ;;  %s405_s12 = smov (!%p21_p0, %s23_s12), %s332_s9 }
   0x7   : > { %p109_p3 = pnand %p249_p1, %p108_p2  ;;  %p25_p4 = scmp.ge.s32.totalorder %s405_s12, 2 }
   0x8   : > { %s250_s13 = sshll.u32 (!%p109_p3), %s320_s6, 1  ;;  %p136_p5 = scmp.lt.s32.totalorder (!%p109_p3), %s324_s7, 1 }
   0x9   : > { %s407_s12 = smov (%p25_p4, %s405_s12), 0  ;;  %112 = sbr.rel (%p109_p3) target bundleno = 23 (0x17), region = 24 }
   0xa   : > { %p138_p6 = scmp.lt.s32.totalorder (!%p109_p3), %s250_s13, 3  ;;  %p147_p7 = scmp.lt.s32.totalorder (!%p109_p3), %s320_s6, 1 }
   0xe   : > { %s409_s7 = smov (!%p136_p5, %s324_s7), 1  ;;  %s411_s13 = smov (!%p138_p6, %s250_s13), 3  ;;  %vm157_vm0 = vcmask 519168  }
   0xf   : > { %s251_s14 = sshll.u32 %s409_s7, 2  ;;  %s253_s20 = sshll.u32 %s409_s7, 1 }
  0x10   : > { %s141_s15 = sadd.s32 %s251_s14, %s411_s13  ;;  %s413_s6 = smov (!%p147_p7, %s320_s6), 1 }
  0x11   : > { %s252_s16 = sshll.u32 %s141_s15, 2  ;;  %s150_s21 = sadd.s32 %s253_s20, %s413_s6 }
  0x12   : > { %s143_s19 = scalar_lea.vmem %s396_s0, %s252_s16  ;;  %s254_s22 = sshll.u32 %s150_s21, 2 }
  0x13   : > { %v153_v0 = vld [vmem:[%s143_s19] sm:$0xf]  ;;  %v255_v1 = vld [vmem:[%s143_s19 + $0x4] sm:$0xf]  ;;  %s152_s25 = scalar_lea.vmem %s397_s1, %s254_s22 }
  0x14   : > { %v156_v2 = vmax.f32 %v153_v0, %v255_v1 }
  0x16   : > { %158 = vst.msk [vmem:[%s152_s25] sm:$0xf] %vm157_vm0, %v156_v2 }
  0x17 PF: > { %s11_s10 = sadd.s32 1, %s336_s10   ;;  %s398_s6 = smov %s328_s8 }
  0x18   : > { %p8_p8 = scmp.ge.s32.totalorder %s11_s10, 6   ;;  %s399_s7 = smov %s332_s9 }
  0x19   : > { %s400_s8 = smov %s403_s11  ;;  %s401_s9 = smov %s407_s12 }
  0x1a   :  { %10 = sbr.rel (!%p8_p8) target bundleno = 3 (0x3), region = 55 }

// kernel: vgg_feature_extractor.22
= control target key start
LH: loop header
LB: loop body
LE: loop exit
PB: predicated region body
PF: predicated region fallthrough
CT: control target
= control target key end

     0   :  { %s1701_s18 = smov 0   ;;  %s1703_s19 = smov 0   ;;  %s1953_s0 = inlined_call_operand.vmem [shape: f32[2,6,6,64], index: 0, kind: input, shape index: {}, may-alias: {0,1,2}]   ;;  %s1954_s1 = inlined_call_operand.vmem [shape: f32[2,6,6,64], index: 1, kind: input, shape index: {}, may-alias: {0,1,2}]   ;;  %s1955_s2 = inlined_call_operand.vmem [shape: f32[2,6,6,64], index: 2, kind: input, shape index: {}, may-alias: {0,1,2}]   ;;  %s1956_s3 = inlined_call_operand.vmem [shape: bf16[9,64,64], index: 3, kind: input, shape index: {}]   ;;  %s1957_s4 = inlined_call_operand.vmem [shape: f32[1,64], index: 4, kind: input, shape index: {}]   ;;  %s1958_s5 = inlined_call_operand.vmem [shape: f32[2,4,4,64], index: 5, kind: output, shape index: {}]  }
   0x1   :  { %s1705_s20 = smov 0   ;;  %s1707_s21 = smov 0  }
   0x2   :  { %s1709_s22 = smov 0  }
   0x3 LB: > { %s27_s23 = sadd.s32 1, %s1659_s20  ;;  %s30_s24 = sadd.s32 1, %s1663_s21  ;;  %s1667_s22 = sphi %s1709_s22, %s15_s22   ;;  %s1663_s21 = sphi %s1707_s21, %s1962_s21   ;;  %s1659_s20 = sphi %s1705_s20, %s1961_s20   ;;  %s1655_s19 = sphi %s1703_s19, %s1960_s19   ;;  %s1651_s18 = sphi %s1701_s18, %s1959_s18  }
   0x4   : > { %p28_p0 = scmp.ge.s32.totalorder %s27_s23, 4  ;;  %p1279_p1 = scmp.ge.s32.totalorder %s1667_s22, 1 }
   0x5   : > { %p270_p2 = scmp.lt.s32.totalorder %s1667_s22, 9 }
   0x6   : > { %s1964_s23 = smov (%p28_p0, %s27_s23), 0  ;;  %s1966_s24 = smov (!%p28_p0, %s30_s24), %s1663_s21 }
   0x7   : > { %p271_p3 = pnand %p1279_p1, %p270_p2  ;;  %p32_p4 = scmp.ge.s32.totalorder %s1966_s24, 2 }
   0x8   : > { %p332_p5 = scmp.lt.s32.totalorder (!%p271_p3), %s1655_s19, 1  ;;  %p334_p6 = scmp.lt.s32.totalorder (!%p271_p3), %s1651_s18, 5 }
   0x9   : > { %s1968_s24 = smov (%p32_p4, %s1966_s24), 0  ;;  %274 = sbr.rel (%p271_p3) target bundleno = 294 (0x126), region = 40 }
   0xa   : > { %s340_s15 = sadd.s32 (!%p271_p3), 1, %s1651_s18  ;;  %p369_p9 = scmp.lt.s32.totalorder (!%p271_p3), %s1651_s18, 3 }
   0xb   : > { %p343_p7 = scmp.lt.s32.totalorder (!%p271_p3), %s340_s15, 5 }
   0xe   : > { %v1593_v0 = vld [vmem:[%s1956_s3 + $0x38] sm:$0xff]   ;;  %v1669_v1 = vmov 0.0   ;;  %v1595_v3 = vld [vmem:[%s1956_s3 + $0x30] sm:$0xff]   ;;  %vm1670_vm0 = vmmov 0   ;;  %s1970_s19 = smov (!%p332_p5, %s1655_s19), 1  ;;  %v1597_v5 = vld [vmem:[%s1956_s3 + $0x28] sm:$0xff]  }
   0xf   : > { %1442 = vmatprep.subr.bf16.mxu0 %v1669_v1  ;;  %1454 = vmatprep.subr.bf16.mxu1 %v1669_v1  ;;  %v1594_v2 = vld [vmem:[%s1956_s3 + $0x18] sm:$0xff]   ;;  %v1596_v4 = vld [vmem:[%s1956_s3 + $0x10] sm:$0xff]   ;;  %s335_s8 = scalar_select %p334_p6, %s1651_s18, 5  ;;  %v1598_v6 = vld [vmem:[%s1956_s3 + $0x8] sm:$0xff]   ;;  %vm429_vm1 = vcmask 523264   ;;  %vm1108_vm2 = vcmask 519168  }
  0x10   : > { %1443 = vmatpush3.bf16.msra.mxu0 %v1593_v0  ;;  %1450 = vmatprep.mubr.msk.bf16.mxu0 %vm1670_vm0, %v1669_v1  ;;  %s1765_s11 = smul.u32 6, %s1970_s19  ;;  %v1599_v7 = vld [vmem:[%s1956_s3 + $0x20] sm:$0xff]   ;;  %v1602_v13 = vld [vmem:[%s1956_s3 + $0x78] sm:$0xff]   ;;  %s1972_s15 = smov (!%p343_p7, %s340_s15), 5  ;;  %v1604_v17 = vld [vmem:[%s1956_s3 + $0x70] sm:$0xff]  }
  0x11   : > { %1455 = vmatpush3.bf16.msra.mxu1 %v1594_v2  ;;  %1444 = vmatprep.subr.bf16.mxu0 %v1669_v1  ;;  %v1600_v8 = vld [vmem:[%s1956_s3] sm:$0xff]   ;;  %v1601_v15 = vld [vmem:[%s1956_s3 + $0x58] sm:$0xff]   ;;  %v1603_v18 = vld [vmem:[%s1956_s3 + $0x50] sm:$0xff]  }
  0x12   : > { %1456 = vmatprep.subr.bf16.mxu1 %v1669_v1  ;;  %1462 = vmatprep.mubr.msk.bf16.mxu1 %vm1670_vm0, %v1669_v1  ;;  %s337_s14 = sadd.s32 %s1765_s11, %s335_s8  ;;  %s346_s10 = sadd.s32 %s1765_s11, %s1972_s15  ;;  %v1606_v19 = vld [vmem:[%s1956_s3 + $0x68] sm:$0xff]   ;;  %v1608_v21 = vld [vmem:[%s1956_s3 + $0x60] sm:$0xff]   ;;  %v1610_v25 = vld [vmem:[%s1956_s3 + $0xb8] sm:$0xff]  }
  0x13   : > { %s1280_s25 = sshll.u32 %s337_s14, 3  ;;  %s1281_s15 = sshll.u32 %s346_s10, 3  ;;  %v1605_v20 = vld [vmem:[%s1956_s3 + $0x48] sm:$0xff]   ;;  %v1607_v23 = vld [vmem:[%s1956_s3 + $0x40] sm:$0xff]   ;;  %v1609_v27 = vld [vmem:[%s1956_s3 + $0x98] sm:$0xff]  }
  0x14   : > { %1445 = vmatpush3.bf16.msra.mxu0 %v1595_v3  ;;  %s339_s30 = scalar_lea.vmem %s1953_s0, %s1280_s25  ;;  %s348_s28 = scalar_lea.vmem %s1954_s1, %s1281_s15  ;;  %v1612_v28 = vld [vmem:[%s1956_s3 + $0xb0] sm:$0xff]   ;;  %v1614_v30 = vld [vmem:[%s1956_s3 + $0xa8] sm:$0xff]   ;;  %v1616_v33 = vld [vmem:[%s1956_s3 + $0xa0] sm:$0xff]  }
  0x15   : > { %1457 = vmatpush3.bf16.msra.mxu1 %v1596_v4  ;;  %1446 = vmatprep.subr.bf16.mxu0 %v1669_v1  ;;  %v379_v9 = vld [vmem:[%s339_s30] sm:$0x3f]  ;;  %s350_s8 = sadd.s32 2, %s1651_s18  ;;  %v1611_v29 = vld [vmem:[%s1956_s3 + $0x90] sm:$0xff]   ;;  %v1613_v32 = vld [vmem:[%s1956_s3 + $0x88] sm:$0xff]   ;;  %s1976_s18 = smov (!%p369_p9, %s1651_s18), 3 }
  0x16   : > { %1458 = vmatprep.subr.bf16.mxu1 %v1669_v1  ;;  %v380_v10 = vpack.c.bf16 %v379_v9, %v379_v9  ;;  %v618_v22 = vld [vmem:[%s348_s28] sm:$0x3f]  ;;  %p353_p8 = scmp.lt.s32.totalorder %s350_s8, 5  ;;  %v1618_v38 = vld [vmem:[%s1956_s3 + $0xf8] sm:$0xff]   ;;  %v1620_v43 = vld [vmem:[%s1956_s3 + $0xf0] sm:$0xff]   ;;  %s1283_s28 = sshll.u32 %s1970_s19, 2 }
  0x17   : > { %v619_v24 = vpack.c.bf16 %v618_v22, %v618_v22  ;;  %v1615_v36 = vld [vmem:[%s1956_s3 + $0x80] sm:$0xff]   ;;  %v1617_v41 = vld [vmem:[%s1956_s3 + $0xd8] sm:$0xff]   ;;  %v1619_v44 = vld [vmem:[%s1956_s3 + $0xd0] sm:$0xff]   ;;  %s375_s29 = sadd.s32 %s1283_s28, %s1976_s18 }
  0x18   : > { %1447 = vmatpush3.bf16.msra.mxu0 %v1597_v5  ;;  %v399_v11 = vshrl.u32 %v380_v10, 16  ;;  %v401_v12 = vshll.u32 %v380_v10, 16  ;;  %v549_v26 = vrot.slane %v380_v10, 1  ;;  %s1974_s8 = smov (!%p353_p8, %s350_s8), 5  ;;  %v1622_v46 = vld [vmem:[%s1956_s3 + $0xe8] sm:$0xff]   ;;  %v1624_v50 = vld [vmem:[%s1956_s3 + $0xe0] sm:$0xff]  }
  0x19   : > { %1459 = vmatpush3.bf16.msra.mxu1 %v1598_v6  ;;  %1448 = vmatprep.subr.bf16.mxu0 %v1669_v1  ;;  %s356_s27 = sadd.s32 %s1765_s11, %s1974_s8  ;;  %v708_v31 = vshll.u32 %v619_v24, 16  ;;  %v706_v34 = vshrl.u32 %v619_v24, 16  ;;  %v790_v37 = vrot.slane %v619_v24, 1  ;;  %v1621_v47 = vld [vmem:[%s1956_s3 + $0xc8] sm:$0xff]   ;;  %v1623_v51 = vld [vmem:[%s1956_s3 + $0xc0] sm:$0xff]   ;;  %v1625_v53 = vld [vmem:[%s1956_s3 + $0x118] sm:$0xff]  }
  0x1a   : > { %1460 = vmatprep.subr.bf16.mxu1 %v1669_v1  ;;  %v403_v14 = vrot.slane %v401_v12, 1  ;;  %s1282_s7 = sshll.u32 %s356_s27, 3  ;;  %v1626_v54 = vld [vmem:[%s1956_s3 + $0x110] sm:$0xff]   ;;  %v1627_v55 = vld [vmem:[%s1956_s3 + $0x108] sm:$0xff]   ;;  %v1628_v56 = vld [vmem:[%s1956_s3 + $0x100] sm:$0xff]   ;;  %s1284_s30 = sshll.u32 %s375_s29, 2 }
  0x1b   : > { %v710_v35 = vrot.slane %v708_v31, 1  ;;  %s358_s12 = scalar_lea.vmem %s1955_s2, %s1282_s7  ;;  %s377_s11 = scalar_lea.vmem %s1958_s5, %s1284_s30 }
  0x1c   : > { %1449 = vmatpush3.bf16.msra.mxu0 %v1599_v7  ;;  %v404_v16 = vor.u32 %v403_v14, %v399_v11  ;;  %v859_v39 = vld [vmem:[%s358_s12] sm:$0x3f] }
  0x1d   : > { %1461 = vmatpush3.bf16.msra.mxu1 %v1600_v8  ;;  %1466 = vmatprep.subr.bf16.mxu0 %v1669_v1  ;;  %v711_v40 = vor.u32 %v710_v35, %v706_v34  ;;  %v860_v42 = vpack.c.bf16 %v859_v39, %v859_v39  ;;  %v1394_v34 = vld [vmem:[%s1957_s4] ss:$0 sm:$0xff] }
  0x1e   : > { %1478 = vmatprep.subr.bf16.mxu1 %v1669_v1 }
  0x1f   : > { %1451 = vmatmul.mubr.msk.bf16.vlgmr.msra.gmra.mxu0 %vm429_vm1, %v404_v16  ;;  %v949_v45 = vshll.u32 %v860_v42, 16  ;;  %v947_v48 = vshrl.u32 %v860_v42, 16  ;;  %v1031_v57 = vrot.slane %v860_v42, 1 }
  0x20   : > { %1463 = vmatmul.mubr.msk.bf16.vlgmr.msra.gmra.mxu1 %vm429_vm1, %v380_v10  ;;  %1467 = vmatpush3.bf16.msra.mxu0 %v1601_v15 }
  0x21   : > { %1479 = vmatpush3.bf16.msra.mxu1 %v1602_v13  ;;  %1486 = vmatprep.mubr.msk.bf16.mxu1 %vm1670_vm0, %v1669_v1  ;;  %v951_v49 = vrot.slane %v949_v45, 1 }
  0x22   : > { %1480 = vmatprep.subr.bf16.mxu1 %v1669_v1  ;;  %1474 = vmatprep.mubr.msk.bf16.mxu0 %vm1670_vm0, %v1669_v1 }
  0x23   : > { %1468 = vmatprep.subr.bf16.mxu0 %v1669_v1  ;;  %v952_v52 = vor.u32 %v951_v49, %v947_v48 }
  0x24   : > { %1469 = vmatpush3.bf16.msra.mxu0 %v1603_v18 }
  0x25   : > { %1481 = vmatpush3.bf16.msra.mxu1 %v1604_v17  ;;  %1470 = vmatprep.subr.bf16.mxu0 %v1669_v1 }
  0x26   : > { %1482 = vmatprep.subr.bf16.mxu1 %v1669_v1 }
  0x28   : > { %1471 = vmatpush3.bf16.msra.mxu0 %v1605_v20 }
  0x29   : > { %1483 = vmatpush3.bf16.msra.mxu1 %v1606_v19  ;;  %1472 = vmatprep.subr.bf16.mxu0 %v1669_v1 }
  0x2a   : > { %1484 = vmatprep.subr.bf16.mxu1 %v1669_v1 }
  0x2c   : > { %1473 = vmatpush3.bf16.msra.mxu0 %v1607_v23 }
  0x2d   : > { %1485 = vmatpush3.bf16.msra.mxu1 %v1608_v21  ;;  %1490 = vmatprep.subr.bf16.mxu0 %v1669_v1 }
  0x2e   : > { %1502 = vmatprep.subr.bf16.mxu1 %v1669_v1 }
  0x2f   : > { %1475 = vmatmul.mubr.msk.bf16.vlgmr.msra.gmra.mxu0 %vm429_vm1, %v549_v26 }
  0x30   : > { %1487 = vmatmul.mubr.msk.bf16.vlgmr.msra.gmra.mxu1 %vm429_vm1, %v619_v24  ;;  %1491 = vmatpush3.bf16.msra.mxu0 %v1609_v27 }
  0x31   : > { %1503 = vmatpush3.bf16.msra.mxu1 %v1610_v25  ;;  %1510 = vmatprep.mubr.msk.bf16.mxu1 %vm1670_vm0, %v1669_v1 }
  0x32   : > { %1504 = vmatprep.subr.bf16.mxu1 %v1669_v1  ;;  %1498 = vmatprep.mubr.msk.bf16.mxu0 %vm1670_vm0, %v1669_v1 }
  0x33   : > { %1492 = vmatprep.subr.bf16.mxu0 %v1669_v1 }
  0x34   : > { %1493 = vmatpush3.bf16.msra.mxu0 %v1611_v29 }
  0x35   : > { %1505 = vmatpush3.bf16.msra.mxu1 %v1612_v28  ;;  %1494 = vmatprep.subr.bf16.mxu0 %v1669_v1 }
  0x36   : > { %1506 = vmatprep.subr.bf16.mxu1 %v1669_v1 }
  0x38   : > { %1495 = vmatpush3.bf16.msra.mxu0 %v1613_v32 }
  0x39   : > { %1507 = vmatpush3.bf16.msra.mxu1 %v1614_v30  ;;  %1496 = vmatprep.subr.bf16.mxu0 %v1669_v1 }
  0x3a   : > { %1508 = vmatprep.subr.bf16.mxu1 %v1669_v1 }
  0x3c   : > { %1497 = vmatpush3.bf16.msra.mxu0 %v1615_v36 }
  0x3d   : > { %1509 = vmatpush3.bf16.msra.mxu1 %v1616_v33  ;;  %1514 = vmatprep.subr.bf16.mxu0 %v1669_v1 }
  0x3e   : > { %1526 = vmatprep.subr.bf16.mxu1 %v1669_v1 }
  0x3f   : > { %1499 = vmatmul.mubr.msk.bf16.vlgmr.msra.gmra.mxu0 %vm429_vm1, %v711_v40 }
  0x40   : > { %1511 = vmatmul.mubr.msk.bf16.vlgmr.msra.gmra.mxu1 %vm429_vm1, %v790_v37  ;;  %1515 = vmatpush3.bf16.msra.mxu0 %v1617_v41 }
  0x41   : > { %1527 = vmatpush3.bf16.msra.mxu1 %v1618_v38  ;;  %1534 = vmatprep.mubr.msk.bf16.mxu1 %vm1670_vm0, %v1669_v1 }
  0x42   : > { %1528 = vmatprep.subr.bf16.mxu1 %v1669_v1  ;;  %1522 = vmatprep.mubr.msk.bf16.mxu0 %vm1670_vm0, %v1669_v1 }
  0x43   : > { %1516 = vmatprep.subr.bf16.mxu0 %v1669_v1 }
  0x44   : > { %1517 = vmatpush3.bf16.msra.mxu0 %v1619_v44 }
  0x45   : > { %1529 = vmatpush3.bf16.msra.mxu1 %v1620_v43  ;;  %1518 = vmatprep.subr.bf16.mxu0 %v1669_v1 }
  0x46   : > { %1530 = vmatprep.subr.bf16.mxu1 %v1669_v1 }
  0x48   : > { %1519 = vmatpush3.bf16.msra.mxu0 %v1621_v47 }
  0x49   : > { %1531 = vmatpush3.bf16.msra.mxu1 %v1622_v46  ;;  %1520 = vmatprep.subr.bf16.mxu0 %v1669_v1 }
  0x4a   : > { %1532 = vmatprep.subr.bf16.mxu1 %v1669_v1 }
  0x4c   : > { %1521 = vmatpush3.bf16.msra.mxu0 %v1623_v51 }
  0x4d   : > { %1533 = vmatpush3.bf16.msra.mxu1 %v1624_v50  ;;  %1538 = vmatprep.subr.bf16.mxu0 %v1669_v1 }
  0x4f   : > { %1523 = vmatmul.mubr.msk.bf16.vlgmr.msra.gmra.mxu0 %vm429_vm1, %v860_v42 }
  0x50   : > { %1535 = vmatmul.mubr.msk.bf16.vlgmr.msra.gmra.mxu1 %vm429_vm1, %v952_v52  ;;  %1539 = vmatpush3.bf16.msra.mxu0 %v1625_v53 }
  0x51   : > { %1546 = vmatprep.mubr.msk.bf16.mxu0 %vm1670_vm0, %v1669_v1  ;;  %1540 = vmatprep.subr.bf16.mxu0 %v1669_v1 }
  0x54   : > { %1541 = vmatpush3.bf16.msra.mxu0 %v1626_v54 }
  0x55   : > { %1542 = vmatprep.subr.bf16.mxu0 %v1669_v1 }
  0x58   : > { %1543 = vmatpush3.bf16.msra.mxu0 %v1627_v55 }
  0x59   : > { %1544 = vmatprep.subr.bf16.mxu0 %v1669_v1 }
  0x5c   : > { %1545 = vmatpush3.bf16.msra.mxu0 %v1628_v56 }
  0x5f   : > { %1547 = vmatmul.mubr.msk.bf16.vlgmr.msra.gmra.mxu0 %vm429_vm1, %v1031_v57 }
  0xdf   : > { %v467_v59 = vpop.f32.mrf.mxu0 }
  0xe0   : > { %v533_v58 = vpop.f32.mrf.mxu1 }
  0xe1   : > { %v1452_v61 = vpop.f32.mrf.mxu0  ;;  %v534_v18 = vadd.f32 %v533_v58, %v467_v59 }
  0xe2   : > { %v1464_v60 = vpop.f32.mrf.mxu1 }
  0xe3   : > { %v470_v63 = vpop.f32.mrf.mxu0 }
  0xe4   : > { %v536_v62 = vpop.f32.mrf.mxu1 }
  0xe5   : > { %v1453_v2 = vpop.f32.mrf.mxu0 }
  0xe6   : > { %v1465_v0 = vpop.f32.mrf.mxu1 }
  0xef   : > { %v611_v4 = vpop.f32.mrf.mxu0 }
  0xf0   : > { %v690_v3 = vpop.f32.mrf.mxu1  ;;  %v617_v20 = vadd.f32 %v611_v4, %v534_v18 }
  0xf1   : > { %v1476_v6 = vpop.f32.mrf.mxu0 }
  0xf2   : > { %v1488_v5 = vpop.f32.mrf.mxu1  ;;  %v696_v25 = vadd.f32 %v690_v3, %v617_v20 }
  0xf3   : > { %v614_v8 = vpop.f32.mrf.mxu0 }
  0xf4   : > { %v693_v7 = vpop.f32.mrf.mxu1 }
  0xf5   : > { %v1477_v1 = vpop.f32.mrf.mxu0 }
  0xf6   : > { %v1489_v9 = vpop.f32.mrf.mxu1 }
  0xff   : > { %v773_v11 = vpop.f32.mrf.mxu0 }
 0x100   : > { %v852_v10 = vpop.f32.mrf.mxu1  ;;  %v779_v28 = vadd.f32 %v773_v11, %v696_v25 }
 0x101   : > { %v1500_v13 = vpop.f32.mrf.mxu0 }
 0x102   : > { %v1512_v12 = vpop.f32.mrf.mxu1  ;;  %v858_v30 = vadd.f32 %v852_v10, %v779_v28 }
 0x103   : > { %v776_v15 = vpop.f32.mrf.mxu0 }
 0x104   : > { %v855_v14 = vpop.f32.mrf.mxu1 }
 0x105   : > { %v1501_v17 = vpop.f32.mrf.mxu0 }
 0x106   : > { %v1513_v16 = vpop.f32.mrf.mxu1 }
 0x10f   : > { %v931_v21 = vpop.f32.mrf.mxu0 }
 0x110   : > { %v1014_v19 = vpop.f32.mrf.mxu1  ;;  %v937_v31 = vadd.f32 %v931_v21, %v858_v30 }
 0x111   : > { %v1524_v23 = vpop.f32.mrf.mxu0 }
 0x112   : > { %v1536_v22 = vpop.f32.mrf.mxu1  ;;  %v1020_v32 = vadd.f32 %v1014_v19, %v937_v31 }
 0x113   : > { %v934_v26 = vpop.f32.mrf.mxu0 }
 0x114   : > { %v1017_v24 = vpop.f32.mrf.mxu1 }
 0x115   : > { %v1525_v29 = vpop.f32.mrf.mxu0 }
 0x116   : > { %v1537_v27 = vpop.f32.mrf.mxu1 }
 0x11f   : > { %v1093_v33 = vpop.f32.mrf.mxu0 }
 0x120   : > { %v1099_v35 = vadd.f32 %v1093_v33, %v1020_v32 }
 0x121   : > { %v1548_v36 = vpop.f32.mrf.mxu0 }
 0x122   : > { %v1107_v37 = vadd.f32 %v1394_v34, %v1099_v35 }
 0x123   : > { %v1096_v38 = vpop.f32.mrf.mxu0 }
 0x124   : > { %1109 = vst.msk [vmem:[%s377_s11] sm:$0xf] %vm1108_vm2, %v1107_v37 }
 0x125   : > { %v1549_v39 = vpop.f32.mrf.mxu0 }
 0x126 PF: > { %s15_s22 = sadd.s32 1, %s1667_s22   ;;  %s1959_s18 = smov %s1659_s20 }
 0x127   : > { %p12_p10 = scmp.ge.s32.totalorder %s15_s22, 10   ;;  %s1960_s19 = smov %s1663_s21 }
 0x128   : > { %s1961_s20 = smov %s1964_s23  ;;  %s1962_s21 = smov %s1968_s24 }
 0x129   :  { %14 = sbr.rel (!%p12_p10) target bundleno = 3 (0x3), region = 90 }

// kernel: vgg_feature_extractor.25
= control target key start
LH: loop header
LB: loop body
LE: loop exit
PB: predicated region body
PF: predicated region fallthrough
CT: control target
= control target key end

     0   :  { %s1005_s15 = smov 0   ;;  %s1007_s16 = smov 0   ;;  %s1124_s0 = inlined_call_operand.vmem [shape: f32[2,2,4,64], index: 0, kind: input, shape index: {}, may-alias: {0,1}]   ;;  %s1125_s1 = inlined_call_operand.vmem [shape: f32[2,2,4,64], index: 1, kind: input, shape index: {}, may-alias: {0,1}]   ;;  %s1126_s2 = inlined_call_operand.vmem [shape: bf16[4,64,64], index: 2, kind: input, shape index: {}]   ;;  %s1127_s3 = inlined_call_operand.vmem [shape: f32[1,64], index: 3, kind: input, shape index: {}]   ;;  %s1128_s4 = inlined_call_operand.vmem [shape: f32[2,1,3,64], index: 4, kind: output, shape index: {}]  }
   0x1   :  { %s1009_s17 = smov 0  }
   0x2 LB: > { %s29_s18 = sadd.s32 1, %s972_s16  ;;  %p787_p0 = scmp.ge.s32.totalorder %s976_s17, 1  ;;  %s976_s17 = sphi %s1009_s17, %s14_s17   ;;  %s972_s16 = sphi %s1007_s16, %s1130_s16   ;;  %s968_s15 = sphi %s1005_s15, %s1129_s15  }
   0x3   : > { %p31_p1 = scmp.ge.s32.totalorder %s29_s18, 2  ;;  %p226_p2 = scmp.lt.s32.totalorder %s976_s17, 3 }
   0x5   : > { %s1132_s18 = smov (%p31_p1, %s29_s18), 0  ;;  %p227_p3 = pnand %p787_p0, %p226_p2 }
   0x6   : > { %p276_p4 = scmp.lt.s32.totalorder (!%p227_p3), %s968_s15, 1 }
   0x7   : > { %230 = sbr.rel (%p227_p3) target bundleno = 247 (0xf7), region = 36 }
   0xc   : > { %v938_v0 = vld [vmem:[%s1126_s2 + $0x38] sm:$0xff]   ;;  %v978_v1 = vmov 0.0   ;;  %v940_v3 = vld [vmem:[%s1126_s2 + $0x30] sm:$0xff]   ;;  %vm979_vm0 = vmmov 0   ;;  %s1134_s15 = smov (!%p276_p4, %s968_s15), 1  ;;  %v942_v5 = vld [vmem:[%s1126_s2 + $0x28] sm:$0xff]  }
   0xd   : > { %864 = vmatprep.subr.bf16.mxu0 %v978_v1  ;;  %876 = vmatprep.subr.bf16.mxu1 %v978_v1  ;;  %v939_v2 = vld [vmem:[%s1126_s2 + $0x18] sm:$0xff]   ;;  %v941_v4 = vld [vmem:[%s1126_s2 + $0x10] sm:$0xff]   ;;  %s840_s29 = sshll.u32 %s1134_s15, 3  ;;  %v943_v6 = vld [vmem:[%s1126_s2 + $0x8] sm:$0xff]   ;;  %vm362_vm1 = vcmask 523264   ;;  %s792_s13 = sshll.u32 %s1134_s15, 2 }
   0xe   : > { %865 = vmatpush3.bf16.msra.mxu0 %v938_v0  ;;  %872 = vmatprep.mubr.msk.bf16.mxu0 %vm979_vm0, %v978_v1  ;;  %s283_s8 = scalar_lea.vmem %s1124_s0, %s840_s29  ;;  %v944_v9 = vld [vmem:[%s1126_s2 + $0x20] sm:$0xff]   ;;  %s842_s11 = sadd.s32 4, %s840_s29  ;;  %v946_v14 = vld [vmem:[%s1126_s2 + $0x58] sm:$0xff]   ;;  %v948_v18 = vld [vmem:[%s1126_s2 + $0x50] sm:$0xff]   ;;  %vm643_vm2 = vcmask 518144  }
   0xf   : > { %877 = vmatpush3.bf16.msra.mxu1 %v939_v2  ;;  %866 = vmatprep.subr.bf16.mxu0 %v978_v1  ;;  %v312_v7 = vld [vmem:[%s283_s8] sm:$0xf]  ;;  %s292_s20 = scalar_lea.vmem %s1125_s1, %s842_s11  ;;  %v947_v16 = vld [vmem:[%s1126_s2 + $0x78] sm:$0xff]   ;;  %v949_v20 = vld [vmem:[%s1126_s2 + $0x70] sm:$0xff]  }
  0x10   : > { %878 = vmatprep.subr.bf16.mxu1 %v978_v1  ;;  %884 = vmatprep.mubr.msk.bf16.mxu1 %vm979_vm0, %v978_v1  ;;  %v313_v8 = vpack.c.bf16 %v312_v7, %v312_v7  ;;  %v945_v10 = vld [vmem:[%s1126_s2] sm:$0xff]   ;;  %v950_v21 = vld [vmem:[%s1126_s2 + $0x48] sm:$0xff]  }
  0x11   : > { %v472_v17 = vld [vmem:[%s292_s20] sm:$0xf]  ;;  %v951_v23 = vld [vmem:[%s1126_s2 + $0x68] sm:$0xff]   ;;  %s310_s20 = scalar_lea.vmem %s1128_s4, %s792_s13 }
  0x12   : > { %867 = vmatpush3.bf16.msra.mxu0 %v940_v3  ;;  %v332_v11 = vshrl.u32 %v313_v8, 16  ;;  %v334_v12 = vshll.u32 %v313_v8, 16  ;;  %v473_v19 = vpack.c.bf16 %v472_v17, %v472_v17  ;;  %v952_v24 = vld [vmem:[%s1126_s2 + $0x40] sm:$0xff]  }
  0x13   : > { %879 = vmatpush3.bf16.msra.mxu1 %v941_v4  ;;  %868 = vmatprep.subr.bf16.mxu0 %v978_v1  ;;  %v953_v27 = vld [vmem:[%s1126_s2 + $0x60] sm:$0xff]  }
  0x14   : > { %880 = vmatprep.subr.bf16.mxu1 %v978_v1  ;;  %v336_v13 = vrot.slane %v334_v12, 1  ;;  %v562_v22 = vshll.u32 %v473_v19, 16  ;;  %v560_v25 = vshrl.u32 %v473_v19, 16  ;;  %v837_v41 = vld [vmem:[%s1127_s3] ss:$0 sm:$0xff] }
  0x16   : > { %869 = vmatpush3.bf16.msra.mxu0 %v942_v5  ;;  %v337_v15 = vor.u32 %v336_v13, %v332_v11  ;;  %v564_v26 = vrot.slane %v562_v22, 1 }
  0x17   : > { %881 = vmatpush3.bf16.msra.mxu1 %v943_v6  ;;  %870 = vmatprep.subr.bf16.mxu0 %v978_v1 }
  0x18   : > { %882 = vmatprep.subr.bf16.mxu1 %v978_v1  ;;  %v565_v28 = vor.u32 %v564_v26, %v560_v25 }
  0x1a   : > { %871 = vmatpush3.bf16.msra.mxu0 %v944_v9 }
  0x1b   : > { %883 = vmatpush3.bf16.msra.mxu1 %v945_v10  ;;  %888 = vmatprep.subr.bf16.mxu0 %v978_v1 }
  0x1c   : > { %900 = vmatprep.subr.bf16.mxu1 %v978_v1 }
  0x1d   : > { %873 = vmatmul.mubr.msk.bf16.vlgmr.msra.gmra.mxu0 %vm362_vm1, %v337_v15 }
  0x1e   : > { %885 = vmatmul.mubr.msk.bf16.vlgmr.msra.gmra.mxu1 %vm362_vm1, %v313_v8  ;;  %889 = vmatpush3.bf16.msra.mxu0 %v946_v14 }
  0x1f   : > { %901 = vmatpush3.bf16.msra.mxu1 %v947_v16  ;;  %890 = vmatprep.subr.bf16.mxu0 %v978_v1 }
  0x20   : > { %902 = vmatprep.subr.bf16.mxu1 %v978_v1  ;;  %896 = vmatprep.mubr.msk.bf16.mxu0 %vm979_vm0, %v978_v1 }
  0x21   : > { %908 = vmatprep.mubr.msk.bf16.mxu1 %vm979_vm0, %v978_v1 }
  0x22   : > { %891 = vmatpush3.bf16.msra.mxu0 %v948_v18 }
  0x23   : > { %903 = vmatpush3.bf16.msra.mxu1 %v949_v20  ;;  %892 = vmatprep.subr.bf16.mxu0 %v978_v1 }
  0x24   : > { %904 = vmatprep.subr.bf16.mxu1 %v978_v1 }
  0x26   : > { %893 = vmatpush3.bf16.msra.mxu0 %v950_v21 }
  0x27   : > { %905 = vmatpush3.bf16.msra.mxu1 %v951_v23  ;;  %894 = vmatprep.subr.bf16.mxu0 %v978_v1 }
  0x28   : > { %906 = vmatprep.subr.bf16.mxu1 %v978_v1 }
  0x2a   : > { %895 = vmatpush3.bf16.msra.mxu0 %v952_v24 }
  0x2b   : > { %907 = vmatpush3.bf16.msra.mxu1 %v953_v27 }
  0x2d   : > { %897 = vmatmul.mubr.msk.bf16.vlgmr.msra.gmra.mxu0 %vm362_vm1, %v473_v19 }
  0x2e   : > { %909 = vmatmul.mubr.msk.bf16.vlgmr.msra.gmra.mxu1 %vm362_vm1, %v565_v28 }
  0xdd   : > { %v400_v29 = vpop.f32.mrf.mxu0 }
  0xde   : > { %v466_v30 = vpop.f32.mrf.mxu1 }
  0xdf   : > { %v874_v31 = vpop.f32.mrf.mxu0  ;;  %v467_v37 = vadd.f32 %v466_v30, %v400_v29 }
  0xe0   : > { %v886_v32 = vpop.f32.mrf.mxu1 }
  0xe1   : > { %v403_v33 = vpop.f32.mrf.mxu0 }
  0xe2   : > { %v469_v34 = vpop.f32.mrf.mxu1 }
  0xe3   : > { %v875_v35 = vpop.f32.mrf.mxu0 }
  0xe4   : > { %v887_v36 = vpop.f32.mrf.mxu1 }
  0xed   : > { %v544_v38 = vpop.f32.mrf.mxu0 }
  0xee   : > { %v550_v39 = vadd.f32 %v544_v38, %v467_v37  ;;  %v627_v40 = vpop.f32.mrf.mxu1 }
  0xef   : > { %v898_v42 = vpop.f32.mrf.mxu0 }
  0xf0   : > { %v633_v43 = vadd.f32 %v627_v40, %v550_v39  ;;  %v910_v44 = vpop.f32.mrf.mxu1 }
  0xf1   : > { %v547_v45 = vpop.f32.mrf.mxu0 }
  0xf2   : > { %v641_v46 = vadd.f32 %v837_v41, %v633_v43  ;;  %v630_v47 = vpop.f32.mrf.mxu1 }
  0xf3   : > { %v899_v48 = vpop.f32.mrf.mxu0 }
  0xf4   : > { %v642_v49 = vmax.f32 %v641_v46, 0.0  ;;  %v911_v50 = vpop.f32.mrf.mxu1 }
  0xf6   : > { %644 = vst.msk [vmem:[%s310_s20] sm:$0x7] %vm643_vm2, %v642_v49 }
  0xf7 PF: > { %s14_s17 = sadd.s32 1, %s976_s17   ;;  %s1129_s15 = smov %s972_s16 }
  0xf8   : > { %p11_p5 = scmp.ge.s32.totalorder %s14_s17, 4   ;;  %s1130_s16 = smov %s1132_s18 }
  0xfa   :  { %13 = sbr.rel (!%p11_p5) target bundleno = 2 (0x2), region = 78 }

</bundles_post_ra>
